<compile_context>
chip_gen: v7x
topology: tpu7x:2x2x1
jax: 0.10.0
libtpu: 0.0.40
codegen_flags: <defaults>
</compile_context>

<pallas_src>
import functools

import jax
import jax.numpy as jnp
from jax import lax
from jax.experimental import pallas as pl
from jax.experimental.pallas import tpu as pltpu


def _mobile_block_kernel(x_ref, mask_ref, w1t_ref, b1_ref, dw_ref, b2_ref,
                         w3t_ref, b3_ref, o_ref,
                         *, W, HW, block_n, use_res_connect, matmul_dtype):
    """Processes `block_n` images per grid step.

    Layout: channels in sublanes, flattened H*W in lanes (lane-dense stores).
    """
    # Grid-constant operands: load once per step, reuse across all images.
    w1t = w1t_ref[...].astype(matmul_dtype)        # (hidden, Cin), BN-folded
    w3t = w3t_ref[...].astype(matmul_dtype)        # (Cout, hidden), BN-folded
    b1 = b1_ref[...]                               # (hidden, 1)
    b2 = b2_ref[...]                               # (hidden, 1)
    b3 = b3_ref[...]                               # (Cout, 1)
    dwt = dw_ref[...]                              # (hidden, 9), BN-folded
    mask = mask_ref[...]                           # (9, HW) border masks (0/1 f32)

    def body(b, carry):
        x = x_ref[b].astype(jnp.float32)           # (Cin, HW)

        # ---- 1x1 expand conv (BN-folded) + bias + ReLU6 ----
        h = jnp.dot(w1t, x.astype(matmul_dtype),
                    preferred_element_type=jnp.float32)
        h = jnp.clip(h + b1, 0.0, 6.0)             # (hidden, HW)

        # ---- 3x3 depthwise conv, stride 1, padding 1 ----
        # Off-center taps are lane-rolls (XLU slot) of the flattened H*W axis;
        # wraparound / border contributions are zeroed with the precomputed
        # multiplicative masks.  Accumulator starts at the (unmasked) center.
        acc = h * dwt[:, 4:5]
        for dy in range(3):
            for dx in range(3):
                t = dy * 3 + dx
                if t == 4:
                    continue                       # center tap already in acc
                off = (dy - 1) * W + (dx - 1)
                tap = pltpu.roll(h, shift=(-off) % HW, axis=1)
                acc = acc + (tap * dwt[:, t:t + 1]) * mask[t:t + 1, :]
        y = jnp.clip(acc + b2, 0.0, 6.0)           # (hidden, HW)

        # ---- 1x1 project conv (BN-folded) + bias (+ residual) ----
        out = jnp.dot(w3t, y.astype(matmul_dtype),
                      preferred_element_type=jnp.float32)
        out = out + b3                             # (Cout, HW)
        if use_res_connect:
            # Re-read x here (cheap vld) instead of holding it live all along.
            out = out + x_ref[b].astype(jnp.float32)
        o_ref[b] = out.astype(o_ref.dtype)
        return carry

    lax.fori_loop(0, block_n, body, 0, unroll=True)


def _pick_block_n(n):
    """Largest divisor of n that is <= 8, preferring to keep >= 2 grid steps
    (so v7x's two TensorCores both get work)."""
    candidates = [d for d in range(1, 9) if n % d == 0]
    two_step = [d for d in candidates if n // d >= 2]
    return max(two_step) if two_step else max(candidates)


def mobile_block_pallas(x_nchw, params, use_res_connect, *,
                        matmul_dtype=jnp.float32, block_n=None):
    """x_nchw: (N, Cin, H, W) float32. Returns (N, Cout, H, W)."""
    N, Cin, H, W = x_nchw.shape
    HW = H * W
    w1, s1, b1, dw, s2, b2, w3, s3, b3 = params
    hidden = w1.shape[1]
    Cout = w3.shape[1]

    if use_res_connect and Cin != Cout:
        raise ValueError("Residual connection requires in_channels == out_channels")

    if block_n is None:
        block_n = _pick_block_n(N)
    assert N % block_n == 0, (N, block_n)

    # Fold BN scales into the conv weights (once, outside the kernel) and lay
    # weights out for (C, H*W) slabs: channels in sublanes.
    w1t = (w1 * s1[None, :]).T                              # (hidden, Cin)
    dwf = (dw * s2[None, None, :]).reshape(9, hidden).T     # (hidden, 9), tap = dy*3+dx
    w3t = (w3 * s3[None, :]).T                              # (Cout, hidden)
    b1c = b1.reshape(hidden, 1)
    b2c = b2.reshape(hidden, 1)
    b3c = b3.reshape(Cout, 1)

    # Precomputed multiplicative border masks, one row per tap: (9, HW).
    pos = jnp.arange(HW, dtype=jnp.int32)
    row = pos // W
    col = pos % W
    ones = jnp.ones((HW,), dtype=bool)
    row_ok = {0: row >= 1, 1: ones, 2: row <= H - 2}
    col_ok = {0: col >= 1, 1: ones, 2: col <= W - 2}
    mask9 = jnp.stack([(row_ok[dy] & col_ok[dx]).astype(jnp.float32)
                       for dy in range(3) for dx in range(3)])   # (9, HW)

    # NCHW -> (N, C, H*W) is a free reshape (no HBM transpose); same on output.
    x = x_nchw.reshape(N, Cin, HW)

    kernel = functools.partial(_mobile_block_kernel, W=W, HW=HW,
                               block_n=block_n,
                               use_res_connect=use_res_connect,
                               matmul_dtype=matmul_dtype)
    out = pl.pallas_call(
        kernel,
        out_shape=jax.ShapeDtypeStruct((N, Cout, HW), x_nchw.dtype),
        grid_spec=pltpu.PrefetchScalarGridSpec(
            num_scalar_prefetch=0,
            # block_n images per step amortizes the ~0.35 us per-step
            # overhead; "parallel" shards the remaining steps across v7x's
            # two TensorCores (neutral on single-TC v5e/v6e).
            grid=(N // block_n,),
            in_specs=[
                pl.BlockSpec((block_n, Cin, HW), lambda n: (n, 0, 0)),
                pl.BlockSpec((9, HW), lambda n: (0, 0)),          # border masks
                pl.BlockSpec((hidden, Cin), lambda n: (0, 0)),    # weights are
                pl.BlockSpec((hidden, 1), lambda n: (0, 0)),      # grid-constant:
                pl.BlockSpec((hidden, 9), lambda n: (0, 0)),      # resident, not
                pl.BlockSpec((hidden, 1), lambda n: (0, 0)),      # re-DMA'd
                pl.BlockSpec((Cout, hidden), lambda n: (0, 0)),
                pl.BlockSpec((Cout, 1), lambda n: (0, 0)),
            ],
            out_specs=pl.BlockSpec((block_n, Cout, HW), lambda n: (n, 0, 0)),
        ),
        compiler_params=pltpu.CompilerParams(
            dimension_semantics=("parallel",)),
        # NOTE: at production feature-map sizes add a spatial grid axis and
        # set vmem_limit_bytes explicitly (v7x has half the VMEM of v5e/v6e).
    )(x, mask9, w1t, b1c, dwf, b2c, w3t, b3c)

    return out.reshape(N, Cout, H, W)


def mobile_block_ref(x_nchw, params, use_res_connect):
    """Pure-JAX reference (mirrors PyTorch eval-mode semantics)."""
    w1, s1, b1, dw, s2, b2, w3, s3, b3 = params
    N, Cin, H, W = x_nchw.shape
    x = jnp.transpose(x_nchw, (0, 2, 3, 1)).astype(jnp.float32)   # NHWC

    h = jnp.einsum('nhwc,cd->nhwd', x, w1)
    h = jnp.clip(h * s1 + b1, 0.0, 6.0)

    hp = jnp.pad(h, ((0, 0), (1, 1), (1, 1), (0, 0)))
    acc = jnp.zeros_like(h)
    for dy in range(3):
        for dx in range(3):
            acc = acc + hp[:, dy:dy + H, dx:dx + W, :] * dw[dy, dx]
    y = jnp.clip(acc * s2 + b2, 0.0, 6.0)

    out = jnp.einsum('nhwd,do->nhwo', y, w3) * s3 + b3
    if use_res_connect:
        out = out + x
    return jnp.transpose(out, (0, 3, 1, 2))


def make_params(key, in_channels, out_channels, expansion_factor=6, eps=1e-5):
    hidden = in_channels * expansion_factor
    ks = jax.random.split(key, 15)

    def bn(k0, k1, k2, k3, c):
        gamma = 1.0 + 0.05 * jax.random.normal(k0, (c,), jnp.float32)
        beta = 0.05 * jax.random.normal(k1, (c,), jnp.float32)
        mean = 0.1 * jax.random.normal(k2, (c,), jnp.float32)
        var = jax.random.uniform(k3, (c,), jnp.float32, 0.5, 1.5)
        scale = gamma / jnp.sqrt(var + eps)
        bias = beta - mean * scale
        return scale, bias

    w1 = 0.1 * jax.random.normal(ks[0], (in_channels, hidden), jnp.float32)
    dw = 0.1 * jax.random.normal(ks[1], (3, 3, hidden), jnp.float32)
    w3 = 0.1 * jax.random.normal(ks[2], (hidden, out_channels), jnp.float32)

    s1, b1 = bn(ks[3], ks[4], ks[5], ks[6], hidden)
    s2, b2 = bn(ks[7], ks[8], ks[9], ks[10], hidden)
    s3, b3 = bn(ks[11], ks[12], ks[13], ks[14], out_channels)
    return (w1, s1, b1, dw, s2, b2, w3, s3, b3)


if __name__ == "__main__":
    key = jax.random.PRNGKey(0)
    k_x1, k_x2, k_p1, k_p2 = jax.random.split(key, 4)

    H, W = 16, 16
    expansion = 6

    # Case 1: Cin == Cout -> residual path, batched grid step (N=8 -> block_n=4).
    N1, Cin, Cout = 8, 4, 4
    x1 = jax.random.normal(k_x1, (N1, Cin, H, W), jnp.float32)
    params = make_params(k_p1, Cin, Cout, expansion)
    out = jax.block_until_ready(mobile_block_pallas(x1, params, True))
    ref = mobile_block_ref(x1, params, True)
    assert out.shape == (N1, Cout, H, W)
    assert jnp.allclose(out, ref, atol=1e-4, rtol=1e-4), \
        float(jnp.max(jnp.abs(out - ref)))

    # Case 2: Cin != Cout -> no residual (N=2 -> block_n=1).
    N2, Cout2 = 2, 8
    x2 = jax.random.normal(k_x2, (N2, Cin, H, W), jnp.float32)
    params2 = make_params(k_p2, Cin, Cout2, expansion)
    out2 = jax.block_until_ready(mobile_block_pallas(x2, params2, False))
    ref2 = mobile_block_ref(x2, params2, False)
    assert out2.shape == (N2, Cout2, H, W)
    assert jnp.allclose(out2, ref2, atol=1e-4, rtol=1e-4), \
        float(jnp.max(jnp.abs(out2 - ref2)))

    print("KERNEL_OK")
</pallas_src>

<mosaic_0001>
module attributes {stable_mosaic.version = 11 : i64} {
  func.func @_mobile_block_kernel(%arg0: i32, %arg1: memref<4x4x256xf32, #tpu.memory_space<vmem>>, %arg2: memref<9x256xf32, #tpu.memory_space<vmem>>, %arg3: memref<24x4xf32, #tpu.memory_space<vmem>>, %arg4: memref<24x1xf32, #tpu.memory_space<vmem>>, %arg5: memref<24x9xf32, #tpu.memory_space<vmem>>, %arg6: memref<24x1xf32, #tpu.memory_space<vmem>>, %arg7: memref<4x24xf32, #tpu.memory_space<vmem>>, %arg8: memref<4x1xf32, #tpu.memory_space<vmem>>, %arg9: memref<4x4x256xf32, #tpu.memory_space<vmem>>) attributes {dimension_semantics = [#tpu.dimension_semantics<parallel>], iteration_bounds = array<i64: 2>, scalar_prefetch = 0 : i64, scratch_operands = 0 : i64, tpu.core_type = #tpu.core_type<tc>, window_params = [{transform_indices = @transform_0, window_bounds = array<i64: 4, 4, 256>}, {pipeline_mode = #tpu.pipeline_mode<synchronous>, transform_indices = @transform_1, window_bounds = array<i64: 9, 256>}, {pipeline_mode = #tpu.pipeline_mode<synchronous>, transform_indices = @transform_2, window_bounds = array<i64: 24, 4>}, {pipeline_mode = #tpu.pipeline_mode<synchronous>, transform_indices = @transform_3, window_bounds = array<i64: 24, 1>}, {pipeline_mode = #tpu.pipeline_mode<synchronous>, transform_indices = @transform_4, window_bounds = array<i64: 24, 9>}, {pipeline_mode = #tpu.pipeline_mode<synchronous>, transform_indices = @transform_5, window_bounds = array<i64: 24, 1>}, {pipeline_mode = #tpu.pipeline_mode<synchronous>, transform_indices = @transform_6, window_bounds = array<i64: 4, 24>}, {pipeline_mode = #tpu.pipeline_mode<synchronous>, transform_indices = @transform_7, window_bounds = array<i64: 4, 1>}, {transform_indices = @transform_8, window_bounds = array<i64: 4, 4, 256>}]} {
    %c0 = arith.constant 0 : index
    %c0_0 = arith.constant 0 : index
    %0 = vector.load %arg3[%c0, %c0_0] : memref<24x4xf32, #tpu.memory_space<vmem>>, vector<24x4xf32>
    %c0_1 = arith.constant 0 : index
    %c0_2 = arith.constant 0 : index
    %1 = vector.load %arg7[%c0_1, %c0_2] : memref<4x24xf32, #tpu.memory_space<vmem>>, vector<4x24xf32>
    %c0_3 = arith.constant 0 : index
    %c0_4 = arith.constant 0 : index
    %2 = vector.load %arg4[%c0_3, %c0_4] : memref<24x1xf32, #tpu.memory_space<vmem>>, vector<24x1xf32>
    %c0_5 = arith.constant 0 : index
    %c0_6 = arith.constant 0 : index
    %3 = vector.load %arg6[%c0_5, %c0_6] : memref<24x1xf32, #tpu.memory_space<vmem>>, vector<24x1xf32>
    %c0_7 = arith.constant 0 : index
    %c0_8 = arith.constant 0 : index
    %4 = vector.load %arg8[%c0_7, %c0_8] : memref<4x1xf32, #tpu.memory_space<vmem>>, vector<4x1xf32>
    %c0_9 = arith.constant 0 : index
    %c0_10 = arith.constant 0 : index
    %5 = vector.load %arg5[%c0_9, %c0_10] : memref<24x9xf32, #tpu.memory_space<vmem>>, vector<24x9xf32>
    %c0_11 = arith.constant 0 : index
    %c0_12 = arith.constant 0 : index
    %6 = vector.load %arg2[%c0_11, %c0_12] : memref<9x256xf32, #tpu.memory_space<vmem>>, vector<9x256xf32>
    %c0_i32 = arith.constant 0 : i32
    %7 = arith.index_cast %c0_i32 : i32 to index
    %c0_13 = arith.constant 0 : index
    %c0_14 = arith.constant 0 : index
    %8 = vector.load %arg1[%7, %c0_13, %c0_14] : memref<4x4x256xf32, #tpu.memory_space<vmem>>, vector<1x4x256xf32>
    %9 = vector.shape_cast %8 : vector<1x4x256xf32> to vector<4x256xf32>
    %cst = arith.constant dense<0.000000e+00> : vector<24x256xf32>
    %10 = tpu.matmul %0, %9, %cst {dimension_numbers = #tpu.dot_dimension_numbers<[1], [0], [0], [1], [0, 0, 1, 1], [], []>} : vector<24x4xf32>, vector<4x256xf32>, vector<24x256xf32> -> vector<24x256xf32>
    %11 = vector.broadcast %2 : vector<24x1xf32> to vector<24x256xf32>
    %12 = arith.addf %10, %11 : vector<24x256xf32>
    %cst_15 = arith.constant 0.000000e+00 : f32
    %cst_16 = arith.constant 6.000000e+00 : f32
    %13 = vector.broadcast %cst_15 : f32 to vector<24x256xf32>
    %14 = arith.maximumf %13, %12 : vector<24x256xf32>
    %15 = vector.broadcast %cst_16 : f32 to vector<24x256xf32>
    %16 = arith.minimumf %15, %14 : vector<24x256xf32>
    %17 = vector.extract_strided_slice %5 {offsets = [0, 4], sizes = [24, 1], strides = [1, 1]} : vector<24x9xf32> to vector<24x1xf32>
    %18 = vector.broadcast %17 : vector<24x1xf32> to vector<24x256xf32>
    %19 = arith.mulf %16, %18 : vector<24x256xf32>
    %c17_i32 = arith.constant 17 : i32
    %20 = tpu.dynamic_rotate %16 by %c17_i32 dim 1 : vector<24x256xf32>, i32 -> vector<24x256xf32>
    %21 = vector.extract_strided_slice %5 {offsets = [0, 0], sizes = [24, 1], strides = [1, 1]} : vector<24x9xf32> to vector<24x1xf32>
    %22 = vector.broadcast %21 : vector<24x1xf32> to vector<24x256xf32>
    %23 = arith.mulf %20, %22 : vector<24x256xf32>
    %24 = vector.extract_strided_slice %6 {offsets = [0, 0], sizes = [1, 256], strides = [1, 1]} : vector<9x256xf32> to vector<1x256xf32>
    %25 = vector.broadcast %24 : vector<1x256xf32> to vector<24x256xf32>
    %26 = arith.mulf %23, %25 : vector<24x256xf32>
    %27 = arith.addf %19, %26 : vector<24x256xf32>
    %c16_i32 = arith.constant 16 : i32
    %28 = tpu.dynamic_rotate %16 by %c16_i32 dim 1 : vector<24x256xf32>, i32 -> vector<24x256xf32>
    %29 = vector.extract_strided_slice %5 {offsets = [0, 1], sizes = [24, 1], strides = [1, 1]} : vector<24x9xf32> to vector<24x1xf32>
    %30 = vector.broadcast %29 : vector<24x1xf32> to vector<24x256xf32>
    %31 = arith.mulf %28, %30 : vector<24x256xf32>
    %32 = vector.extract_strided_slice %6 {offsets = [1, 0], sizes = [1, 256], strides = [1, 1]} : vector<9x256xf32> to vector<1x256xf32>
    %33 = vector.broadcast %32 : vector<1x256xf32> to vector<24x256xf32>
    %34 = arith.mulf %31, %33 : vector<24x256xf32>
    %35 = arith.addf %27, %34 : vector<24x256xf32>
    %c15_i32 = arith.constant 15 : i32
    %36 = tpu.dynamic_rotate %16 by %c15_i32 dim 1 : vector<24x256xf32>, i32 -> vector<24x256xf32>
    %37 = vector.extract_strided_slice %5 {offsets = [0, 2], sizes = [24, 1], strides = [1, 1]} : vector<24x9xf32> to vector<24x1xf32>
    %38 = vector.broadcast %37 : vector<24x1xf32> to vector<24x256xf32>
    %39 = arith.mulf %36, %38 : vector<24x256xf32>
    %40 = vector.extract_strided_slice %6 {offsets = [2, 0], sizes = [1, 256], strides = [1, 1]} : vector<9x256xf32> to vector<1x256xf32>
    %41 = vector.broadcast %40 : vector<1x256xf32> to vector<24x256xf32>
    %42 = arith.mulf %39, %41 : vector<24x256xf32>
    %43 = arith.addf %35, %42 : vector<24x256xf32>
    %c1_i32 = arith.constant 1 : i32
    %44 = tpu.dynamic_rotate %16 by %c1_i32 dim 1 : vector<24x256xf32>, i32 -> vector<24x256xf32>
    %45 = vector.extract_strided_slice %5 {offsets = [0, 3], sizes = [24, 1], strides = [1, 1]} : vector<24x9xf32> to vector<24x1xf32>
    %46 = vector.broadcast %45 : vector<24x1xf32> to vector<24x256xf32>
    %47 = arith.mulf %44, %46 : vector<24x256xf32>
    %48 = vector.extract_strided_slice %6 {offsets = [3, 0], sizes = [1, 256], strides = [1, 1]} : vector<9x256xf32> to vector<1x256xf32>
    %49 = vector.broadcast %48 : vector<1x256xf32> to vector<24x256xf32>
    %50 = arith.mulf %47, %49 : vector<24x256xf32>
    %51 = arith.addf %43, %50 : vector<24x256xf32>
    %c255_i32 = arith.constant 255 : i32
    %52 = tpu.dynamic_rotate %16 by %c255_i32 dim 1 : vector<24x256xf32>, i32 -> vector<24x256xf32>
    %53 = vector.extract_strided_slice %5 {offsets = [0, 5], sizes = [24, 1], strides = [1, 1]} : vector<24x9xf32> to vector<24x1xf32>
    %54 = vector.broadcast %53 : vector<24x1xf32> to vector<24x256xf32>
    %55 = arith.mulf %52, %54 : vector<24x256xf32>
    %56 = vector.extract_strided_slice %6 {offsets = [5, 0], sizes = [1, 256], strides = [1, 1]} : vector<9x256xf32> to vector<1x256xf32>
    %57 = vector.broadcast %56 : vector<1x256xf32> to vector<24x256xf32>
    %58 = arith.mulf %55, %57 : vector<24x256xf32>
    %59 = arith.addf %51, %58 : vector<24x256xf32>
    %c241_i32 = arith.constant 241 : i32
    %60 = tpu.dynamic_rotate %16 by %c241_i32 dim 1 : vector<24x256xf32>, i32 -> vector<24x256xf32>
    %61 = vector.extract_strided_slice %5 {offsets = [0, 6], sizes = [24, 1], strides = [1, 1]} : vector<24x9xf32> to vector<24x1xf32>
    %62 = vector.broadcast %61 : vector<24x1xf32> to vector<24x256xf32>
    %63 = arith.mulf %60, %62 : vector<24x256xf32>
    %64 = vector.extract_strided_slice %6 {offsets = [6, 0], sizes = [1, 256], strides = [1, 1]} : vector<9x256xf32> to vector<1x256xf32>
    %65 = vector.broadcast %64 : vector<1x256xf32> to vector<24x256xf32>
    %66 = arith.mulf %63, %65 : vector<24x256xf32>
    %67 = arith.addf %59, %66 : vector<24x256xf32>
    %c240_i32 = arith.constant 240 : i32
    %68 = tpu.dynamic_rotate %16 by %c240_i32 dim 1 : vector<24x256xf32>, i32 -> vector<24x256xf32>
    %69 = vector.extract_strided_slice %5 {offsets = [0, 7], sizes = [24, 1], strides = [1, 1]} : vector<24x9xf32> to vector<24x1xf32>
    %70 = vector.broadcast %69 : vector<24x1xf32> to vector<24x256xf32>
    %71 = arith.mulf %68, %70 : vector<24x256xf32>
    %72 = vector.extract_strided_slice %6 {offsets = [7, 0], sizes = [1, 256], strides = [1, 1]} : vector<9x256xf32> to vector<1x256xf32>
    %73 = vector.broadcast %72 : vector<1x256xf32> to vector<24x256xf32>
    %74 = arith.mulf %71, %73 : vector<24x256xf32>
    %75 = arith.addf %67, %74 : vector<24x256xf32>
    %c239_i32 = arith.constant 239 : i32
    %76 = tpu.dynamic_rotate %16 by %c239_i32 dim 1 : vector<24x256xf32>, i32 -> vector<24x256xf32>
    %77 = vector.extract_strided_slice %5 {offsets = [0, 8], sizes = [24, 1], strides = [1, 1]} : vector<24x9xf32> to vector<24x1xf32>
    %78 = vector.broadcast %77 : vector<24x1xf32> to vector<24x256xf32>
    %79 = arith.mulf %76, %78 : vector<24x256xf32>
    %80 = vector.extract_strided_slice %6 {offsets = [8, 0], sizes = [1, 256], strides = [1, 1]} : vector<9x256xf32> to vector<1x256xf32>
    %81 = vector.broadcast %80 : vector<1x256xf32> to vector<24x256xf32>
    %82 = arith.mulf %79, %81 : vector<24x256xf32>
    %83 = arith.addf %75, %82 : vector<24x256xf32>
    %84 = vector.broadcast %3 : vector<24x1xf32> to vector<24x256xf32>
    %85 = arith.addf %83, %84 : vector<24x256xf32>
    %cst_17 = arith.constant 0.000000e+00 : f32
    %cst_18 = arith.constant 6.000000e+00 : f32
    %86 = vector.broadcast %cst_17 : f32 to vector<24x256xf32>
    %87 = arith.maximumf %86, %85 : vector<24x256xf32>
    %88 = vector.broadcast %cst_18 : f32 to vector<24x256xf32>
    %89 = arith.minimumf %88, %87 : vector<24x256xf32>
    %cst_19 = arith.constant dense<0.000000e+00> : vector<4x256xf32>
    %90 = tpu.matmul %1, %89, %cst_19 {dimension_numbers = #tpu.dot_dimension_numbers<[1], [0], [0], [1], [0, 0, 1, 1], [], []>} : vector<4x24xf32>, vector<24x256xf32>, vector<4x256xf32> -> vector<4x256xf32>
    %91 = vector.broadcast %4 : vector<4x1xf32> to vector<4x256xf32>
    %92 = arith.addf %90, %91 : vector<4x256xf32>
    %93 = arith.index_cast %c0_i32 : i32 to index
    %c0_20 = arith.constant 0 : index
    %c0_21 = arith.constant 0 : index
    %94 = vector.load %arg1[%93, %c0_20, %c0_21] : memref<4x4x256xf32, #tpu.memory_space<vmem>>, vector<1x4x256xf32>
    %95 = vector.shape_cast %94 : vector<1x4x256xf32> to vector<4x256xf32>
    %96 = arith.addf %92, %95 : vector<4x256xf32>
    %97 = arith.index_cast %c0_i32 : i32 to index
    %c0_22 = arith.constant 0 : index
    %c0_23 = arith.constant 0 : index
    %98 = vector.load %arg9[%97, %c0_22, %c0_23] : memref<4x4x256xf32, #tpu.memory_space<vmem>>, vector<1x4x256xf32>
    %99 = vector.shape_cast %98 : vector<1x4x256xf32> to vector<4x256xf32>
    %100 = vector.shape_cast %96 : vector<4x256xf32> to vector<1x4x256xf32>
    tpu.vector_store %arg9[%97, %c0_22, %c0_23], %100 {strides = array<i32>} : memref<4x4x256xf32, #tpu.memory_space<vmem>>, vector<1x4x256xf32>,
    %c1_i32_24 = arith.constant 1 : i32
    %101 = arith.index_cast %c1_i32_24 : i32 to index
    %c0_25 = arith.constant 0 : index
    %c0_26 = arith.constant 0 : index
    %102 = vector.load %arg1[%101, %c0_25, %c0_26] : memref<4x4x256xf32, #tpu.memory_space<vmem>>, vector<1x4x256xf32>
    %103 = vector.shape_cast %102 : vector<1x4x256xf32> to vector<4x256xf32>
    %cst_27 = arith.constant dense<0.000000e+00> : vector<24x256xf32>
    %104 = tpu.matmul %0, %103, %cst_27 {dimension_numbers = #tpu.dot_dimension_numbers<[1], [0], [0], [1], [0, 0, 1, 1], [], []>} : vector<24x4xf32>, vector<4x256xf32>, vector<24x256xf32> -> vector<24x256xf32>
    %105 = vector.broadcast %2 : vector<24x1xf32> to vector<24x256xf32>
    %106 = arith.addf %104, %105 : vector<24x256xf32>
    %cst_28 = arith.constant 0.000000e+00 : f32
    %cst_29 = arith.constant 6.000000e+00 : f32
    %107 = vector.broadcast %cst_28 : f32 to vector<24x256xf32>
    %108 = arith.maximumf %107, %106 : vector<24x256xf32>
    %109 = vector.broadcast %cst_29 : f32 to vector<24x256xf32>
    %110 = arith.minimumf %109, %108 : vector<24x256xf32>
    %111 = vector.extract_strided_slice %5 {offsets = [0, 4], sizes = [24, 1], strides = [1, 1]} : vector<24x9xf32> to vector<24x1xf32>
    %112 = vector.broadcast %111 : vector<24x1xf32> to vector<24x256xf32>
    %113 = arith.mulf %110, %112 : vector<24x256xf32>
    %c17_i32_30 = arith.constant 17 : i32
    %114 = tpu.dynamic_rotate %110 by %c17_i32_30 dim 1 : vector<24x256xf32>, i32 -> vector<24x256xf32>
    %115 = vector.extract_strided_slice %5 {offsets = [0, 0], sizes = [24, 1], strides = [1, 1]} : vector<24x9xf32> to vector<24x1xf32>
    %116 = vector.broadcast %115 : vector<24x1xf32> to vector<24x256xf32>
    %117 = arith.mulf %114, %116 : vector<24x256xf32>
    %118 = vector.extract_strided_slice %6 {offsets = [0, 0], sizes = [1, 256], strides = [1, 1]} : vector<9x256xf32> to vector<1x256xf32>
    %119 = vector.broadcast %118 : vector<1x256xf32> to vector<24x256xf32>
    %120 = arith.mulf %117, %119 : vector<24x256xf32>
    %121 = arith.addf %113, %120 : vector<24x256xf32>
    %c16_i32_31 = arith.constant 16 : i32
    %122 = tpu.dynamic_rotate %110 by %c16_i32_31 dim 1 : vector<24x256xf32>, i32 -> vector<24x256xf32>
    %123 = vector.extract_strided_slice %5 {offsets = [0, 1], sizes = [24, 1], strides = [1, 1]} : vector<24x9xf32> to vector<24x1xf32>
    %124 = vector.broadcast %123 : vector<24x1xf32> to vector<24x256xf32>
    %125 = arith.mulf %122, %124 : vector<24x256xf32>
    %126 = vector.extract_strided_slice %6 {offsets = [1, 0], sizes = [1, 256], strides = [1, 1]} : vector<9x256xf32> to vector<1x256xf32>
    %127 = vector.broadcast %126 : vector<1x256xf32> to vector<24x256xf32>
    %128 = arith.mulf %125, %127 : vector<24x256xf32>
    %129 = arith.addf %121, %128 : vector<24x256xf32>
    %c15_i32_32 = arith.constant 15 : i32
    %130 = tpu.dynamic_rotate %110 by %c15_i32_32 dim 1 : vector<24x256xf32>, i32 -> vector<24x256xf32>
    %131 = vector.extract_strided_slice %5 {offsets = [0, 2], sizes = [24, 1], strides = [1, 1]} : vector<24x9xf32> to vector<24x1xf32>
    %132 = vector.broadcast %131 : vector<24x1xf32> to vector<24x256xf32>
    %133 = arith.mulf %130, %132 : vector<24x256xf32>
    %134 = vector.extract_strided_slice %6 {offsets = [2, 0], sizes = [1, 256], strides = [1, 1]} : vector<9x256xf32> to vector<1x256xf32>
    %135 = vector.broadcast %134 : vector<1x256xf32> to vector<24x256xf32>
    %136 = arith.mulf %133, %135 : vector<24x256xf32>
    %137 = arith.addf %129, %136 : vector<24x256xf32>
    %c1_i32_33 = arith.constant 1 : i32
    %138 = tpu.dynamic_rotate %110 by %c1_i32_33 dim 1 : vector<24x256xf32>, i32 -> vector<24x256xf32>
    %139 = vector.extract_strided_slice %5 {offsets = [0, 3], sizes = [24, 1], strides = [1, 1]} : vector<24x9xf32> to vector<24x1xf32>
    %140 = vector.broadcast %139 : vector<24x1xf32> to vector<24x256xf32>
    %141 = arith.mulf %138, %140 : vector<24x256xf32>
    %142 = vector.extract_strided_slice %6 {offsets = [3, 0], sizes = [1, 256], strides = [1, 1]} : vector<9x256xf32> to vector<1x256xf32>
    %143 = vector.broadcast %142 : vector<1x256xf32> to vector<24x256xf32>
    %144 = arith.mulf %141, %143 : vector<24x256xf32>
    %145 = arith.addf %137, %144 : vector<24x256xf32>
    %c255_i32_34 = arith.constant 255 : i32
    %146 = tpu.dynamic_rotate %110 by %c255_i32_34 dim 1 : vector<24x256xf32>, i32 -> vector<24x256xf32>
    %147 = vector.extract_strided_slice %5 {offsets = [0, 5], sizes = [24, 1], strides = [1, 1]} : vector<24x9xf32> to vector<24x1xf32>
    %148 = vector.broadcast %147 : vector<24x1xf32> to vector<24x256xf32>
    %149 = arith.mulf %146, %148 : vector<24x256xf32>
    %150 = vector.extract_strided_slice %6 {offsets = [5, 0], sizes = [1, 256], strides = [1, 1]} : vector<9x256xf32> to vector<1x256xf32>
    %151 = vector.broadcast %150 : vector<1x256xf32> to vector<24x256xf32>
    %152 = arith.mulf %149, %151 : vector<24x256xf32>
    %153 = arith.addf %145, %152 : vector<24x256xf32>
    %c241_i32_35 = arith.constant 241 : i32
    %154 = tpu.dynamic_rotate %110 by %c241_i32_35 dim 1 : vector<24x256xf32>, i32 -> vector<24x256xf32>
    %155 = vector.extract_strided_slice %5 {offsets = [0, 6], sizes = [24, 1], strides = [1, 1]} : vector<24x9xf32> to vector<24x1xf32>
    %156 = vector.broadcast %155 : vector<24x1xf32> to vector<24x256xf32>
    %157 = arith.mulf %154, %156 : vector<24x256xf32>
    %158 = vector.extract_strided_slice %6 {offsets = [6, 0], sizes = [1, 256], strides = [1, 1]} : vector<9x256xf32> to vector<1x256xf32>
    %159 = vector.broadcast %158 : vector<1x256xf32> to vector<24x256xf32>
    %160 = arith.mulf %157, %159 : vector<24x256xf32>
    %161 = arith.addf %153, %160 : vector<24x256xf32>
    %c240_i32_36 = arith.constant 240 : i32
    %162 = tpu.dynamic_rotate %110 by %c240_i32_36 dim 1 : vector<24x256xf32>, i32 -> vector<24x256xf32>
    %163 = vector.extract_strided_slice %5 {offsets = [0, 7], sizes = [24, 1], strides = [1, 1]} : vector<24x9xf32> to vector<24x1xf32>
    %164 = vector.broadcast %163 : vector<24x1xf32> to vector<24x256xf32>
    %165 = arith.mulf %162, %164 : vector<24x256xf32>
    %166 = vector.extract_strided_slice %6 {offsets = [7, 0], sizes = [1, 256], strides = [1, 1]} : vector<9x256xf32> to vector<1x256xf32>
    %167 = vector.broadcast %166 : vector<1x256xf32> to vector<24x256xf32>
    %168 = arith.mulf %165, %167 : vector<24x256xf32>
    %169 = arith.addf %161, %168 : vector<24x256xf32>
    %c239_i32_37 = arith.constant 239 : i32
    %170 = tpu.dynamic_rotate %110 by %c239_i32_37 dim 1 : vector<24x256xf32>, i32 -> vector<24x256xf32>
    %171 = vector.extract_strided_slice %5 {offsets = [0, 8], sizes = [24, 1], strides = [1, 1]} : vector<24x9xf32> to vector<24x1xf32>
    %172 = vector.broadcast %171 : vector<24x1xf32> to vector<24x256xf32>
    %173 = arith.mulf %170, %172 : vector<24x256xf32>
    %174 = vector.extract_strided_slice %6 {offsets = [8, 0], sizes = [1, 256], strides = [1, 1]} : vector<9x256xf32> to vector<1x256xf32>
    %175 = vector.broadcast %174 : vector<1x256xf32> to vector<24x256xf32>
    %176 = arith.mulf %173, %175 : vector<24x256xf32>
    %177 = arith.addf %169, %176 : vector<24x256xf32>
    %178 = vector.broadcast %3 : vector<24x1xf32> to vector<24x256xf32>
    %179 = arith.addf %177, %178 : vector<24x256xf32>
    %cst_38 = arith.constant 0.000000e+00 : f32
    %cst_39 = arith.constant 6.000000e+00 : f32
    %180 = vector.broadcast %cst_38 : f32 to vector<24x256xf32>
    %181 = arith.maximumf %180, %179 : vector<24x256xf32>
    %182 = vector.broadcast %cst_39 : f32 to vector<24x256xf32>
    %183 = arith.minimumf %182, %181 : vector<24x256xf32>
    %cst_40 = arith.constant dense<0.000000e+00> : vector<4x256xf32>
    %184 = tpu.matmul %1, %183, %cst_40 {dimension_numbers = #tpu.dot_dimension_numbers<[1], [0], [0], [1], [0, 0, 1, 1], [], []>} : vector<4x24xf32>, vector<24x256xf32>, vector<4x256xf32> -> vector<4x256xf32>
    %185 = vector.broadcast %4 : vector<4x1xf32> to vector<4x256xf32>
    %186 = arith.addf %184, %185 : vector<4x256xf32>
    %187 = arith.index_cast %c1_i32_24 : i32 to index
    %c0_41 = arith.constant 0 : index
    %c0_42 = arith.constant 0 : index
    %188 = vector.load %arg1[%187, %c0_41, %c0_42] : memref<4x4x256xf32, #tpu.memory_space<vmem>>, vector<1x4x256xf32>
    %189 = vector.shape_cast %188 : vector<1x4x256xf32> to vector<4x256xf32>
    %190 = arith.addf %186, %189 : vector<4x256xf32>
    %191 = arith.index_cast %c1_i32_24 : i32 to index
    %c0_43 = arith.constant 0 : index
    %c0_44 = arith.constant 0 : index
    %192 = vector.load %arg9[%191, %c0_43, %c0_44] : memref<4x4x256xf32, #tpu.memory_space<vmem>>, vector<1x4x256xf32>
    %193 = vector.shape_cast %192 : vector<1x4x256xf32> to vector<4x256xf32>
    %194 = vector.shape_cast %190 : vector<4x256xf32> to vector<1x4x256xf32>
    tpu.vector_store %arg9[%191, %c0_43, %c0_44], %194 {strides = array<i32>} : memref<4x4x256xf32, #tpu.memory_space<vmem>>, vector<1x4x256xf32>,
    %c2_i32 = arith.constant 2 : i32
    %195 = arith.index_cast %c2_i32 : i32 to index
    %c0_45 = arith.constant 0 : index
    %c0_46 = arith.constant 0 : index
    %196 = vector.load %arg1[%195, %c0_45, %c0_46] : memref<4x4x256xf32, #tpu.memory_space<vmem>>, vector<1x4x256xf32>
    %197 = vector.shape_cast %196 : vector<1x4x256xf32> to vector<4x256xf32>
    %cst_47 = arith.constant dense<0.000000e+00> : vector<24x256xf32>
    %198 = tpu.matmul %0, %197, %cst_47 {dimension_numbers = #tpu.dot_dimension_numbers<[1], [0], [0], [1], [0, 0, 1, 1], [], []>} : vector<24x4xf32>, vector<4x256xf32>, vector<24x256xf32> -> vector<24x256xf32>
    %199 = vector.broadcast %2 : vector<24x1xf32> to vector<24x256xf32>
    %200 = arith.addf %198, %199 : vector<24x256xf32>
    %cst_48 = arith.constant 0.000000e+00 : f32
    %cst_49 = arith.constant 6.000000e+00 : f32
    %201 = vector.broadcast %cst_48 : f32 to vector<24x256xf32>
    %202 = arith.maximumf %201, %200 : vector<24x256xf32>
    %203 = vector.broadcast %cst_49 : f32 to vector<24x256xf32>
    %204 = arith.minimumf %203, %202 : vector<24x256xf32>
    %205 = vector.extract_strided_slice %5 {offsets = [0, 4], sizes = [24, 1], strides = [1, 1]} : vector<24x9xf32> to vector<24x1xf32>
    %206 = vector.broadcast %205 : vector<24x1xf32> to vector<24x256xf32>
    %207 = arith.mulf %204, %206 : vector<24x256xf32>
    %c17_i32_50 = arith.constant 17 : i32
    %208 = tpu.dynamic_rotate %204 by %c17_i32_50 dim 1 : vector<24x256xf32>, i32 -> vector<24x256xf32>
    %209 = vector.extract_strided_slice %5 {offsets = [0, 0], sizes = [24, 1], strides = [1, 1]} : vector<24x9xf32> to vector<24x1xf32>
    %210 = vector.broadcast %209 : vector<24x1xf32> to vector<24x256xf32>
    %211 = arith.mulf %208, %210 : vector<24x256xf32>
    %212 = vector.extract_strided_slice %6 {offsets = [0, 0], sizes = [1, 256], strides = [1, 1]} : vector<9x256xf32> to vector<1x256xf32>
    %213 = vector.broadcast %212 : vector<1x256xf32> to vector<24x256xf32>
    %214 = arith.mulf %211, %213 : vector<24x256xf32>
    %215 = arith.addf %207, %214 : vector<24x256xf32>
    %c16_i32_51 = arith.constant 16 : i32
    %216 = tpu.dynamic_rotate %204 by %c16_i32_51 dim 1 : vector<24x256xf32>, i32 -> vector<24x256xf32>
    %217 = vector.extract_strided_slice %5 {offsets = [0, 1], sizes = [24, 1], strides = [1, 1]} : vector<24x9xf32> to vector<24x1xf32>
    %218 = vector.broadcast %217 : vector<24x1xf32> to vector<24x256xf32>
    %219 = arith.mulf %216, %218 : vector<24x256xf32>
    %220 = vector.extract_strided_slice %6 {offsets = [1, 0], sizes = [1, 256], strides = [1, 1]} : vector<9x256xf32> to vector<1x256xf32>
    %221 = vector.broadcast %220 : vector<1x256xf32> to vector<24x256xf32>
    %222 = arith.mulf %219, %221 : vector<24x256xf32>
    %223 = arith.addf %215, %222 : vector<24x256xf32>
    %c15_i32_52 = arith.constant 15 : i32
    %224 = tpu.dynamic_rotate %204 by %c15_i32_52 dim 1 : vector<24x256xf32>, i32 -> vector<24x256xf32>
    %225 = vector.extract_strided_slice %5 {offsets = [0, 2], sizes = [24, 1], strides = [1, 1]} : vector<24x9xf32> to vector<24x1xf32>
    %226 = vector.broadcast %225 : vector<24x1xf32> to vector<24x256xf32>
    %227 = arith.mulf %224, %226 : vector<24x256xf32>
    %228 = vector.extract_strided_slice %6 {offsets = [2, 0], sizes = [1, 256], strides = [1, 1]} : vector<9x256xf32> to vector<1x256xf32>
    %229 = vector.broadcast %228 : vector<1x256xf32> to vector<24x256xf32>
    %230 = arith.mulf %227, %229 : vector<24x256xf32>
    %231 = arith.addf %223, %230 : vector<24x256xf32>
    %c1_i32_53 = arith.constant 1 : i32
    %232 = tpu.dynamic_rotate %204 by %c1_i32_53 dim 1 : vector<24x256xf32>, i32 -> vector<24x256xf32>
    %233 = vector.extract_strided_slice %5 {offsets = [0, 3], sizes = [24, 1], strides = [1, 1]} : vector<24x9xf32> to vector<24x1xf32>
    %234 = vector.broadcast %233 : vector<24x1xf32> to vector<24x256xf32>
    %235 = arith.mulf %232, %234 : vector<24x256xf32>
    %236 = vector.extract_strided_slice %6 {offsets = [3, 0], sizes = [1, 256], strides = [1, 1]} : vector<9x256xf32> to vector<1x256xf32>
    %237 = vector.broadcast %236 : vector<1x256xf32> to vector<24x256xf32>
    %238 = arith.mulf %235, %237 : vector<24x256xf32>
    %239 = arith.addf %231, %238 : vector<24x256xf32>
    %c255_i32_54 = arith.constant 255 : i32
    %240 = tpu.dynamic_rotate %204 by %c255_i32_54 dim 1 : vector<24x256xf32>, i32 -> vector<24x256xf32>
    %241 = vector.extract_strided_slice %5 {offsets = [0, 5], sizes = [24, 1], strides = [1, 1]} : vector<24x9xf32> to vector<24x1xf32>
    %242 = vector.broadcast %241 : vector<24x1xf32> to vector<24x256xf32>
    %243 = arith.mulf %240, %242 : vector<24x256xf32>
    %244 = vector.extract_strided_slice %6 {offsets = [5, 0], sizes = [1, 256], strides = [1, 1]} : vector<9x256xf32> to vector<1x256xf32>
    %245 = vector.broadcast %244 : vector<1x256xf32> to vector<24x256xf32>
    %246 = arith.mulf %243, %245 : vector<24x256xf32>
    %247 = arith.addf %239, %246 : vector<24x256xf32>
    %c241_i32_55 = arith.constant 241 : i32
    %248 = tpu.dynamic_rotate %204 by %c241_i32_55 dim 1 : vector<24x256xf32>, i32 -> vector<24x256xf32>
    %249 = vector.extract_strided_slice %5 {offsets = [0, 6], sizes = [24, 1], strides = [1, 1]} : vector<24x9xf32> to vector<24x1xf32>
    %250 = vector.broadcast %249 : vector<24x1xf32> to vector<24x256xf32>
    %251 = arith.mulf %248, %250 : vector<24x256xf32>
    %252 = vector.extract_strided_slice %6 {offsets = [6, 0], sizes = [1, 256], strides = [1, 1]} : vector<9x256xf32> to vector<1x256xf32>
    %253 = vector.broadcast %252 : vector<1x256xf32> to vector<24x256xf32>
    %254 = arith.mulf %251, %253 : vector<24x256xf32>
    %255 = arith.addf %247, %254 : vector<24x256xf32>
    %c240_i32_56 = arith.constant 240 : i32
    %256 = tpu.dynamic_rotate %204 by %c240_i32_56 dim 1 : vector<24x256xf32>, i32 -> vector<24x256xf32>
    %257 = vector.extract_strided_slice %5 {offsets = [0, 7], sizes = [24, 1], strides = [1, 1]} : vector<24x9xf32> to vector<24x1xf32>
    %258 = vector.broadcast %257 : vector<24x1xf32> to vector<24x256xf32>
    %259 = arith.mulf %256, %258 : vector<24x256xf32>
    %260 = vector.extract_strided_slice %6 {offsets = [7, 0], sizes = [1, 256], strides = [1, 1]} : vector<9x256xf32> to vector<1x256xf32>
    %261 = vector.broadcast %260 : vector<1x256xf32> to vector<24x256xf32>
    %262 = arith.mulf %259, %261 : vector<24x256xf32>
    %263 = arith.addf %255, %262 : vector<24x256xf32>
    %c239_i32_57 = arith.constant 239 : i32
    %264 = tpu.dynamic_rotate %204 by %c239_i32_57 dim 1 : vector<24x256xf32>, i32 -> vector<24x256xf32>
    %265 = vector.extract_strided_slice %5 {offsets = [0, 8], sizes = [24, 1], strides = [1, 1]} : vector<24x9xf32> to vector<24x1xf32>
    %266 = vector.broadcast %265 : vector<24x1xf32> to vector<24x256xf32>
    %267 = arith.mulf %264, %266 : vector<24x256xf32>
    %268 = vector.extract_strided_slice %6 {offsets = [8, 0], sizes = [1, 256], strides = [1, 1]} : vector<9x256xf32> to vector<1x256xf32>
    %269 = vector.broadcast %268 : vector<1x256xf32> to vector<24x256xf32>
    %270 = arith.mulf %267, %269 : vector<24x256xf32>
    %271 = arith.addf %263, %270 : vector<24x256xf32>
    %272 = vector.broadcast %3 : vector<24x1xf32> to vector<24x256xf32>
    %273 = arith.addf %271, %272 : vector<24x256xf32>
    %cst_58 = arith.constant 0.000000e+00 : f32
    %cst_59 = arith.constant 6.000000e+00 : f32
    %274 = vector.broadcast %cst_58 : f32 to vector<24x256xf32>
    %275 = arith.maximumf %274, %273 : vector<24x256xf32>
    %276 = vector.broadcast %cst_59 : f32 to vector<24x256xf32>
    %277 = arith.minimumf %276, %275 : vector<24x256xf32>
    %cst_60 = arith.constant dense<0.000000e+00> : vector<4x256xf32>
    %278 = tpu.matmul %1, %277, %cst_60 {dimension_numbers = #tpu.dot_dimension_numbers<[1], [0], [0], [1], [0, 0, 1, 1], [], []>} : vector<4x24xf32>, vector<24x256xf32>, vector<4x256xf32> -> vector<4x256xf32>
    %279 = vector.broadcast %4 : vector<4x1xf32> to vector<4x256xf32>
    %280 = arith.addf %278, %279 : vector<4x256xf32>
    %281 = arith.index_cast %c2_i32 : i32 to index
    %c0_61 = arith.constant 0 : index
    %c0_62 = arith.constant 0 : index
    %282 = vector.load %arg1[%281, %c0_61, %c0_62] : memref<4x4x256xf32, #tpu.memory_space<vmem>>, vector<1x4x256xf32>
    %283 = vector.shape_cast %282 : vector<1x4x256xf32> to vector<4x256xf32>
    %284 = arith.addf %280, %283 : vector<4x256xf32>
    %285 = arith.index_cast %c2_i32 : i32 to index
    %c0_63 = arith.constant 0 : index
    %c0_64 = arith.constant 0 : index
    %286 = vector.load %arg9[%285, %c0_63, %c0_64] : memref<4x4x256xf32, #tpu.memory_space<vmem>>, vector<1x4x256xf32>
    %287 = vector.shape_cast %286 : vector<1x4x256xf32> to vector<4x256xf32>
    %288 = vector.shape_cast %284 : vector<4x256xf32> to vector<1x4x256xf32>
    tpu.vector_store %arg9[%285, %c0_63, %c0_64], %288 {strides = array<i32>} : memref<4x4x256xf32, #tpu.memory_space<vmem>>, vector<1x4x256xf32>,
    %c3_i32 = arith.constant 3 : i32
    %289 = arith.index_cast %c3_i32 : i32 to index
    %c0_65 = arith.constant 0 : index
    %c0_66 = arith.constant 0 : index
    %290 = vector.load %arg1[%289, %c0_65, %c0_66] : memref<4x4x256xf32, #tpu.memory_space<vmem>>, vector<1x4x256xf32>
    %291 = vector.shape_cast %290 : vector<1x4x256xf32> to vector<4x256xf32>
    %cst_67 = arith.constant dense<0.000000e+00> : vector<24x256xf32>
    %292 = tpu.matmul %0, %291, %cst_67 {dimension_numbers = #tpu.dot_dimension_numbers<[1], [0], [0], [1], [0, 0, 1, 1], [], []>} : vector<24x4xf32>, vector<4x256xf32>, vector<24x256xf32> -> vector<24x256xf32>
    %293 = vector.broadcast %2 : vector<24x1xf32> to vector<24x256xf32>
    %294 = arith.addf %292, %293 : vector<24x256xf32>
    %cst_68 = arith.constant 0.000000e+00 : f32
    %cst_69 = arith.constant 6.000000e+00 : f32
    %295 = vector.broadcast %cst_68 : f32 to vector<24x256xf32>
    %296 = arith.maximumf %295, %294 : vector<24x256xf32>
    %297 = vector.broadcast %cst_69 : f32 to vector<24x256xf32>
    %298 = arith.minimumf %297, %296 : vector<24x256xf32>
    %299 = vector.extract_strided_slice %5 {offsets = [0, 4], sizes = [24, 1], strides = [1, 1]} : vector<24x9xf32> to vector<24x1xf32>
    %300 = vector.broadcast %299 : vector<24x1xf32> to vector<24x256xf32>
    %301 = arith.mulf %298, %300 : vector<24x256xf32>
    %c17_i32_70 = arith.constant 17 : i32
    %302 = tpu.dynamic_rotate %298 by %c17_i32_70 dim 1 : vector<24x256xf32>, i32 -> vector<24x256xf32>
    %303 = vector.extract_strided_slice %5 {offsets = [0, 0], sizes = [24, 1], strides = [1, 1]} : vector<24x9xf32> to vector<24x1xf32>
    %304 = vector.broadcast %303 : vector<24x1xf32> to vector<24x256xf32>
    %305 = arith.mulf %302, %304 : vector<24x256xf32>
    %306 = vector.extract_strided_slice %6 {offsets = [0, 0], sizes = [1, 256], strides = [1, 1]} : vector<9x256xf32> to vector<1x256xf32>
    %307 = vector.broadcast %306 : vector<1x256xf32> to vector<24x256xf32>
    %308 = arith.mulf %305, %307 : vector<24x256xf32>
    %309 = arith.addf %301, %308 : vector<24x256xf32>
    %c16_i32_71 = arith.constant 16 : i32
    %310 = tpu.dynamic_rotate %298 by %c16_i32_71 dim 1 : vector<24x256xf32>, i32 -> vector<24x256xf32>
    %311 = vector.extract_strided_slice %5 {offsets = [0, 1], sizes = [24, 1], strides = [1, 1]} : vector<24x9xf32> to vector<24x1xf32>
    %312 = vector.broadcast %311 : vector<24x1xf32> to vector<24x256xf32>
    %313 = arith.mulf %310, %312 : vector<24x256xf32>
    %314 = vector.extract_strided_slice %6 {offsets = [1, 0], sizes = [1, 256], strides = [1, 1]} : vector<9x256xf32> to vector<1x256xf32>
    %315 = vector.broadcast %314 : vector<1x256xf32> to vector<24x256xf32>
    %316 = arith.mulf %313, %315 : vector<24x256xf32>
    %317 = arith.addf %309, %316 : vector<24x256xf32>
    %c15_i32_72 = arith.constant 15 : i32
    %318 = tpu.dynamic_rotate %298 by %c15_i32_72 dim 1 : vector<24x256xf32>, i32 -> vector<24x256xf32>
    %319 = vector.extract_strided_slice %5 {offsets = [0, 2], sizes = [24, 1], strides = [1, 1]} : vector<24x9xf32> to vector<24x1xf32>
    %320 = vector.broadcast %319 : vector<24x1xf32> to vector<24x256xf32>
    %321 = arith.mulf %318, %320 : vector<24x256xf32>
    %322 = vector.extract_strided_slice %6 {offsets = [2, 0], sizes = [1, 256], strides = [1, 1]} : vector<9x256xf32> to vector<1x256xf32>
    %323 = vector.broadcast %322 : vector<1x256xf32> to vector<24x256xf32>
    %324 = arith.mulf %321, %323 : vector<24x256xf32>
    %325 = arith.addf %317, %324 : vector<24x256xf32>
    %c1_i32_73 = arith.constant 1 : i32
    %326 = tpu.dynamic_rotate %298 by %c1_i32_73 dim 1 : vector<24x256xf32>, i32 -> vector<24x256xf32>
    %327 = vector.extract_strided_slice %5 {offsets = [0, 3], sizes = [24, 1], strides = [1, 1]} : vector<24x9xf32> to vector<24x1xf32>
    %328 = vector.broadcast %327 : vector<24x1xf32> to vector<24x256xf32>
    %329 = arith.mulf %326, %328 : vector<24x256xf32>
    %330 = vector.extract_strided_slice %6 {offsets = [3, 0], sizes = [1, 256], strides = [1, 1]} : vector<9x256xf32> to vector<1x256xf32>
    %331 = vector.broadcast %330 : vector<1x256xf32> to vector<24x256xf32>
    %332 = arith.mulf %329, %331 : vector<24x256xf32>
    %333 = arith.addf %325, %332 : vector<24x256xf32>
    %c255_i32_74 = arith.constant 255 : i32
    %334 = tpu.dynamic_rotate %298 by %c255_i32_74 dim 1 : vector<24x256xf32>, i32 -> vector<24x256xf32>
    %335 = vector.extract_strided_slice %5 {offsets = [0, 5], sizes = [24, 1], strides = [1, 1]} : vector<24x9xf32> to vector<24x1xf32>
    %336 = vector.broadcast %335 : vector<24x1xf32> to vector<24x256xf32>
    %337 = arith.mulf %334, %336 : vector<24x256xf32>
    %338 = vector.extract_strided_slice %6 {offsets = [5, 0], sizes = [1, 256], strides = [1, 1]} : vector<9x256xf32> to vector<1x256xf32>
    %339 = vector.broadcast %338 : vector<1x256xf32> to vector<24x256xf32>
    %340 = arith.mulf %337, %339 : vector<24x256xf32>
    %341 = arith.addf %333, %340 : vector<24x256xf32>
    %c241_i32_75 = arith.constant 241 : i32
    %342 = tpu.dynamic_rotate %298 by %c241_i32_75 dim 1 : vector<24x256xf32>, i32 -> vector<24x256xf32>
    %343 = vector.extract_strided_slice %5 {offsets = [0, 6], sizes = [24, 1], strides = [1, 1]} : vector<24x9xf32> to vector<24x1xf32>
    %344 = vector.broadcast %343 : vector<24x1xf32> to vector<24x256xf32>
    %345 = arith.mulf %342, %344 : vector<24x256xf32>
    %346 = vector.extract_strided_slice %6 {offsets = [6, 0], sizes = [1, 256], strides = [1, 1]} : vector<9x256xf32> to vector<1x256xf32>
    %347 = vector.broadcast %346 : vector<1x256xf32> to vector<24x256xf32>
    %348 = arith.mulf %345, %347 : vector<24x256xf32>
    %349 = arith.addf %341, %348 : vector<24x256xf32>
    %c240_i32_76 = arith.constant 240 : i32
    %350 = tpu.dynamic_rotate %298 by %c240_i32_76 dim 1 : vector<24x256xf32>, i32 -> vector<24x256xf32>
    %351 = vector.extract_strided_slice %5 {offsets = [0, 7], sizes = [24, 1], strides = [1, 1]} : vector<24x9xf32> to vector<24x1xf32>
    %352 = vector.broadcast %351 : vector<24x1xf32> to vector<24x256xf32>
    %353 = arith.mulf %350, %352 : vector<24x256xf32>
    %354 = vector.extract_strided_slice %6 {offsets = [7, 0], sizes = [1, 256], strides = [1, 1]} : vector<9x256xf32> to vector<1x256xf32>
    %355 = vector.broadcast %354 : vector<1x256xf32> to vector<24x256xf32>
    %356 = arith.mulf %353, %355 : vector<24x256xf32>
    %357 = arith.addf %349, %356 : vector<24x256xf32>
    %c239_i32_77 = arith.constant 239 : i32
    %358 = tpu.dynamic_rotate %298 by %c239_i32_77 dim 1 : vector<24x256xf32>, i32 -> vector<24x256xf32>
    %359 = vector.extract_strided_slice %5 {offsets = [0, 8], sizes = [24, 1], strides = [1, 1]} : vector<24x9xf32> to vector<24x1xf32>
    %360 = vector.broadcast %359 : vector<24x1xf32> to vector<24x256xf32>
    %361 = arith.mulf %358, %360 : vector<24x256xf32>
    %362 = vector.extract_strided_slice %6 {offsets = [8, 0], sizes = [1, 256], strides = [1, 1]} : vector<9x256xf32> to vector<1x256xf32>
    %363 = vector.broadcast %362 : vector<1x256xf32> to vector<24x256xf32>
    %364 = arith.mulf %361, %363 : vector<24x256xf32>
    %365 = arith.addf %357, %364 : vector<24x256xf32>
    %366 = vector.broadcast %3 : vector<24x1xf32> to vector<24x256xf32>
    %367 = arith.addf %365, %366 : vector<24x256xf32>
    %cst_78 = arith.constant 0.000000e+00 : f32
    %cst_79 = arith.constant 6.000000e+00 : f32
    %368 = vector.broadcast %cst_78 : f32 to vector<24x256xf32>
    %369 = arith.maximumf %368, %367 : vector<24x256xf32>
    %370 = vector.broadcast %cst_79 : f32 to vector<24x256xf32>
    %371 = arith.minimumf %370, %369 : vector<24x256xf32>
    %cst_80 = arith.constant dense<0.000000e+00> : vector<4x256xf32>
    %372 = tpu.matmul %1, %371, %cst_80 {dimension_numbers = #tpu.dot_dimension_numbers<[1], [0], [0], [1], [0, 0, 1, 1], [], []>} : vector<4x24xf32>, vector<24x256xf32>, vector<4x256xf32> -> vector<4x256xf32>
    %373 = vector.broadcast %4 : vector<4x1xf32> to vector<4x256xf32>
    %374 = arith.addf %372, %373 : vector<4x256xf32>
    %375 = arith.index_cast %c3_i32 : i32 to index
    %c0_81 = arith.constant 0 : index
    %c0_82 = arith.constant 0 : index
    %376 = vector.load %arg1[%375, %c0_81, %c0_82] : memref<4x4x256xf32, #tpu.memory_space<vmem>>, vector<1x4x256xf32>
    %377 = vector.shape_cast %376 : vector<1x4x256xf32> to vector<4x256xf32>
    %378 = arith.addf %374, %377 : vector<4x256xf32>
    %379 = arith.index_cast %c3_i32 : i32 to index
    %c0_83 = arith.constant 0 : index
    %c0_84 = arith.constant 0 : index
    %380 = vector.load %arg9[%379, %c0_83, %c0_84] : memref<4x4x256xf32, #tpu.memory_space<vmem>>, vector<1x4x256xf32>
    %381 = vector.shape_cast %380 : vector<1x4x256xf32> to vector<4x256xf32>
    %382 = vector.shape_cast %378 : vector<4x256xf32> to vector<1x4x256xf32>
    tpu.vector_store %arg9[%379, %c0_83, %c0_84], %382 {strides = array<i32>} : memref<4x4x256xf32, #tpu.memory_space<vmem>>, vector<1x4x256xf32>,
    %c4_i32 = arith.constant 4 : i32
    return
  }
  func.func @transform_0(%arg0: i32) -> (i32, i32, i32) {
    %c0_i32 = arith.constant 0 : i32
    %c0_i32_0 = arith.constant 0 : i32
    %c0_i32_1 = arith.constant 0 : i32
    return %arg0, %c0_i32, %c0_i32_0 : i32, i32, i32
  }
  func.func @transform_1(%arg0: i32) -> (i32, i32) {
    %c0_i32 = arith.constant 0 : i32
    %c0_i32_0 = arith.constant 0 : i32
    %c0_i32_1 = arith.constant 0 : i32
    return %c0_i32, %c0_i32_0 : i32, i32
  }
  func.func @transform_2(%arg0: i32) -> (i32, i32) {
    %c0_i32 = arith.constant 0 : i32
    %c0_i32_0 = arith.constant 0 : i32
    %c0_i32_1 = arith.constant 0 : i32
    return %c0_i32, %c0_i32_0 : i32, i32
  }
  func.func @transform_3(%arg0: i32) -> (i32, i32) {
    %c0_i32 = arith.constant 0 : i32
    %c0_i32_0 = arith.constant 0 : i32
    %c0_i32_1 = arith.constant 0 : i32
    return %c0_i32, %c0_i32_0 : i32, i32
  }
  func.func @transform_4(%arg0: i32) -> (i32, i32) {
    %c0_i32 = arith.constant 0 : i32
    %c0_i32_0 = arith.constant 0 : i32
    %c0_i32_1 = arith.constant 0 : i32
    return %c0_i32, %c0_i32_0 : i32, i32
  }
  func.func @transform_5(%arg0: i32) -> (i32, i32) {
    %c0_i32 = arith.constant 0 : i32
    %c0_i32_0 = arith.constant 0 : i32
    %c0_i32_1 = arith.constant 0 : i32
    return %c0_i32, %c0_i32_0 : i32, i32
  }
  func.func @transform_6(%arg0: i32) -> (i32, i32) {
    %c0_i32 = arith.constant 0 : i32
    %c0_i32_0 = arith.constant 0 : i32
    %c0_i32_1 = arith.constant 0 : i32
    return %c0_i32, %c0_i32_0 : i32, i32
  }
  func.func @transform_7(%arg0: i32) -> (i32, i32) {
    %c0_i32 = arith.constant 0 : i32
    %c0_i32_0 = arith.constant 0 : i32
    %c0_i32_1 = arith.constant 0 : i32
    return %c0_i32, %c0_i32_0 : i32, i32
  }
  func.func @transform_8(%arg0: i32) -> (i32, i32, i32) {
    %c0_i32 = arith.constant 0 : i32
    %c0_i32_0 = arith.constant 0 : i32
    %c0_i32_1 = arith.constant 0 : i32
    return %arg0, %c0_i32, %c0_i32_0 : i32, i32, i32
  }
}

</mosaic_0001>

<bundles_post_ra>
// kernel: tpu_custom_call.1
= control target key start
LH: loop header
LB: loop body
LE: loop exit
PB: predicated region body
PF: predicated region fallthrough
CT: control target
= control target key end

     0   :  { %13 = vsyncpa [#allocation3], 0  ;;  %s4826_s0 = inlined_call_operand.vmem [shape: f32[8,4,256], index: 0, kind: input, shape index: {}]   ;;  %s4827_s1 = inlined_call_operand.vmem [shape: f32[9,256], index: 1, kind: input, shape index: {}]   ;;  %s4828_s2 = inlined_call_operand.vmem [shape: f32[24,4], index: 2, kind: input, shape index: {}]   ;;  %s4829_s3 = inlined_call_operand.vmem [shape: f32[24,1], index: 3, kind: input, shape index: {}]   ;;  %s4830_s4 = inlined_call_operand.vmem [shape: f32[24,9], index: 4, kind: input, shape index: {}]   ;;  %s4831_s5 = inlined_call_operand.vmem [shape: f32[24,1], index: 5, kind: input, shape index: {}]   ;;  %s4832_s6 = inlined_call_operand.vmem [shape: f32[4,24], index: 6, kind: input, shape index: {}]   ;;  %s4833_s7 = inlined_call_operand.vmem [shape: f32[4,1], index: 7, kind: input, shape index: {}]   ;;  %s4834_s8 = inlined_call_operand.hbm [shape: f32[8,4,256], index: 8, kind: output, shape index: {}]  }
   0x1   :  { %15 = vsyncpa [#allocation3 + $0x1], 0  ;;  %s2906_s27 = smov 0   ;;  %s2908_s28 = smov 0  }
   0x2   :  { %s2910_s29 = smov 0   ;;  %s2912_s30 = smov 0  }
   0x3 LB: > { %s2927_s9 = sadd.s32 4294967295, %s2838_s30   ;;  %s2618_s10 = sadd.s32 4294967294, %s2838_s30   ;;  %s2838_s30 = sphi %s2912_s30, %s5142_s30   ;;  %s2834_s29 = sphi %s2910_s29, %s5141_s29   ;;  %s2830_s28 = sphi %s2908_s28, %s5140_s28   ;;  %s2826_s27 = sphi %s2906_s27, %s5139_s27  }
   0x4   : > { %s2931_s11 = sadd.s32 1, %s2838_s30   ;;  %s201_s12 = sadd.s32 1, %s2834_s29 }
   0x5   : > { %s198_s13 = ssub.s32 %s2838_s30, %s2931_s11  ;;  %p211_p0 = scmp.ne.s32.totalorder %s2834_s29, %s2830_s28 }
   0x6   : > { %p199_p1 = scmp.eq.s32.totalorder %s198_s13, 0  ;;  %p212_p2 = scmp.eq.s32.totalorder %s2927_s9, 1 }
   0x7   : > { %p217_p3 = scmp.ne.s32.totalorder %s2830_s28, %s2826_s27  ;;  %p218_p4 = scmp.eq.s32.totalorder %s2618_s10, 1 }
   0x8   : > { %s2942_s14 = scalar_select %p199_p1, %s2834_s29, %s201_s12  }
   0x9   : > { %p2944_p5 = por %p212_p2, %p211_p0  ;;  %p2948_p6 = por %p218_p4, %p217_p3 }
   0xa   : > { %p2621_p7 = scmp.ge.s32.totalorder %s2838_s30, 1  ;;  %p267_p8 = scmp.lt.s32.totalorder %s2838_s30, 3 }
   0xc   : > { %p268_p9 = pnand %p2621_p7, %p267_p8 }
   0xe   : > { %271 = sbr.rel (%p268_p9) target bundleno = 2058 (0x80a), region = 52 }
  0x15   : > { %s2623_s17 = sshll.u32 %s2927_s9, 2  ;;  %v4835_v0 = vmov 0.0   ;;  %v2959_v1 = vld [vmem:[%s4830_s4 + $0x8] sm:$0xff]  ;;  %v2841_v2 = vmov 4   ;;  %v316_v3 = vld [vmem:[%s4829_s3 + $0x10] sm:$0xff]  ;;  %v2842_v4 = vmov 0  }
  0x16   : > { %p303_p10 = scmp.lt.s32.totalorder %s2623_s17, 7  ;;  %425 = vmatprep.mubr.f32.mxu0 %v4835_v0  ;;  %1041 = vmatprep.mubr.f32.mxu1 %v4835_v0  ;;  %v323_v5 = vld [vmem:[%s4830_s4 + $0x10] sm:$0xff]  ;;  %vm356_vm0 = vcmask 1043456   ;;  %v2843_v7 = vmov 1   ;;  %v321_v9 = vld [vmem:[%s4830_s4] sm:$0xff]  ;;  %vm346_vm1 = vcmask 31744  }
  0x17   : > { %2744 = vset.pattern.permute.xlu0 %v2841_v2  ;;  %2742 = vset.pattern.permute.xlu1 %v2842_v4  ;;  %v2984_v10 = vld [vmem:[%s4828_s2] sm:$0xff]  ;;  %v2844_v11 = vmov 2   ;;  %v2995_v12 = vld [vmem:[%s4828_s2 + $0x8] sm:$0xff]  ;;  %v3003_v13 = vld [vmem:[%s4828_s2 + $0x10] sm:$0xff]  ;;  %v2845_v14 = vmov 3   ;;  %v2846_v15 = vmov 5  }
  0x18   : > { %s5144_s17 = smov (!%p303_p10, %s2623_s17), 7  ;;  %463 = vperm.xlu0 %2744, %v2959_v1   ;;  %341 = vperm.xlu1 %2742, %v316_v3   ;;  %4967 = vst [vmem:[#allocation6_spill] sm:$0xff] %v2984_v10  ;;  %4968 = vst [vmem:[#allocation7_spill] sm:$0xff] %v2995_v12  ;;  %v2847_v16 = vmov 6   ;;  %v2848_v17 = vmov 7   ;;  %v2849_v18 = vmov 8  }
  0x19   : > { %s2664_s22 = sshll.u32 %s5144_s17, 3  ;;  %4969 = vst [vmem:[#allocation8_spill] sm:$0xff] %v3003_v13  ;;  %v314_v19 = vld [vmem:[%s4829_s3] sm:$0xff]  ;;  %v315_v20 = vld [vmem:[%s4829_s3 + $0x8] sm:$0xff]  ;;  %s2850_s19 = smov 16   ;;  %vm973_vm10 = vcmask 195584  }
  0x1a   : > { %s2973_s10 = scalar_lea.vmem %s4826_s0, %s2664_s22  ;;  %v317_v21 = vld [vmem:[%s4831_s5] sm:$0xff]  ;;  %v318_v22 = vld [vmem:[%s4831_s5 + $0x8] sm:$0xff]  ;;  %s2851_s20 = smov 17  }
  0x1b   : > { %v328_v6 = vld [vmem:[%s2973_s10] sm:$0xff]  ;;  %s2852_s21 = smov 15   ;;  %s2853_s22 = smov 1  }
  0x1c   : > { %2750 = vset.pattern.permute.xlu0 %v2843_v7  ;;  %v2976_v8 = vcombine.high %v328_v6, %v328_v6  ;;  %499 = vperm.xlu1 %2742, %v321_v9   ;;  %s2854_s23 = smov 127   ;;  %s2855_s24 = smov 113  }
  0x1d   : > { %564 = vperm.xlu0 %2750, %v323_v5   ;;  %s4908_s25 = smov 112   ;;  %s4906_s26 = smov 111  }
  0x1e   : > { %4966 = vst [vmem:[#allocation5_spill] sm:$0xff] %v2976_v8  ;;  %2626 = vmatprep.subr.msk.mxu0 %vm356_vm0, %v2976_v8  ;;  %v3243_v8 = vld [vmem:[%s4827_s1] sm:$0xff]  ;;  %s2858_s12 = smov [#allocation2]  }
  0x1f   : > { %2627 = vmatpush1.msk.msra.mxu0 %vm356_vm0, %v328_v6  ;;  %s2780_s13 = sshll.u32 %s2858_s12, 4  ;;  %s2781_s13 = int_to_ptr.vmem [resolvable:$false] %s2780_s13 }
  0x20   : > { %2628 = vmatmul.mubr.msk.f32.vlgmr.msra.gmra.mrb[0].mxu0 %vm346_vm1, %v2984_v10  ;;  %2743 = vset.pattern.permute.xlu1 %v2841_v2 }
  0x21   : > { %2751 = vset.pattern.permute.xlu0 %v2844_v11  ;;  %431 = vmatprep.mubr.f32.mxu0 %v4835_v0 }
  0x22   : > { %613 = vperm.xlu0 %2751, %v321_v9   ;;  %458 = vperm.xlu1 %2743, %v321_v9  }
  0x24   : > { %2629 = vmatmul.mubr.msk.f32.gmra.mrb[2].mxu0 %vm346_vm1, %v2995_v12 }
  0x25   : > { %437 = vmatprep.mubr.f32.mxu0 %v4835_v0 }
  0x26   : > { %621 = vperm.xlu0 %2751, %v323_v5   ;;  %2745 = vset.pattern.permute.xlu1 %v2843_v7 }
  0x27   : > { %556 = vperm.xlu1 %2745, %v321_v9  }
  0x28   : > { %2630 = vmatmul.mubr.msk.f32.gmra.mrb[4].mxu0 %vm346_vm1, %v3003_v13 }
  0x29   : > { %1535 = vmatprep.mubr.f32.mxu0 %v4835_v0 }
  0x2a   : > { %2753 = vset.pattern.permute.xlu0 %v2845_v14 }
  0x2b   : > { %670 = vperm.xlu0 %2753, %v321_v9   ;;  %560 = vperm.xlu1 %2745, %v2959_v1  }
  0x2f   : > { %678 = vperm.xlu0 %2753, %v323_v5   ;;  %2746 = vset.pattern.permute.xlu1 %v2844_v11 }
  0x30   : > { %617 = vperm.xlu1 %2746, %v2959_v1  }
  0x33   : > { %2756 = vset.pattern.permute.xlu0 %v2846_v15 }
  0x34   : > { %735 = vperm.xlu0 %2756, %v323_v5   ;;  %2747 = vset.pattern.permute.xlu1 %v2842_v4 }
  0x35   : > { %507 = vperm.xlu1 %2747, %v323_v5  }
  0x38   : > { %2758 = vset.pattern.permute.xlu0 %v2847_v16 }
  0x39   : > { %792 = vperm.xlu0 %2758, %v323_v5   ;;  %2748 = vset.pattern.permute.xlu1 %v2845_v14  ;;  %v319_v14 = vld [vmem:[%s4831_s5 + $0x10] sm:$0xff] }
  0x3a   : > { %674 = vperm.xlu1 %2748, %v2959_v1  }
  0x3d   : > { %2759 = vset.pattern.permute.xlu0 %v2848_v17 }
  0x3e   : > { %849 = vperm.xlu0 %2759, %v323_v5   ;;  %2749 = vset.pattern.permute.xlu1 %v2841_v2 }
  0x3f   : > { %468 = vperm.xlu1 %2749, %v323_v5  }
  0x42   : > { %2760 = vset.pattern.permute.xlu0 %v2849_v18 }
  0x43   : > { %906 = vperm.xlu0 %2760, %v323_v5   ;;  %2752 = vset.pattern.permute.xlu1 %v2846_v15 }
  0x44   : > { %727 = vperm.xlu1 %2752, %v321_v9  }
  0x47   : > { %2761 = vset.pattern.permute.xlu0 %v2842_v4 }
  0x48   : > { %331 = vperm.xlu0 %2761, %v314_v19   ;;  %731 = vperm.xlu1 %2752, %v2959_v1  }
  0x4c   : > { %336 = vperm.xlu0 %2761, %v315_v20   ;;  %2754 = vset.pattern.permute.xlu1 %v2847_v16 }
  0x4d   : > { %784 = vperm.xlu1 %2754, %v321_v9  }
  0x50   : > { %503 = vperm.xlu0 %2761, %v2959_v1  }
  0x51   : > { %788 = vperm.xlu1 %2754, %v2959_v1  }
  0x55   : > { %2755 = vset.pattern.permute.xlu1 %v2848_v17 }
  0x56   : > { %841 = vperm.xlu1 %2755, %v321_v9  }
  0x5a   : > { %845 = vperm.xlu1 %2755, %v2959_v1  }
  0x5e   : > { %2757 = vset.pattern.permute.xlu1 %v2849_v18 }
  0x5f   : > { %898 = vperm.xlu1 %2757, %v321_v9  }
  0x63   : > { %902 = vperm.xlu1 %2757, %v2959_v1  }
  0x67   : > { %2762 = vset.pattern.permute.xlu1 %v2842_v4 }
  0x68   : > { %937 = vperm.xlu1 %2762, %v317_v21  }
  0x6c   : > { %942 = vperm.xlu1 %2762, %v318_v22  }
  0x97   : > { %v3031_v23 = vpop.permute.xlu0 %463  ;;  %v3070_v49 = vpop.permute.xlu1 %341 }
  0x98   : > { %4970 = vst [vmem:[#allocation9_spill] sm:$0xff] %v3031_v23  ;;  %4982 = vst [vmem:[#allocation21_spill] sm:$0xff] %v3070_v49 }
  0x9b   : > { %v3078_v51 = vpop.permute.xlu1 %499 }
  0x9c   : > { %v3033_v24 = vpop.permute.xlu0 %564  ;;  %4983 = vst [vmem:[#allocation22_spill] sm:$0xff] %v3078_v51 }
  0x9d   : > { %4971 = vst [vmem:[#allocation10_spill] sm:$0xff] %v3033_v24 }
  0xa1   : > { %v3035_v25 = vpop.permute.xlu0 %613  ;;  %v3088_v52 = vpop.permute.xlu1 %458 }
  0xa2   : > { %4972 = vst [vmem:[#allocation11_spill] sm:$0xff] %v3035_v25  ;;  %4984 = vst [vmem:[#allocation23_spill] sm:$0xff] %v3088_v52 }
  0xa5   : > { %v3037_v26 = vpop.permute.xlu0 %621 }
  0xa6   : > { %4973 = vst [vmem:[#allocation12_spill] sm:$0xff] %v3037_v26  ;;  %v3094_v53 = vpop.permute.xlu1 %556 }
  0xa7   : > { %4985 = vst [vmem:[#allocation24_spill] sm:$0xff] %v3094_v53 }
  0xaa   : > { %v3039_v27 = vpop.permute.xlu0 %670  ;;  %v3101_v55 = vpop.permute.xlu1 %560 }
  0xab   : > { %4974 = vst [vmem:[#allocation13_spill] sm:$0xff] %v3039_v27  ;;  %4986 = vst [vmem:[#allocation25_spill] sm:$0xff] %v3101_v55 }
  0xae   : > { %v3041_v28 = vpop.permute.xlu0 %678 }
  0xaf   : > { %4975 = vst [vmem:[#allocation14_spill] sm:$0xff] %v3041_v28  ;;  %v3113_v58 = vpop.permute.xlu1 %617 }
  0xb3   : > { %v3043_v29 = vpop.permute.xlu0 %735 }
  0xb4   : > { %4976 = vst [vmem:[#allocation15_spill] sm:$0xff] %v3043_v29  ;;  %v3119_v59 = vpop.permute.xlu1 %507 }
  0xb5   : > { %4987 = vst [vmem:[#allocation26_spill] sm:$0xff] %v3119_v59 }
  0xb8   : > { %v3045_v30 = vpop.permute.xlu0 %792 }
  0xb9   : > { %4977 = vst [vmem:[#allocation16_spill] sm:$0xff] %v3045_v30  ;;  %v3129_v60 = vpop.permute.xlu1 %674 }
  0xbd   : > { %v3047_v31 = vpop.permute.xlu0 %849 }
  0xbe   : > { %4978 = vst [vmem:[#allocation17_spill] sm:$0xff] %v3047_v31  ;;  %v3135_v61 = vpop.permute.xlu1 %468 }
  0xbf   : > { %4988 = vst [vmem:[#allocation27_spill] sm:$0xff] %v3135_v61 }
  0xc2   : > { %v3049_v32 = vpop.permute.xlu0 %906 }
  0xc3   : > { %4979 = vst [vmem:[#allocation18_spill] sm:$0xff] %v3049_v32  ;;  %v3146_v63 = vpop.permute.xlu1 %727 }
  0xc7   : > { %v3051_v33 = vpop.permute.xlu0 %331  ;;  %v3155_v4 = vpop.permute.xlu1 %731 }
  0xc8   : > { %4980 = vst [vmem:[#allocation19_spill] sm:$0xff] %v3051_v33  ;;  %4990 = vst [vmem:[#allocation29_spill] sm:$0xff] %v3155_v4 }
  0xcb   : > { %v3055_v39 = vpop.permute.xlu0 %336 }
  0xcc   : > { %4981 = vst [vmem:[#allocation20_spill] sm:$0xff] %v3055_v39  ;;  %v3165_v6 = vpop.permute.xlu1 %784 }
  0xcf   : > { %v3208_v19 = vpop.permute.xlu0 %503 }
  0xd0   : > { %v3173_v9 = vpop.permute.xlu1 %788  ;;  %4997 = vst [vmem:[#allocation36_spill] sm:$0xff] %v3208_v19 }
  0xd5   : > { %v3183_v11 = vpop.permute.xlu1 %841 }
  0xd6   : > { %4992 = vst [vmem:[#allocation31_spill] sm:$0xff] %v3183_v11 }
  0xd9   : > { %v3192_v15 = vpop.permute.xlu1 %845 }
  0xda   : > { %4993 = vst [vmem:[#allocation32_spill] sm:$0xff] %v3192_v15 }
  0xde   : > { %v3198_v16 = vpop.permute.xlu1 %898 }
  0xdf   : > { %4994 = vst [vmem:[#allocation33_spill] sm:$0xff] %v3198_v16 }
  0xe2   : > { %v3202_v17 = vpop.permute.xlu1 %902 }
  0xe3   : > { %4995 = vst [vmem:[#allocation34_spill] sm:$0xff] %v3202_v17 }
  0xe7   : > { %v3206_v18 = vpop.permute.xlu1 %937 }
  0xe8   : > { %4996 = vst [vmem:[#allocation35_spill] sm:$0xff] %v3206_v18 }
  0xeb   : > { %v3210_v20 = vpop.permute.xlu1 %942 }
  0xec   : > { %4998 = vst [vmem:[#allocation37_spill] sm:$0xff] %v3210_v20 }
  0xf3   : > { %v427_v34 = vpop.f32.mrb[0].mxu0 }
  0xf4   : > { %v428_v35 = vadd.f32 %v427_v34, %v3051_v33  ;;  %v429_v36 = vpop.f32.mrb[1].mxu0 }
  0xf5   : > { %v430_v37 = vadd.f32 %v429_v36, %v3051_v33 }
  0xf6   : > { %v444_v38 = vmax.f32 %v428_v35, 0.0 }
  0xf7   : > { %v433_v40 = vpop.f32.mrb[2].mxu0  ;;  %v445_v42 = vmax.f32 %v430_v37, 0.0 }
  0xf8   : > { %v3057_v41 = vmin.f32 %v444_v38, 6.0  ;;  %v434_v43 = vadd.f32 %v433_v40, %v3055_v39  ;;  %v435_v44 = vpop.f32.mrb[3].mxu0 }
  0xf9   : > { %v3064_v46 = vmin.f32 %v445_v42, 6.0  ;;  %v436_v54 = vadd.f32 %v435_v44, %v3055_v39 }
  0xfa   : > { %536 = vrot.lane.b32.xlu0 %v3057_v41, %s2850_s19  ;;  %477 = vrot.lane.b32.xlu1 %v3057_v41, %s2851_s20  ;;  %v446_v47 = vmax.f32 %v434_v43, 0.0 }
  0xfb   : > { %v439_v45 = vpop.f32.mrb[4].mxu0  ;;  %v447_v56 = vmax.f32 %v436_v54, 0.0  ;;  %v489_v54 = vlaneseq }
  0xfc   : > { %v441_v48 = vpop.f32.mrb[5].mxu0  ;;  %v3072_v50 = vmin.f32 %v446_v47, 6.0  ;;  %v440_v62 = vadd.f32 %v439_v45, %v3070_v49 }
  0xfd   : > { %v3111_v57 = vmin.f32 %v447_v56, 6.0  ;;  %v442_v3 = vadd.f32 %v441_v48, %v3070_v49  ;;  %v3248_v49 = vld [vmem:[%s4827_s1 + $0x8] sm:$0xff] }
  0xfe   : > { %593 = vrot.lane.b32.xlu0 %v3057_v41, %s2852_s21  ;;  %483 = vrot.lane.b32.xlu1 %v3064_v46, %s2851_s20  ;;  %v448_v1 = vmax.f32 %v440_v62, 0.0 }
  0xff   : > { %v449_v5 = vmax.f32 %v442_v3, 0.0  ;;  %v3234_v3 = vshrl.u32 %v489_v54, 7 }
 0x100   : > { %v3152_v2 = vmin.f32 %v448_v1, 6.0  ;;  %v3232_v1 = vand.u32 127, %v489_v54 }
 0x101   : > { %v3167_v7 = vmin.f32 %v449_v5, 6.0  ;;  %v518_v0 = vsub.s32 0, %v3234_v3  ;;  %v575_v12 = vsub.s32 1, %v3234_v3  ;;  %v632_v31 = vsub.s32 2, %v3234_v3 }
 0x102   : > { %650 = vrot.lane.b32.xlu0 %v3057_v41, %s2853_s22  ;;  %538 = vrot.lane.b32.xlu1 %v3072_v50, %s2850_s19  ;;  %4989 = vst [vmem:[#allocation28_spill] sm:$0xff] %v3152_v2  ;;  %vm491_vm2 = vcmp.lt.s32.totalorder %v3232_v1, 17  ;;  %vm548_vm3 = vcmp.lt.s32.totalorder %v3232_v1, 16  ;;  %vm605_vm4 = vcmp.lt.s32.totalorder %v3232_v1, 15  ;;  %vm662_vm5 = vcmp.lt.s32.totalorder %v3232_v1, 1 }
 0x103   : > { %4991 = vst [vmem:[#allocation30_spill] sm:$0xff] %v3167_v7  ;;  %v3259_v10 = vrot.slane %v3243_v8, %v518_v0  ;;  %v3262_v32 = vrot.slane %v3248_v49, %v518_v0  ;;  %vm719_vm6 = vcmp.lt.s32.totalorder %v3232_v1, 127  ;;  %v3275_v0 = vrot.slane %v3243_v8, %v575_v12 }
 0x104   : > { %v3283_v24 = vrot.slane %v3248_v49, %v575_v12  ;;  %v3288_v20 = vrot.slane %v3243_v8, %v632_v31  ;;  %vm776_vm7 = vcmp.lt.s32.totalorder %v3232_v1, 113  ;;  %vm833_vm8 = vcmp.lt.s32.totalorder %v3232_v1, 112 }
 0x105   : > { %5000 = vst [vmem:[#allocation39_spill] sm:$0xff] %v3275_v0  ;;  %vm890_vm9 = vcmp.lt.s32.totalorder %v3232_v1, 111 }
 0x106   : > { %707 = vrot.lane.b32.xlu0 %v3057_v41, %s2854_s23  ;;  %595 = vrot.lane.b32.xlu1 %v3072_v50, %s2852_s21  ;;  %5001 = vst [vmem:[#allocation40_spill] sm:$0xff] %v3283_v24 }
 0x10a   : > { %764 = vrot.lane.b32.xlu0 %v3057_v41, %s2855_s24  ;;  %652 = vrot.lane.b32.xlu1 %v3072_v50, %s2853_s22 }
 0x10e   : > { %821 = vrot.lane.b32.xlu0 %v3057_v41, %s4908_s25  ;;  %709 = vrot.lane.b32.xlu1 %v3072_v50, %s2854_s23 }
 0x112   : > { %878 = vrot.lane.b32.xlu0 %v3057_v41, %s4906_s26  ;;  %766 = vrot.lane.b32.xlu1 %v3072_v50, %s2855_s24 }
 0x116   : > { %542 = vrot.lane.b32.xlu0 %v3064_v46, %s2850_s19  ;;  %823 = vrot.lane.b32.xlu1 %v3072_v50, %s4908_s25 }
 0x11a   : > { %599 = vrot.lane.b32.xlu0 %v3064_v46, %s2852_s21  ;;  %880 = vrot.lane.b32.xlu1 %v3072_v50, %s4906_s26 }
 0x11e   : > { %656 = vrot.lane.b32.xlu0 %v3064_v46, %s2853_s22  ;;  %544 = vrot.lane.b32.xlu1 %v3111_v57, %s2850_s19 }
 0x122   : > { %713 = vrot.lane.b32.xlu0 %v3064_v46, %s2854_s23  ;;  %601 = vrot.lane.b32.xlu1 %v3111_v57, %s2852_s21 }
 0x126   : > { %770 = vrot.lane.b32.xlu0 %v3064_v46, %s2855_s24  ;;  %658 = vrot.lane.b32.xlu1 %v3111_v57, %s2853_s22 }
 0x12a   : > { %827 = vrot.lane.b32.xlu0 %v3064_v46, %s4908_s25  ;;  %715 = vrot.lane.b32.xlu1 %v3111_v57, %s2854_s23 }
 0x12e   : > { %884 = vrot.lane.b32.xlu0 %v3064_v46, %s4906_s26  ;;  %772 = vrot.lane.b32.xlu1 %v3111_v57, %s2855_s24 }
 0x132   : > { %479 = vrot.lane.b32.xlu0 %v3072_v50, %s2851_s20  ;;  %829 = vrot.lane.b32.xlu1 %v3111_v57, %s4908_s25 }
 0x136   : > { %485 = vrot.lane.b32.xlu0 %v3111_v57, %s2851_s20  ;;  %886 = vrot.lane.b32.xlu1 %v3111_v57, %s4906_s26 }
 0x13a   : > { %481 = vrot.lane.b32.xlu0 %v3152_v2, %s2851_s20  ;;  %654 = vrot.lane.b32.xlu1 %v3152_v2, %s2853_s22 }
 0x13e   : > { %540 = vrot.lane.b32.xlu0 %v3152_v2, %s2850_s19  ;;  %711 = vrot.lane.b32.xlu1 %v3152_v2, %s2854_s23 }
 0x142   : > { %597 = vrot.lane.b32.xlu0 %v3152_v2, %s2852_s21  ;;  %487 = vrot.lane.b32.xlu1 %v3167_v7, %s2851_s20 }
 0x146   : > { %768 = vrot.lane.b32.xlu0 %v3152_v2, %s2855_s24  ;;  %546 = vrot.lane.b32.xlu1 %v3167_v7, %s2850_s19 }
 0x14a   : > { %825 = vrot.lane.b32.xlu0 %v3152_v2, %s4908_s25  ;;  %603 = vrot.lane.b32.xlu1 %v3167_v7, %s2852_s21 }
 0x14e   : > { %882 = vrot.lane.b32.xlu0 %v3152_v2, %s4906_s26  ;;  %660 = vrot.lane.b32.xlu1 %v3167_v7, %s2853_s22  ;;  %v3293_v2 = vrot.slane %v3248_v49, %v632_v31  ;;  %v471_v31 = vmul.f32 %v3088_v52, %v3057_v41 }
 0x152   : > { %947 = vperm.xlu0 %2761, %v319_v14   ;;  %717 = vrot.lane.b32.xlu1 %v3167_v7, %s2854_s23 }
 0x156   : > { %774 = vrot.lane.b32.xlu1 %v3167_v7, %s2855_s24 }
 0x15a   : > { %831 = vrot.lane.b32.xlu1 %v3167_v7, %s4908_s25 }
 0x15e   : > { %888 = vrot.lane.b32.xlu1 %v3167_v7, %s4906_s26 }
 0x16c   : > { %v537_v21 = vpop.permute.xlu0 %536  ;;  %v478_v22 = vpop.permute.xlu1 %477 }
 0x170   : > { %v594_v34 = vpop.permute.xlu0 %593  ;;  %v484_v35 = vpop.permute.xlu1 %483 }
 0x171   : > { %v492_v33 = vsel %vm491_vm2, %v478_v22, %v484_v35  ;;  %v495_v13 = vsel %vm491_vm2, %v484_v35, %v478_v22 }
 0x172   : > { %v510_v30 = vmul.f32 %v3078_v51, %v495_v13  ;;  %v511_v29 = vmul.f32 %v3078_v51, %v492_v33  ;;  %v689_v51 = vsub.s32 3, %v3234_v3 }
 0x174   : > { %v651_v36 = vpop.permute.xlu0 %650  ;;  %v3212_v37 = vpop.permute.xlu1 %538  ;;  %v524_v7 = vmul.f32 %v3259_v10, %v510_v30  ;;  %v525_v61 = vmul.f32 %v3262_v32, %v511_v29  ;;  %v472_v29 = vmul.f32 %v3088_v52, %v3064_v46  ;;  %v3323_v41 = vrot.slane %v3248_v49, %v689_v51 }
 0x176   : > { %v530_v18 = vadd.f32 %v524_v7, %v471_v31  ;;  %v531_v17 = vadd.f32 %v525_v61, %v472_v29 }
 0x178   : > { %v3214_v38 = vpop.permute.xlu0 %707  ;;  %v3216_v40 = vpop.permute.xlu1 %595 }
 0x17c   : > { %v3218_v42 = vpop.permute.xlu0 %764  ;;  %v3220_v43 = vpop.permute.xlu1 %652 }
 0x180   : > { %v3222_v44 = vpop.permute.xlu0 %821  ;;  %v3224_v45 = vpop.permute.xlu1 %709 }
 0x184   : > { %v3226_v47 = vpop.permute.xlu0 %878  ;;  %v3228_v48 = vpop.permute.xlu1 %766 }
 0x188   : > { %v543_v56 = vpop.permute.xlu0 %542  ;;  %v3230_v62 = vpop.permute.xlu1 %823 }
 0x189   : > { %v549_v28 = vsel %vm548_vm3, %v537_v21, %v543_v56  ;;  %v552_v22 = vsel %vm548_vm3, %v543_v56, %v537_v21 }
 0x18a   : > { %v567_v21 = vmul.f32 %v3094_v53, %v552_v22  ;;  %v568_v56 = vmul.f32 %v3094_v53, %v549_v28  ;;  %v3308_v53 = vrot.slane %v3243_v8, %v689_v51 }
 0x18c   : > { %v600_v5 = vpop.permute.xlu0 %599  ;;  %v3236_v14 = vpop.permute.xlu1 %880 }
 0x18d   : > { %4999 = vst [vmem:[#allocation38_spill] sm:$0xff] %v3236_v14  ;;  %v606_v13 = vsel %vm605_vm4, %v594_v34, %v600_v5  ;;  %v609_v33 = vsel %vm605_vm4, %v600_v5, %v594_v34  ;;  %v746_v34 = vsub.s32 5, %v3234_v3 }
 0x18e   : > { %v624_v12 = vmul.f32 %v3035_v25, %v609_v33  ;;  %v625_v28 = vmul.f32 %v3035_v25, %v606_v13  ;;  %v3312_v33 = vmul.f32 %v3031_v23, %v3072_v50  ;;  %v581_v13 = vmul.f32 %v3275_v0, %v567_v21 }
 0x18f   : > { %v582_v25 = vmul.f32 %v3283_v24, %v568_v56  ;;  %v3328_v52 = vrot.slane %v3243_v8, %v746_v34  ;;  %v3334_v51 = vrot.slane %v3248_v49, %v746_v34 }
 0x190   : > { %v657_v39 = vpop.permute.xlu0 %656  ;;  %v3250_v54 = vpop.permute.xlu1 %544  ;;  %v638_v15 = vmul.f32 %v3288_v20, %v624_v12 }
 0x191   : > { %v663_v22 = vsel %vm662_vm5, %v651_v36, %v657_v39  ;;  %v666_v30 = vsel %vm662_vm5, %v657_v39, %v651_v36  ;;  %v588_v14 = vadd.f32 %v582_v25, %v531_v17  ;;  %v550_v61 = vsel %vm548_vm3, %v3212_v37, %v3250_v54 }
 0x192   : > { %v681_v36 = vmul.f32 %v3039_v27, %v666_v30  ;;  %v682_v50 = vmul.f32 %v3039_v27, %v663_v22  ;;  %v803_v30 = vsub.s32 6, %v3234_v3  ;;  %v587_v27 = vadd.f32 %v581_v13, %v530_v18 }
 0x193   : > { %v553_v7 = vsel %vm548_vm3, %v3250_v54, %v3212_v37  ;;  %v860_v13 = vsub.s32 7, %v3234_v3  ;;  %v474_v37 = vmul.f32 %v3031_v23, %v3111_v57 }
 0x194   : > { %v714_v35 = vpop.permute.xlu0 %713  ;;  %v602_v26 = vpop.permute.xlu1 %601  ;;  %v695_v34 = vmul.f32 %v3308_v53, %v681_v36  ;;  %v696_v12 = vmul.f32 %v3323_v41, %v682_v50  ;;  %v644_v29 = vadd.f32 %v638_v15, %v587_v27  ;;  %v569_v54 = vmul.f32 %v3101_v55, %v553_v7 }
 0x195   : > { %v720_v39 = vsel %vm719_vm6, %v3214_v38, %v714_v35  ;;  %v723_v46 = vsel %vm719_vm6, %v714_v35, %v3214_v38  ;;  %v639_v38 = vmul.f32 %v3293_v2, %v625_v28  ;;  %v607_v28 = vsel %vm605_vm4, %v3216_v40, %v602_v26 }
 0x196   : > { %v738_v35 = vmul.f32 %v3146_v63, %v720_v39  ;;  %v739_v22 = vmul.f32 %v3146_v63, %v723_v46  ;;  %v610_v25 = vsel %vm605_vm4, %v602_v26, %v3216_v40  ;;  %v570_v39 = vmul.f32 %v3101_v55, %v550_v61 }
 0x197   : > { %v645_v31 = vadd.f32 %v639_v38, %v588_v14  ;;  %v626_v50 = vmul.f32 %v3113_v58, %v610_v25  ;;  %v627_v26 = vmul.f32 %v3113_v58, %v607_v28  ;;  %v3366_v27 = vrot.slane %v3243_v8, %v803_v30 }
 0x198   : > { %v771_v5 = vpop.permute.xlu0 %770  ;;  %v659_v59 = vpop.permute.xlu1 %658  ;;  %v752_v46 = vmul.f32 %v3328_v52, %v738_v35  ;;  %v753_v36 = vmul.f32 %v3334_v51, %v739_v22  ;;  %v3369_v15 = vrot.slane %v3248_v49, %v803_v30  ;;  %v701_v40 = vadd.f32 %v695_v34, %v644_v29 }
 0x199   : > { %v702_v57 = vadd.f32 %v696_v12, %v645_v31  ;;  %v777_v3 = vsel %vm776_vm7, %v3218_v42, %v771_v5  ;;  %v780_v14 = vsel %vm776_vm7, %v771_v5, %v3218_v42  ;;  %v664_v22 = vsel %vm662_vm5, %v3220_v43, %v659_v59 }
 0x19a   : > { %v667_v30 = vsel %vm662_vm5, %v659_v59, %v3220_v43  ;;  %v3384_v61 = vrot.slane %v3243_v8, %v860_v13  ;;  %v3387_v7 = vrot.slane %v3248_v49, %v860_v13  ;;  %v583_v34 = vmul.f32 %v3275_v0, %v569_v54 }
 0x19b   : > { %v584_v42 = vmul.f32 %v3283_v24, %v570_v39  ;;  %v758_v5 = vadd.f32 %v752_v46, %v701_v40  ;;  %v759_v12 = vadd.f32 %v753_v36, %v702_v57  ;;  %v640_v28 = vmul.f32 %v3288_v20, %v626_v50 }
 0x19c   : > { %v828_v21 = vpop.permute.xlu0 %827  ;;  %v716_v56 = vpop.permute.xlu1 %715  ;;  %v641_v25 = vmul.f32 %v3293_v2, %v627_v26  ;;  %v795_v29 = vmul.f32 %v3165_v6, %v777_v3  ;;  %v796_v59 = vmul.f32 %v3165_v6, %v780_v14  ;;  %v683_v8 = vmul.f32 %v3129_v60, %v667_v30 }
 0x19d   : > { %v684_v43 = vmul.f32 %v3129_v60, %v664_v22  ;;  %v834_v49 = vsel %vm833_vm8, %v3222_v44, %v828_v21  ;;  %v837_v31 = vsel %vm833_vm8, %v828_v21, %v3222_v44  ;;  %v721_v39 = vsel %vm719_vm6, %v3224_v45, %v716_v56 }
 0x19e   : > { %v724_v46 = vsel %vm719_vm6, %v716_v56, %v3224_v45  ;;  %v809_v45 = vmul.f32 %v3366_v27, %v795_v29  ;;  %v810_v56 = vmul.f32 %v3369_v15, %v796_v59  ;;  %v852_v57 = vmul.f32 %v3183_v11, %v834_v49 }
 0x19f   : > { %v853_v3 = vmul.f32 %v3183_v11, %v837_v31  ;;  %v740_v14 = vmul.f32 %v3155_v4, %v721_v39  ;;  %v697_v31 = vmul.f32 %v3308_v53, %v683_v8  ;;  %v3444_v39 = vld [vmem:[%s4827_s1 + $0x10] ss:$0 sm:$0xff] }
 0x1a0   : > { %v885_v17 = vpop.permute.xlu0 %884  ;;  %v773_v18 = vpop.permute.xlu1 %772 }
 0x1a1   : > { %v891_v44 = vsel %vm890_vm9, %v3226_v47, %v885_v17  ;;  %v894_v21 = vsel %vm890_vm9, %v885_v17, %v3226_v47  ;;  %v778_v59 = vsel %vm776_vm7, %v3228_v48, %v773_v18  ;;  %v781_v49 = vsel %vm776_vm7, %v773_v18, %v3228_v48 }
 0x1a2   : > { %v909_v30 = vmul.f32 %v3198_v16, %v891_v44  ;;  %v910_v29 = vmul.f32 %v3198_v16, %v894_v21  ;;  %v815_v44 = vadd.f32 %v809_v45, %v758_v5  ;;  %v816_v21 = vadd.f32 %v810_v56, %v759_v12  ;;  %v5002_v56 = vld [vmem:[#allocation38_spill] sm:$0xff] }
 0x1a3   : > { %v866_v48 = vmul.f32 %v3384_v61, %v852_v57  ;;  %v867_v18 = vmul.f32 %v3387_v7, %v853_v3  ;;  %v797_v8 = vmul.f32 %v3173_v9, %v778_v59 }
 0x1a4   : > { %v480_v38 = vpop.permute.xlu0 %479  ;;  %v830_v35 = vpop.permute.xlu1 %829 }
 0x1a5   : > { %v835_v5 = vsel %vm833_vm8, %v3230_v62, %v830_v35  ;;  %v838_v12 = vsel %vm833_vm8, %v830_v35, %v3230_v62  ;;  %v5003_v35 = vld [vmem:[#allocation32_spill] sm:$0xff] }
 0x1a8   : > { %v486_v13 = vpop.permute.xlu0 %485  ;;  %v887_v54 = vpop.permute.xlu1 %886 }
 0x1a9   : > { %v493_v36 = vsel %vm491_vm2, %v480_v38, %v486_v13  ;;  %v496_v50 = vsel %vm491_vm2, %v486_v13, %v480_v38  ;;  %v741_v38 = vmul.f32 %v3155_v4, %v724_v46  ;;  %v698_v13 = vmul.f32 %v3323_v41, %v684_v43  ;;  %v3449_v46 = vld [vmem:[%s4827_s1 + $0x18] ss:$0 sm:$0xff] }
 0x1aa   : > { %v512_v26 = vmul.f32 %v3208_v19, %v496_v50  ;;  %v513_v40 = vmul.f32 %v3208_v19, %v493_v36  ;;  %v798_v43 = vmul.f32 %v3173_v9, %v781_v49  ;;  %v754_v4 = vmul.f32 %v3328_v52, %v740_v14 }
 0x1ab   : > { %v755_v11 = vmul.f32 %v3334_v51, %v741_v38  ;;  %v892_v57 = vsel %vm890_vm9, %v5002_v56, %v887_v54  ;;  %v895_v3 = vsel %vm890_vm9, %v887_v54, %v5002_v56  ;;  %v873_v14 = vadd.f32 %v867_v18, %v816_v21 }
 0x1ac   : > { %v526_v22 = vmul.f32 %v3259_v10, %v512_v26  ;;  %v527_v47 = vmul.f32 %v3262_v32, %v513_v40  ;;  %v3429_v17 = vpop.permute.xlu1 %654  ;;  %v482_v45 = vpop.permute.xlu0 %481  ;;  %v872_v38 = vadd.f32 %v866_v48, %v815_v44 }
 0x1ae   : > { %v532_v36 = vadd.f32 %v526_v22, %v3312_v33  ;;  %v533_v50 = vadd.f32 %v527_v47, %v474_v37  ;;  %v923_v33 = vmul.f32 %v3444_v39, %v909_v30  ;;  %v924_v37 = vmul.f32 %v3449_v46, %v910_v29 }
 0x1af   : > { %v811_v22 = vmul.f32 %v3366_v27, %v797_v8  ;;  %v812_v47 = vmul.f32 %v3369_v15, %v798_v43 }
 0x1b0   : > { %v589_v26 = vadd.f32 %v583_v34, %v532_v36  ;;  %v590_v40 = vadd.f32 %v584_v42, %v533_v50  ;;  %v3456_v16 = vpop.permute.xlu1 %711  ;;  %v930_v59 = vadd.f32 %v924_v37, %v873_v14  ;;  %v929_v49 = vadd.f32 %v923_v33, %v872_v38  ;;  %v5004_v36 = vld [vmem:[#allocation34_spill] sm:$0xff]  ;;  %v541_v44 = vpop.permute.xlu0 %540  ;;  %v5005_v37 = vld [vmem:[#allocation35_spill] sm:$0xff] }
 0x1b1   : > { %v911_v50 = vmul.f32 %v5004_v36, %v892_v57 }
 0x1b2   : > { %v646_v34 = vadd.f32 %v640_v28, %v589_v26  ;;  %v647_v42 = vadd.f32 %v641_v25, %v590_v40  ;;  %v854_v28 = vmul.f32 %v5003_v35, %v835_v5  ;;  %v855_v25 = vmul.f32 %v5003_v35, %v838_v12 }
 0x1b3   : > { %v912_v26 = vmul.f32 %v5004_v36, %v895_v3  ;;  %v951_v33 = vadd.f32 %v5005_v37, %v930_v59  ;;  %v950_v5 = vadd.f32 %v5005_v37, %v929_v49  ;;  %v5009_v59 = vld [vmem:[#allocation30_spill] sm:$0xff] }
 0x1b4   : > { %v488_v30 = vpop.permute.xlu1 %487  ;;  %v704_v29 = vadd.f32 %v698_v13, %v647_v42  ;;  %v703_v62 = vadd.f32 %v697_v31, %v646_v34  ;;  %v868_v43 = vmul.f32 %v3384_v61, %v854_v28  ;;  %v869_v31 = vmul.f32 %v3387_v7, %v855_v25  ;;  %v598_v38 = vpop.permute.xlu0 %597  ;;  %v5007_v25 = vld [vmem:[#allocation28_spill] sm:$0xff] }
 0x1b5   : > { %v925_v13 = vmul.f32 %v3444_v39, %v911_v50  ;;  %v926_v40 = vmul.f32 %v3449_v46, %v912_v26  ;;  %v956_v28 = vmax.f32 %v950_v5, 0.0  ;;  %v5010_v50 = vld [vmem:[#allocation37_spill] sm:$0xff] }
 0x1b6   : > { %v761_v54 = vadd.f32 %v755_v11, %v704_v29  ;;  %v760_v21 = vadd.f32 %v754_v4, %v703_v62  ;;  %v494_v11 = vsel %vm491_vm2, %v482_v45, %v488_v30  ;;  %v497_v4 = vsel %vm491_vm2, %v488_v30, %v482_v45  ;;  %v5008_v45 = vld [vmem:[#allocation27_spill] sm:$0xff] }
 0x1b7   : > { %v957_v62 = vmax.f32 %v951_v33, 0.0  ;;  %v475_v30 = vmul.f32 %v5008_v45, %v5007_v25  ;;  %v476_v49 = vmul.f32 %v5008_v45, %v5009_v59 }
 0x1b8   : > { %v547_v48 = vpop.permute.xlu1 %546  ;;  %v818_v18 = vadd.f32 %v812_v47, %v761_v54  ;;  %v817_v8 = vadd.f32 %v811_v22, %v760_v21  ;;  %v5006_v22 = vld [vmem:[#allocation26_spill] sm:$0xff] }
 0x1b9   : > { %v551_v56 = vsel %vm548_vm3, %v541_v44, %v547_v48  ;;  %v554_v57 = vsel %vm548_vm3, %v547_v48, %v541_v44  ;;  %v514_v47 = vmul.f32 %v5006_v22, %v497_v4  ;;  %v515_v29 = vmul.f32 %v5006_v22, %v494_v11  ;;  %v5011_v21 = vld [vmem:[#allocation10_spill] sm:$0xff] }
 0x1ba   : > { %v875_v12 = vadd.f32 %v869_v31, %v818_v18  ;;  %v874_v34 = vadd.f32 %v868_v43, %v817_v8  ;;  %v571_v44 = vmul.f32 %v5011_v21, %v554_v57  ;;  %v572_v48 = vmul.f32 %v5011_v21, %v551_v56 }
 0x1bb   : > { %v528_v5 = vmul.f32 %v3259_v10, %v514_v47  ;;  %v529_v11 = vmul.f32 %v3262_v32, %v515_v29  ;;  %v963_v4 = vmin.f32 %v957_v62, 6.0 }
 0x1bc   : > { %v604_v42 = vpop.permute.xlu1 %603  ;;  %v932_v3 = vadd.f32 %v926_v40, %v875_v12  ;;  %v931_v14 = vadd.f32 %v925_v13, %v874_v34  ;;  %v962_v12 = vmin.f32 %v956_v28, 6.0  ;;  %v5012_v34 = vld [vmem:[#allocation12_spill] sm:$0xff]  ;;  %v586_v25 = vmul.f32 %v3283_v24, %v572_v48 }
 0x1bd   : > { %v608_v18 = vsel %vm605_vm4, %v598_v38, %v604_v42  ;;  %v611_v8 = vsel %vm605_vm4, %v604_v42, %v598_v38  ;;  %v585_v38 = vmul.f32 %v3275_v0, %v571_v44 }
 0x1be   : > { %v953_v26 = vadd.f32 %v5010_v50, %v932_v3  ;;  %v952_v54 = vadd.f32 %v5010_v50, %v931_v14  ;;  %v628_v56 = vmul.f32 %v5012_v34, %v611_v8  ;;  %v629_v42 = vmul.f32 %v5012_v34, %v608_v18  ;;  %v769_v14 = vpop.permute.xlu0 %768 }
 0x1bf   : > { %v534_v18 = vadd.f32 %v528_v5, %v475_v30  ;;  %v535_v8 = vadd.f32 %v529_v11, %v476_v49  ;;  %v5015_v11 = vld [vmem:[#allocation16_spill] sm:$0xff] }
 0x1c0   : > { %v661_v43 = vpop.permute.xlu1 %660  ;;  %v959_v40 = vmax.f32 %v953_v26, 0.0  ;;  %v958_v33 = vmax.f32 %v952_v54, 0.0  ;;  %v642_v44 = vmul.f32 %v3288_v20, %v628_v56  ;;  %v643_v48 = vmul.f32 %v3293_v2, %v629_v42 }
 0x1c1   : > { %v665_v31 = vsel %vm662_vm5, %v3429_v17, %v661_v43  ;;  %v668_v13 = vsel %vm662_vm5, %v661_v43, %v3429_v17  ;;  %v5013_v17 = vld [vmem:[#allocation14_spill] sm:$0xff]  ;;  %v591_v43 = vadd.f32 %v585_v38, %v534_v18 }
 0x1c2   : > { %v965_v57 = vmin.f32 %v959_v40, 6.0  ;;  %v964_v3 = vmin.f32 %v958_v33, 6.0  ;;  %v685_v59 = vmul.f32 %v5013_v17, %v668_v13  ;;  %v686_v26 = vmul.f32 %v5013_v17, %v665_v31  ;;  %v5014_v13 = vld [vmem:[#allocation15_spill] sm:$0xff]  ;;  %v826_v5 = vpop.permute.xlu0 %825 }
 0x1c3   : > { %v592_v31 = vadd.f32 %v586_v25, %v535_v8  ;;  %v648_v56 = vadd.f32 %v642_v44, %v591_v43 }
 0x1c4   : > { %v718_v47 = vpop.permute.xlu1 %717  ;;  %v2667_v28 = vpack.c.bf16 %v965_v57, %v963_v4  ;;  %v2669_v54 = vpack.c.bf16 %v964_v3, %v962_v12  ;;  %v699_v45 = vmul.f32 %v3308_v53, %v685_v59 }
 0x1c5   : > { %v722_v29 = vsel %vm719_vm6, %v3456_v16, %v718_v47  ;;  %v725_v62 = vsel %vm719_vm6, %v718_v47, %v3456_v16  ;;  %v700_v16 = vmul.f32 %v3323_v41, %v686_v26  ;;  %v649_v42 = vadd.f32 %v643_v48, %v592_v31 }
 0x1c6   : > { %2668 = vmatprep.subr.bf16.mxu1 %v2667_v28  ;;  %v742_v40 = vmul.f32 %v5014_v13, %v722_v29  ;;  %v743_v33 = vmul.f32 %v5014_v13, %v725_v62  ;;  %v705_v25 = vadd.f32 %v699_v45, %v648_v56  ;;  %v5016_v29 = vld [vmem:[#allocation17_spill] sm:$0xff]  ;;  %v5033_v13 = vld [vmem:[#allocation24_spill] sm:$0xff] }
 0x1c7   : > { %2670 = vmatpush1.bf16.msra.mxu1 %v2669_v54  ;;  %v706_v59 = vadd.f32 %v700_v16, %v649_v42  ;;  %v883_v54 = vpop.permute.xlu0 %882  ;;  %v5017_v16 = vld [vmem:[#allocation18_spill] sm:$0xff] }
 0x1c8   : > { %v775_v17 = vpop.permute.xlu1 %774  ;;  %v756_v57 = vmul.f32 %v3328_v52, %v742_v40  ;;  %v757_v3 = vmul.f32 %v3334_v51, %v743_v33 }
 0x1c9   : > { %v779_v30 = vsel %vm776_vm7, %v769_v14, %v775_v17  ;;  %v782_v49 = vsel %vm776_vm7, %v775_v17, %v769_v14 }
 0x1ca   : > { %v799_v4 = vmul.f32 %v5015_v11, %v779_v30  ;;  %v800_v12 = vmul.f32 %v5015_v11, %v782_v49  ;;  %v762_v18 = vadd.f32 %v756_v57, %v705_v25  ;;  %v763_v8 = vadd.f32 %v757_v3, %v706_v59  ;;  %v2634_v59 = vld [vmem:[%s2973_s10 + $0x8] sm:$0xff] }
 0x1cc   : > { %v832_v38 = vpop.permute.xlu1 %831  ;;  %v813_v17 = vmul.f32 %v3366_v27, %v799_v4  ;;  %v814_v47 = vmul.f32 %v3369_v15, %v800_v12 }
 0x1cd   : > { %v836_v26 = vsel %vm833_vm8, %v826_v5, %v832_v38  ;;  %v839_v14 = vsel %vm833_vm8, %v832_v38, %v826_v5 }
 0x1ce   : > { %v856_v62 = vmul.f32 %v5016_v29, %v836_v26  ;;  %v857_v28 = vmul.f32 %v5016_v29, %v839_v14  ;;  %v819_v40 = vadd.f32 %v813_v17, %v762_v18  ;;  %v820_v33 = vadd.f32 %v814_v47, %v763_v8  ;;  %v5022_v18 = vld [vmem:[#allocation6_spill] sm:$0xff]  ;;  %v5023_v8 = vld [vmem:[#allocation7_spill] sm:$0xff] }
 0x1d0   : > { %v870_v45 = vmul.f32 %v3384_v61, %v856_v62  ;;  %v871_v44 = vmul.f32 %v3387_v7, %v857_v28  ;;  %v889_v48 = vpop.permute.xlu1 %888  ;;  %v3565_v62 = vcombine.high %v2634_v59, %v2634_v59  ;;  %v3570_v28 = vld [vmem:[%s4832_s6] sm:$0xf] }
 0x1d1   : > { %v893_v43 = vsel %vm890_vm9, %v883_v54, %v889_v48  ;;  %v896_v31 = vsel %vm890_vm9, %v889_v48, %v883_v54  ;;  %v3560_v3 = vpop.permute.xlu0 %947  ;;  %5020 = vst [vmem:[#allocation28_spill] sm:$0xff] %v3570_v28  ;;  %v5021_v54 = vmov 0.0  }
 0x1d2   : > { %v913_v30 = vmul.f32 %v5017_v16, %v893_v43  ;;  %v914_v49 = vmul.f32 %v5017_v16, %v896_v31  ;;  %v876_v5 = vadd.f32 %v870_v45, %v819_v40  ;;  %v877_v4 = vadd.f32 %v871_v44, %v820_v33  ;;  %5018 = vst [vmem:[#allocation38_spill] sm:$0xff] %v3560_v3  ;;  %v5024_v45 = vld [vmem:[#allocation8_spill] sm:$0xff]  ;;  %v5027_v31 = vld [vmem:[#allocation19_spill] sm:$0xff] }
 0x1d3   : > { %5019 = vst [vmem:[#allocation32_spill] sm:$0xff] %v3565_v62 }
 0x1d4   : > { %v927_v12 = vmul.f32 %v3444_v39, %v913_v30  ;;  %v928_v56 = vmul.f32 %v3449_v46, %v914_v49 }
 0x1d6   : > { %v934_v42 = vadd.f32 %v928_v56, %v877_v4  ;;  %v933_v57 = vadd.f32 %v927_v12, %v876_v5  ;;  %v5028_v4 = vld [vmem:[#allocation20_spill] sm:$0xff] }
 0x1d8   : > { %v955_v38 = vadd.f32 %v3560_v3, %v934_v42  ;;  %v954_v25 = vadd.f32 %v3560_v3, %v933_v57 }
 0x1da   : > { %v961_v26 = vmax.f32 %v955_v38, 0.0  ;;  %v960_v14 = vmax.f32 %v954_v25, 0.0 }
 0x1dc   : > { %v967_v17 = vmin.f32 %v961_v26, 6.0  ;;  %v966_v47 = vmin.f32 %v960_v14, 6.0 }
 0x1de   : > { %981 = vmatprep.subr.mxu1 %v967_v17 }
 0x1df   : > { %982 = vmatpush1.msra.mxu1 %v966_v47 }
 0x1e0   : > { %2633 = vmatmul.mubr.msk.f32.vlgmr.msra.gmra.mrb[0].mxu1 %vm973_vm10, %v3570_v28  ;;  %2635 = vmatprep.subr.msk.mxu1 %vm356_vm0, %v3565_v62 }
 0x1e1   : > { %2636 = vmatpush1.msk.msra.mxu1 %vm356_vm0, %v2634_v59  ;;  %1128 = vmatprep.mubr.f32.mxu1 %v5021_v54 }
 0x1e4   : > { %2637 = vmatmul.mubr.msk.f32.vlgmr.msra.gmra.mrb[2].mxu1 %vm346_vm1, %v5022_v18 }
 0x1e5   : > { %1134 = vmatprep.mubr.f32.mxu1 %v5021_v54 }
 0x1e8   : > { %2638 = vmatmul.mubr.msk.f32.gmra.mrb[4].mxu1 %vm346_vm1, %v5023_v8  ;;  %v5029_v8 = vld [vmem:[#allocation21_spill] sm:$0xff] }
 0x1e9   : > { %1140 = vmatprep.mubr.f32.mxu1 %v5021_v54 }
 0x1ec   : > { %2639 = vmatmul.mubr.msk.f32.gmra.mrb[6].mxu1 %vm346_vm1, %v5024_v45 }
 0x1ed   : > { %2030 = vmatprep.mubr.f32.mxu1 %v5021_v54 }
 0x2b3   : > { %v3587_v44 = vpop.f32.mrb[0].mxu1 }
 0x2b4   : > { %5025 = vst [vmem:[#allocation30_spill] sm:$0xff] %v3587_v44  ;;  %v3589_v48 = vpop.f32.mrb[1].mxu1 }
 0x2b5   : > { %5026 = vst [vmem:[#allocation6_spill] sm:$0xff] %v3589_v48 }
 0x2b7   : > { %v1130_v43 = vpop.f32.mrb[2].mxu1 }
 0x2b8   : > { %v1131_v40 = vadd.f32 %v1130_v43, %v5027_v31  ;;  %v1132_v33 = vpop.f32.mrb[3].mxu1 }
 0x2b9   : > { %v1133_v59 = vadd.f32 %v1132_v33, %v5027_v31  ;;  %v5032_v31 = vld [vmem:[#allocation22_spill] sm:$0xff] }
 0x2ba   : > { %v1147_v30 = vmax.f32 %v1131_v40, 0.0 }
 0x2bb   : > { %v1136_v49 = vpop.f32.mrb[4].mxu1  ;;  %v1148_v26 = vmax.f32 %v1133_v59, 0.0 }
 0x2bc   : > { %v3592_v5 = vmin.f32 %v1147_v30, 6.0  ;;  %v1137_v12 = vadd.f32 %v1136_v49, %v5028_v4  ;;  %v1138_v56 = vpop.f32.mrb[5].mxu1 }
 0x2bd   : > { %v3626_v14 = vmin.f32 %v1148_v26, 6.0  ;;  %v1139_v17 = vadd.f32 %v1138_v56, %v5028_v4 }
 0x2be   : > { %v1149_v42 = vmax.f32 %v1137_v12, 0.0  ;;  %1201 = vrot.lane.b32.xlu0 %v3592_v5, %s2850_s19  ;;  %1165 = vrot.lane.b32.xlu1 %v3592_v5, %s2851_s20 }
 0x2bf   : > { %v1142_v57 = vpop.f32.mrb[6].mxu1  ;;  %v1150_v47 = vmax.f32 %v1139_v17, 0.0 }
 0x2c0   : > { %v3599_v38 = vmin.f32 %v1149_v42, 6.0  ;;  %v1144_v25 = vpop.f32.mrb[7].mxu1  ;;  %v1143_v45 = vadd.f32 %v1142_v57, %v5029_v8 }
 0x2c1   : > { %v3637_v18 = vmin.f32 %v1150_v47, 6.0  ;;  %v1145_v33 = vadd.f32 %v1144_v25, %v5029_v8 }
 0x2c2   : > { %1237 = vrot.lane.b32.xlu0 %v3592_v5, %s2852_s21  ;;  %1167 = vrot.lane.b32.xlu1 %v3599_v38, %s2851_s20  ;;  %v1151_v43 = vmax.f32 %v1143_v45, 0.0 }
 0x2c3   : > { %v1152_v30 = vmax.f32 %v1145_v33, 0.0 }
 0x2c4   : > { %v3664_v40 = vmin.f32 %v1151_v43, 6.0 }
 0x2c5   : > { %v3675_v49 = vmin.f32 %v1152_v30, 6.0 }
 0x2c6   : > { %1273 = vrot.lane.b32.xlu0 %v3592_v5, %s2853_s22  ;;  %1203 = vrot.lane.b32.xlu1 %v3599_v38, %s2850_s19  ;;  %5030 = vst [vmem:[#allocation7_spill] sm:$0xff] %v3664_v40 }
 0x2c7   : > { %5031 = vst [vmem:[#allocation8_spill] sm:$0xff] %v3675_v49 }
 0x2ca   : > { %1309 = vrot.lane.b32.xlu0 %v3592_v5, %s2854_s23  ;;  %1239 = vrot.lane.b32.xlu1 %v3599_v38, %s2852_s21 }
 0x2ce   : > { %1345 = vrot.lane.b32.xlu0 %v3592_v5, %s2855_s24  ;;  %1275 = vrot.lane.b32.xlu1 %v3599_v38, %s2853_s22 }
 0x2d2   : > { %1381 = vrot.lane.b32.xlu0 %v3592_v5, %s4908_s25  ;;  %1311 = vrot.lane.b32.xlu1 %v3599_v38, %s2854_s23 }
 0x2d6   : > { %1417 = vrot.lane.b32.xlu0 %v3592_v5, %s4906_s26  ;;  %1347 = vrot.lane.b32.xlu1 %v3599_v38, %s2855_s24 }
 0x2da   : > { %1171 = vrot.lane.b32.xlu0 %v3626_v14, %s2851_s20  ;;  %1383 = vrot.lane.b32.xlu1 %v3599_v38, %s4908_s25 }
 0x2de   : > { %1207 = vrot.lane.b32.xlu0 %v3626_v14, %s2850_s19  ;;  %1419 = vrot.lane.b32.xlu1 %v3599_v38, %s4906_s26 }
 0x2e2   : > { %1243 = vrot.lane.b32.xlu0 %v3626_v14, %s2852_s21  ;;  %1173 = vrot.lane.b32.xlu1 %v3637_v18, %s2851_s20 }
 0x2e6   : > { %1279 = vrot.lane.b32.xlu0 %v3626_v14, %s2853_s22  ;;  %1209 = vrot.lane.b32.xlu1 %v3637_v18, %s2850_s19 }
 0x2ea   : > { %1315 = vrot.lane.b32.xlu0 %v3626_v14, %s2854_s23  ;;  %1245 = vrot.lane.b32.xlu1 %v3637_v18, %s2852_s21 }
 0x2ee   : > { %1351 = vrot.lane.b32.xlu0 %v3626_v14, %s2855_s24  ;;  %1281 = vrot.lane.b32.xlu1 %v3637_v18, %s2853_s22 }
 0x2f2   : > { %1387 = vrot.lane.b32.xlu0 %v3626_v14, %s4908_s25  ;;  %1317 = vrot.lane.b32.xlu1 %v3637_v18, %s2854_s23 }
 0x2f6   : > { %1423 = vrot.lane.b32.xlu0 %v3626_v14, %s4906_s26  ;;  %1353 = vrot.lane.b32.xlu1 %v3637_v18, %s2855_s24 }
 0x2fa   : > { %1169 = vrot.lane.b32.xlu0 %v3664_v40, %s2851_s20  ;;  %1389 = vrot.lane.b32.xlu1 %v3637_v18, %s4908_s25 }
 0x2fe   : > { %1205 = vrot.lane.b32.xlu0 %v3664_v40, %s2850_s19  ;;  %1425 = vrot.lane.b32.xlu1 %v3637_v18, %s4906_s26 }
 0x302   : > { %1241 = vrot.lane.b32.xlu0 %v3664_v40, %s2852_s21  ;;  %1175 = vrot.lane.b32.xlu1 %v3675_v49, %s2851_s20 }
 0x306   : > { %1277 = vrot.lane.b32.xlu0 %v3664_v40, %s2853_s22  ;;  %1211 = vrot.lane.b32.xlu1 %v3675_v49, %s2850_s19 }
 0x30a   : > { %1313 = vrot.lane.b32.xlu0 %v3664_v40, %s2854_s23  ;;  %1247 = vrot.lane.b32.xlu1 %v3675_v49, %s2852_s21 }
 0x30e   : > { %1349 = vrot.lane.b32.xlu0 %v3664_v40, %s2855_s24  ;;  %1283 = vrot.lane.b32.xlu1 %v3675_v49, %s2853_s22 }
 0x312   : > { %1385 = vrot.lane.b32.xlu0 %v3664_v40, %s4908_s25  ;;  %1319 = vrot.lane.b32.xlu1 %v3675_v49, %s2854_s23 }
 0x316   : > { %1421 = vrot.lane.b32.xlu0 %v3664_v40, %s4906_s26  ;;  %1355 = vrot.lane.b32.xlu1 %v3675_v49, %s2855_s24 }
 0x31a   : > { %1391 = vrot.lane.b32.xlu1 %v3675_v49, %s4908_s25  ;;  %s5064_s25 = smov 112  }
 0x31e   : > { %1427 = vrot.lane.b32.xlu1 %v3675_v49, %s4906_s26  ;;  %s5065_s26 = smov 111  }
 0x330   : > { %v1202_v12 = vpop.permute.xlu0 %1201  ;;  %v1166_v56 = vpop.permute.xlu1 %1165 }
 0x334   : > { %v1238_v42 = vpop.permute.xlu0 %1237  ;;  %v1168_v57 = vpop.permute.xlu1 %1167 }
 0x338   : > { %v1274_v25 = vpop.permute.xlu0 %1273  ;;  %v1204_v59 = vpop.permute.xlu1 %1203 }
 0x33c   : > { %v3705_v26 = vpop.permute.xlu0 %1309  ;;  %v3707_v17 = vpop.permute.xlu1 %1239 }
 0x340   : > { %v3709_v47 = vpop.permute.xlu0 %1345  ;;  %v3711_v45 = vpop.permute.xlu1 %1275 }
 0x344   : > { %v3713_v43 = vpop.permute.xlu0 %1381  ;;  %v3715_v33 = vpop.permute.xlu1 %1311 }
 0x348   : > { %v3717_v30 = vpop.permute.xlu0 %1417  ;;  %v3719_v62 = vpop.permute.xlu1 %1347 }
 0x34c   : > { %v1172_v48 = vpop.permute.xlu0 %1171  ;;  %v3721_v44 = vpop.permute.xlu1 %1383 }
 0x34d   : > { %v1177_v8 = vsel %vm491_vm2, %v1166_v56, %v1172_v48  ;;  %v1180_v4 = vsel %vm491_vm2, %v1172_v48, %v1166_v56 }
 0x34e   : > { %v1183_v54 = vmul.f32 %v1180_v4, %v5032_v31  ;;  %v1184_v28 = vmul.f32 %v1177_v8, %v5032_v31  ;;  %v5034_v4 = vld [vmem:[#allocation23_spill] sm:$0xff] }
 0x34f   : > { %v1160_v8 = vmul.f32 %v3626_v14, %v5034_v4  ;;  %v1159_v56 = vmul.f32 %v3592_v5, %v5034_v4  ;;  %v5035_v14 = vld [vmem:[#allocation11_spill] sm:$0xff] }
 0x350   : > { %v1208_v3 = vpop.permute.xlu0 %1207  ;;  %v3729_v16 = vpop.permute.xlu1 %1419  ;;  %v1189_v34 = vmul.f32 %v1183_v54, %v3259_v10  ;;  %v1190_v48 = vmul.f32 %v1184_v28, %v3262_v32 }
 0x351   : > { %v1213_v29 = vsel %vm548_vm3, %v1202_v12, %v1208_v3  ;;  %v1216_v11 = vsel %vm548_vm3, %v1208_v3, %v1202_v12 }
 0x352   : > { %v1219_v49 = vmul.f32 %v1216_v11, %v5033_v13  ;;  %v1220_v40 = vmul.f32 %v1213_v29, %v5033_v13  ;;  %v1195_v12 = vadd.f32 %v1189_v34, %v1159_v56 }
 0x354   : > { %v1225_v31 = vmul.f32 %v1219_v49, %v3275_v0  ;;  %v1226_v21 = vmul.f32 %v1220_v40, %v3283_v24  ;;  %v1244_v22 = vpop.permute.xlu0 %1243  ;;  %v1174_v3 = vpop.permute.xlu1 %1173  ;;  %v1196_v40 = vadd.f32 %v1190_v48, %v1160_v8 }
 0x355   : > { %v1249_v11 = vsel %vm605_vm4, %v1238_v42, %v1244_v22  ;;  %v1252_v29 = vsel %vm605_vm4, %v1244_v22, %v1238_v42  ;;  %v1178_v28 = vsel %vm491_vm2, %v1168_v57, %v1174_v3  ;;  %v1181_v54 = vsel %vm491_vm2, %v1174_v3, %v1168_v57 }
 0x356   : > { %v1255_v5 = vmul.f32 %v1252_v29, %v5035_v14  ;;  %v1256_v49 = vmul.f32 %v1249_v11, %v5035_v14  ;;  %v1185_v13 = vmul.f32 %v1181_v54, %v3208_v19  ;;  %v1186_v4 = vmul.f32 %v1178_v28, %v3208_v19  ;;  %v5036_v28 = vld [vmem:[#allocation13_spill] sm:$0xff] }
 0x357   : > { %v1161_v42 = vmul.f32 %v3599_v38, %v3031_v23  ;;  %v1162_v57 = vmul.f32 %v3637_v18, %v3031_v23  ;;  %v1231_v37 = vadd.f32 %v1225_v31, %v1195_v12  ;;  %v1232_v11 = vadd.f32 %v1226_v21, %v1196_v40 }
 0x358   : > { %v1261_v50 = vmul.f32 %v1255_v5, %v3288_v20  ;;  %v1262_v22 = vmul.f32 %v1256_v49, %v3293_v2  ;;  %v1280_v3 = vpop.permute.xlu0 %1279  ;;  %v1210_v29 = vpop.permute.xlu1 %1209  ;;  %v1191_v8 = vmul.f32 %v1185_v13, %v3259_v10  ;;  %v1192_v56 = vmul.f32 %v1186_v4, %v3262_v32 }
 0x359   : > { %v1285_v34 = vsel %vm662_vm5, %v1274_v25, %v1280_v3  ;;  %v1288_v48 = vsel %vm662_vm5, %v1280_v3, %v1274_v25  ;;  %v1214_v31 = vsel %vm548_vm3, %v1204_v59, %v1210_v29  ;;  %v1217_v21 = vsel %vm548_vm3, %v1210_v29, %v1204_v59 }
 0x35a   : > { %v1291_v54 = vmul.f32 %v1288_v48, %v5036_v28  ;;  %v1292_v38 = vmul.f32 %v1285_v34, %v5036_v28  ;;  %v1267_v5 = vadd.f32 %v1261_v50, %v1231_v37  ;;  %v1268_v18 = vadd.f32 %v1262_v22, %v1232_v11 }
 0x35b   : > { %v1221_v13 = vmul.f32 %v1217_v21, %v3101_v55  ;;  %v1222_v4 = vmul.f32 %v1214_v31, %v3101_v55  ;;  %v1197_v3 = vadd.f32 %v1191_v8, %v1161_v42  ;;  %v1198_v29 = vadd.f32 %v1192_v56, %v1162_v57 }
 0x35c   : > { %v1297_v49 = vmul.f32 %v1291_v54, %v3308_v53  ;;  %v1298_v25 = vmul.f32 %v1292_v38, %v3323_v41  ;;  %v1316_v12 = vpop.permute.xlu0 %1315  ;;  %v1246_v40 = vpop.permute.xlu1 %1245 }
 0x35d   : > { %v1321_v37 = vsel %vm719_vm6, %v3705_v26, %v1316_v12  ;;  %v1324_v50 = vsel %vm719_vm6, %v1316_v12, %v3705_v26  ;;  %v1250_v59 = vsel %vm605_vm4, %v3707_v17, %v1246_v40  ;;  %v1253_v22 = vsel %vm605_vm4, %v1246_v40, %v3707_v17 }
 0x35e   : > { %v1227_v11 = vmul.f32 %v1221_v13, %v3275_v0  ;;  %v1228_v34 = vmul.f32 %v1222_v4, %v3283_v24  ;;  %v1327_v48 = vmul.f32 %v1321_v37, %v3146_v63  ;;  %v1328_v54 = vmul.f32 %v1324_v50, %v3146_v63 }
 0x35f   : > { %v1257_v26 = vmul.f32 %v1253_v22, %v3113_v58  ;;  %v1258_v38 = vmul.f32 %v1250_v59, %v3113_v58  ;;  %v1303_v31 = vadd.f32 %v1297_v49, %v1267_v5  ;;  %v1304_v21 = vadd.f32 %v1298_v25, %v1268_v18 }
 0x360   : > { %v1352_v12 = vpop.permute.xlu0 %1351  ;;  %v1282_v28 = vpop.permute.xlu1 %1281  ;;  %v1233_v14 = vadd.f32 %v1227_v11, %v1197_v3  ;;  %v1234_v17 = vadd.f32 %v1228_v34, %v1198_v29  ;;  %v1333_v42 = vmul.f32 %v1327_v48, %v3328_v52  ;;  %v1334_v57 = vmul.f32 %v1328_v54, %v3334_v51 }
 0x361   : > { %v1357_v8 = vsel %vm776_vm7, %v3709_v47, %v1352_v12  ;;  %v1360_v56 = vsel %vm776_vm7, %v1352_v12, %v3709_v47  ;;  %v1286_v5 = vsel %vm662_vm5, %v3711_v45, %v1282_v28  ;;  %v1289_v18 = vsel %vm662_vm5, %v1282_v28, %v3711_v45 }
 0x362   : > { %v1339_v49 = vadd.f32 %v1333_v42, %v1303_v31  ;;  %v1340_v25 = vadd.f32 %v1334_v57, %v1304_v21  ;;  %v1263_v13 = vmul.f32 %v1257_v26, %v3288_v20  ;;  %v1264_v4 = vmul.f32 %v1258_v38, %v3293_v2  ;;  %v5037_v26 = vld [vmem:[#allocation31_spill] sm:$0xff]  ;;  %v5038_v31 = vld [vmem:[#allocation29_spill] sm:$0xff] }
 0x363   : > { %v1363_v40 = vmul.f32 %v1357_v8, %v3165_v6  ;;  %v1364_v37 = vmul.f32 %v1360_v56, %v3165_v6  ;;  %v1293_v47 = vmul.f32 %v1289_v18, %v3129_v60  ;;  %v1294_v50 = vmul.f32 %v1286_v5, %v3129_v60 }
 0x364   : > { %v1388_v59 = vpop.permute.xlu0 %1387  ;;  %v1318_v22 = vpop.permute.xlu1 %1317  ;;  %v1269_v42 = vadd.f32 %v1263_v13, %v1233_v14  ;;  %v1270_v57 = vadd.f32 %v1264_v4, %v1234_v17 }
 0x365   : > { %v1393_v45 = vsel %vm833_vm8, %v3713_v43, %v1388_v59  ;;  %v1396_v28 = vsel %vm833_vm8, %v1388_v59, %v3713_v43  ;;  %v1322_v3 = vsel %vm719_vm6, %v3715_v33, %v1318_v22  ;;  %v1325_v29 = vsel %vm719_vm6, %v1318_v22, %v3715_v33 }
 0x366   : > { %v1369_v11 = vmul.f32 %v1363_v40, %v3366_v27  ;;  %v1370_v34 = vmul.f32 %v1364_v37, %v3369_v15  ;;  %v1299_v48 = vmul.f32 %v1293_v47, %v3308_v53  ;;  %v1300_v54 = vmul.f32 %v1294_v50, %v3323_v41  ;;  %v5039_v50 = vld [vmem:[#allocation33_spill] sm:$0xff] }
 0x367   : > { %v1399_v38 = vmul.f32 %v1393_v45, %v5037_v26  ;;  %v1400_v43 = vmul.f32 %v1396_v28, %v5037_v26  ;;  %v1329_v21 = vmul.f32 %v1322_v3, %v5038_v31  ;;  %v1330_v12 = vmul.f32 %v1325_v29, %v5038_v31 }
 0x368   : > { %v1424_v8 = vpop.permute.xlu0 %1423  ;;  %v1354_v33 = vpop.permute.xlu1 %1353  ;;  %v1375_v56 = vadd.f32 %v1369_v11, %v1339_v49  ;;  %v1376_v5 = vadd.f32 %v1370_v34, %v1340_v25  ;;  %v1305_v49 = vadd.f32 %v1299_v48, %v1269_v42  ;;  %v1306_v25 = vadd.f32 %v1300_v54, %v1270_v57 }
 0x369   : > { %v1405_v18 = vmul.f32 %v1399_v38, %v3384_v61  ;;  %v1406_v40 = vmul.f32 %v1400_v43, %v3387_v7  ;;  %v1429_v37 = vsel %vm890_vm9, %v3717_v30, %v1424_v8  ;;  %v1432_v47 = vsel %vm890_vm9, %v1424_v8, %v3717_v30 }
 0x36a   : > { %v1358_v14 = vsel %vm776_vm7, %v3719_v62, %v1354_v33  ;;  %v1361_v17 = vsel %vm776_vm7, %v1354_v33, %v3719_v62  ;;  %v1335_v13 = vmul.f32 %v1329_v21, %v3328_v52  ;;  %v1336_v4 = vmul.f32 %v1330_v12, %v3334_v51 }
 0x36b   : > { %v1435_v59 = vmul.f32 %v1429_v37, %v5039_v50  ;;  %v1436_v22 = vmul.f32 %v1432_v47, %v5039_v50  ;;  %v1365_v30 = vmul.f32 %v1358_v14, %v3173_v9  ;;  %v1366_v45 = vmul.f32 %v1361_v17, %v3173_v9 }
 0x36c   : > { %v1170_v28 = vpop.permute.xlu0 %1169  ;;  %v1390_v3 = vpop.permute.xlu1 %1389  ;;  %v1411_v29 = vadd.f32 %v1405_v18, %v1375_v56  ;;  %v1412_v11 = vadd.f32 %v1406_v40, %v1376_v5  ;;  %v1341_v42 = vadd.f32 %v1335_v13, %v1305_v49  ;;  %v1342_v57 = vadd.f32 %v1336_v4, %v1306_v25  ;;  %v5040_v25 = vld [vmem:[#allocation35_spill] sm:$0xff] }
 0x36d   : > { %v1394_v62 = vsel %vm833_vm8, %v3721_v44, %v1390_v3  ;;  %v1397_v34 = vsel %vm833_vm8, %v1390_v3, %v3721_v44  ;;  %v1441_v48 = vmul.f32 %v3444_v39, %v1435_v59  ;;  %v1442_v54 = vmul.f32 %v3449_v46, %v1436_v22 }
 0x36e   : > { %v1371_v38 = vmul.f32 %v1365_v30, %v3366_v27  ;;  %v1372_v43 = vmul.f32 %v1366_v45, %v3369_v15  ;;  %v1401_v21 = vmul.f32 %v1394_v62, %v5003_v35  ;;  %v1402_v12 = vmul.f32 %v1397_v34, %v5003_v35 }
 0x36f   : > { %v1447_v8 = vadd.f32 %v1441_v48, %v1411_v29  ;;  %v1448_v33 = vadd.f32 %v1442_v54, %v1412_v11  ;;  %v5041_v48 = vld [vmem:[#allocation37_spill] sm:$0xff] }
 0x370   : > { %v1206_v56 = vpop.permute.xlu0 %1205  ;;  %v1426_v5 = vpop.permute.xlu1 %1425  ;;  %v1407_v44 = vmul.f32 %v1401_v21, %v3384_v61  ;;  %v1408_v18 = vmul.f32 %v1402_v12, %v3387_v7  ;;  %v1377_v47 = vadd.f32 %v1371_v38, %v1341_v42  ;;  %v1378_v14 = vadd.f32 %v1372_v43, %v1342_v57 }
 0x371   : > { %v1430_v40 = vsel %vm890_vm9, %v3729_v16, %v1426_v5  ;;  %v1433_v37 = vsel %vm890_vm9, %v1426_v5, %v3729_v16  ;;  %v1454_v13 = vadd.f32 %v1448_v33, %v5040_v25  ;;  %v1453_v4 = vadd.f32 %v1447_v8, %v5040_v25 }
 0x372   : > { %v1437_v17 = vmul.f32 %v1430_v40, %v5004_v36  ;;  %v1438_v49 = vmul.f32 %v1433_v37, %v5004_v36  ;;  %v1413_v59 = vadd.f32 %v1407_v44, %v1377_v47  ;;  %v1414_v22 = vadd.f32 %v1408_v18, %v1378_v14  ;;  %v5042_v14 = vld [vmem:[#allocation26_spill] sm:$0xff] }
 0x373   : > { %v1460_v38 = vmax.f32 %v1454_v13, 0.0  ;;  %v1459_v21 = vmax.f32 %v1453_v4, 0.0 }
 0x374   : > { %v1443_v30 = vmul.f32 %v3444_v39, %v1437_v17  ;;  %v1444_v45 = vmul.f32 %v3449_v46, %v1438_v49  ;;  %v1242_v3 = vpop.permute.xlu0 %1241  ;;  %v1176_v29 = vpop.permute.xlu1 %1175 }
 0x375   : > { %v1179_v12 = vsel %vm491_vm2, %v1170_v28, %v1176_v29  ;;  %v1182_v42 = vsel %vm491_vm2, %v1176_v29, %v1170_v28  ;;  %v1466_v5 = vmin.f32 %v1460_v38, 6.0  ;;  %v1465_v44 = vmin.f32 %v1459_v21, 6.0  ;;  %v5044_v38 = vld [vmem:[#allocation12_spill] sm:$0xff] }
 0x376   : > { %v1449_v11 = vadd.f32 %v1443_v30, %v1413_v59  ;;  %v1450_v16 = vadd.f32 %v1444_v45, %v1414_v22  ;;  %v1187_v17 = vmul.f32 %v1182_v42, %v5042_v14  ;;  %v1188_v49 = vmul.f32 %v1179_v12, %v5042_v14  ;;  %v5043_v59 = vld [vmem:[#allocation10_spill] sm:$0xff]  ;;  %v5045_v12 = vld [vmem:[#allocation27_spill] sm:$0xff] }
 0x377   : > { %v5046_v42 = vld [vmem:[#allocation7_spill] sm:$0xff] }
 0x378   : > { %v1278_v62 = vpop.permute.xlu0 %1277  ;;  %v1212_v34 = vpop.permute.xlu1 %1211  ;;  %v1456_v54 = vadd.f32 %v1450_v16, %v5041_v48  ;;  %v1455_v43 = vadd.f32 %v1449_v11, %v5041_v48  ;;  %v1193_v11 = vmul.f32 %v1187_v17, %v3259_v10  ;;  %v1194_v16 = vmul.f32 %v1188_v49, %v3262_v32 }
 0x379   : > { %v1215_v18 = vsel %vm548_vm3, %v1206_v56, %v1212_v34  ;;  %v1218_v40 = vsel %vm548_vm3, %v1212_v34, %v1206_v56 }
 0x37a   : > { %v1462_v57 = vmax.f32 %v1456_v54, 0.0  ;;  %v1461_v8 = vmax.f32 %v1455_v43, 0.0  ;;  %v1223_v22 = vmul.f32 %v1218_v40, %v5043_v59  ;;  %v1224_v30 = vmul.f32 %v1215_v18, %v5043_v59  ;;  %v5048_v40 = vld [vmem:[#allocation14_spill] sm:$0xff] }
 0x37c   : > { %v1248_v33 = vpop.permute.xlu1 %1247  ;;  %v1468_v37 = vmin.f32 %v1462_v57, 6.0  ;;  %v1467_v47 = vmin.f32 %v1461_v8, 6.0  ;;  %v1314_v13 = vpop.permute.xlu0 %1313  ;;  %v5047_v57 = vld [vmem:[#allocation8_spill] sm:$0xff] }
 0x37d   : > { %v1251_v45 = vsel %vm605_vm4, %v1242_v3, %v1248_v33  ;;  %v1254_v29 = vsel %vm605_vm4, %v1248_v33, %v1242_v3  ;;  %v1163_v3 = vmul.f32 %v5046_v42, %v5045_v12  ;;  %v1164_v8 = vmul.f32 %v5047_v57, %v5045_v12 }
 0x37e   : > { %v2671_v4 = vpack.c.bf16 %v1468_v37, %v1466_v5  ;;  %v2673_v28 = vpack.c.bf16 %v1467_v47, %v1465_v44  ;;  %v1259_v43 = vmul.f32 %v1254_v29, %v5044_v38  ;;  %v1260_v21 = vmul.f32 %v1251_v45, %v5044_v38  ;;  %v5049_v29 = vld [vmem:[#allocation15_spill] sm:$0xff] }
 0x37f   : > { %v1229_v33 = vmul.f32 %v1223_v22, %v3275_v0  ;;  %v1230_v5 = vmul.f32 %v1224_v30, %v3283_v24  ;;  %v1199_v49 = vadd.f32 %v1193_v11, %v1163_v3 }
 0x380   : > { %v1284_v56 = vpop.permute.xlu1 %1283  ;;  %2672 = vmatprep.subr.bf16.mxu0 %v2671_v4  ;;  %v1350_v44 = vpop.permute.xlu0 %1349  ;;  %v1200_v4 = vadd.f32 %v1194_v16, %v1164_v8  ;;  %v1266_v22 = vmul.f32 %v1260_v21, %v3293_v2 }
 0x381   : > { %v1287_v34 = vsel %vm662_vm5, %v1278_v62, %v1284_v56  ;;  %v1290_v54 = vsel %vm662_vm5, %v1284_v56, %v1278_v62  ;;  %2674 = vmatpush1.bf16.msra.mxu0 %v2673_v28  ;;  %v1265_v28 = vmul.f32 %v1259_v43, %v3288_v20  ;;  %v1235_v45 = vadd.f32 %v1229_v33, %v1199_v49  ;;  %v5050_v43 = vld [vmem:[#allocation16_spill] sm:$0xff] }
 0x382   : > { %v1295_v37 = vmul.f32 %v1290_v54, %v5048_v40  ;;  %v1296_v62 = vmul.f32 %v1287_v34, %v5048_v40  ;;  %v1236_v30 = vadd.f32 %v1230_v5, %v1200_v4 }
 0x383   : > { %v1271_v8 = vadd.f32 %v1265_v28, %v1235_v45 }
 0x384   : > { %v1320_v18 = vpop.permute.xlu1 %1319  ;;  %v1301_v34 = vmul.f32 %v1295_v37, %v3308_v53  ;;  %v1302_v57 = vmul.f32 %v1296_v62, %v3323_v41  ;;  %v1386_v16 = vpop.permute.xlu0 %1385  ;;  %v1272_v33 = vadd.f32 %v1266_v22, %v1236_v30 }
 0x385   : > { %v1323_v47 = vsel %vm719_vm6, %v1314_v13, %v1320_v18  ;;  %v1326_v17 = vsel %vm719_vm6, %v1320_v18, %v1314_v13 }
 0x386   : > { %v1331_v56 = vmul.f32 %v1323_v47, %v5049_v29  ;;  %v1332_v54 = vmul.f32 %v1326_v17, %v5049_v29  ;;  %v1307_v47 = vadd.f32 %v1301_v34, %v1271_v8  ;;  %v1308_v62 = vadd.f32 %v1302_v57, %v1272_v33 }
 0x388   : > { %v1356_v42 = vpop.permute.xlu1 %1355  ;;  %v1337_v5 = vmul.f32 %v1331_v56, %v3328_v52  ;;  %v1338_v18 = vmul.f32 %v1332_v54, %v3334_v51  ;;  %v1422_v56 = vpop.permute.xlu0 %1421 }
 0x389   : > { %v1359_v13 = vsel %vm776_vm7, %v1350_v44, %v1356_v42  ;;  %v1362_v11 = vsel %vm776_vm7, %v1356_v42, %v1350_v44  ;;  %v5051_v42 = vld [vmem:[#allocation17_spill] sm:$0xff] }
 0x38a   : > { %v1367_v21 = vmul.f32 %v1359_v13, %v5050_v43  ;;  %v1368_v3 = vmul.f32 %v1362_v11, %v5050_v43  ;;  %v1343_v45 = vadd.f32 %v1337_v5, %v1307_v47  ;;  %v1344_v30 = vadd.f32 %v1338_v18, %v1308_v62 }
 0x38c   : > { %v1392_v37 = vpop.permute.xlu1 %1391  ;;  %v1373_v49 = vmul.f32 %v1367_v21, %v3366_v27  ;;  %v1374_v4 = vmul.f32 %v1368_v3, %v3369_v15  ;;  %v5052_v3 = vld [vmem:[#allocation18_spill] sm:$0xff] }
 0x38d   : > { %v1395_v17 = vsel %vm833_vm8, %v1386_v16, %v1392_v37  ;;  %v1398_v44 = vsel %vm833_vm8, %v1392_v37, %v1386_v16 }
 0x38e   : > { %v1403_v28 = vmul.f32 %v1395_v17, %v5051_v42  ;;  %v1404_v22 = vmul.f32 %v1398_v44, %v5051_v42  ;;  %v1379_v16 = vadd.f32 %v1373_v49, %v1343_v45  ;;  %v1380_v21 = vadd.f32 %v1374_v4, %v1344_v30  ;;  %v5053_v44 = vld [vmem:[#allocation38_spill] sm:$0xff]  ;;  %v2642_v42 = vld [vmem:[%s2973_s10 + $0x10] sm:$0xff] }
 0x38f   : > { %v3956_v30 = vcombine.high %v2642_v42, %v2642_v42 }
 0x390   : > { %v1409_v54 = vmul.f32 %v1403_v28, %v3384_v61  ;;  %v1410_v34 = vmul.f32 %v1404_v22, %v3387_v7  ;;  %v1428_v57 = vpop.permute.xlu1 %1427 }
 0x391   : > { %v1431_v13 = vsel %vm890_vm9, %v1422_v56, %v1428_v57  ;;  %v1434_v11 = vsel %vm890_vm9, %v1428_v57, %v1422_v56  ;;  %5054 = vst [vmem:[#allocation31_spill] sm:$0xff] %v3956_v30 }
 0x392   : > { %v1439_v8 = vmul.f32 %v1431_v13, %v5052_v3  ;;  %v1440_v33 = vmul.f32 %v1434_v11, %v5052_v3  ;;  %v1415_v5 = vadd.f32 %v1409_v54, %v1379_v16  ;;  %v1416_v18 = vadd.f32 %v1410_v34, %v1380_v21  ;;  %v5055_v54 = vld [vmem:[#allocation28_spill] sm:$0xff]  ;;  %v3975_v34 = vld [vmem:[%s4828_s2 + $0x8] sm:$0xff]  ;;  %v5062_v16 = vld [vmem:[#allocation19_spill] sm:$0xff] }
 0x393   : > { %5058 = vst [vmem:[#allocation33_spill] sm:$0xff] %v3975_v34 }
 0x394   : > { %v1445_v37 = vmul.f32 %v3444_v39, %v1439_v8  ;;  %v1446_v47 = vmul.f32 %v3449_v46, %v1440_v33  ;;  %v5056_v39 = vmov 0.0   ;;  %v3967_v46 = vld [vmem:[%s4828_s2] sm:$0xff] }
 0x395   : > { %5057 = vst [vmem:[#allocation29_spill] sm:$0xff] %v3967_v46 }
 0x396   : > { %v1451_v62 = vadd.f32 %v1445_v37, %v1415_v5  ;;  %v1452_v17 = vadd.f32 %v1446_v47, %v1416_v18  ;;  %v5063_v37 = vld [vmem:[#allocation20_spill] sm:$0xff] }
 0x398   : > { %v1458_v28 = vadd.f32 %v1452_v17, %v5053_v44  ;;  %v1457_v22 = vadd.f32 %v1451_v62, %v5053_v44  ;;  %v5069_v44 = vld [vmem:[#allocation22_spill] sm:$0xff] }
 0x39a   : > { %v1464_v56 = vmax.f32 %v1458_v28, 0.0  ;;  %v1463_v49 = vmax.f32 %v1457_v22, 0.0 }
 0x39c   : > { %v1470_v4 = vmin.f32 %v1464_v56, 6.0  ;;  %v1469_v45 = vmin.f32 %v1463_v49, 6.0 }
 0x39e   : > { %1475 = vmatprep.subr.mxu0 %v1470_v4 }
 0x39f   : > { %1476 = vmatpush1.msra.mxu0 %v1469_v45 }
 0x3a0   : > { %2640 = vmatmul.mubr.msk.f32.vlgmr.msra.gmra.mrb[6].mxu0 %vm973_vm10, %v5055_v54  ;;  %2643 = vmatprep.subr.msk.mxu0 %vm356_vm0, %v3956_v30 }
 0x3a1   : > { %2644 = vmatpush1.msk.msra.mxu0 %vm356_vm0, %v2642_v42  ;;  %1623 = vmatprep.mubr.f32.mxu0 %v5056_v39  ;;  %v3983_v42 = vld [vmem:[%s4828_s2 + $0x10] sm:$0xff] }
 0x3a2   : > { %5059 = vst [vmem:[#allocation7_spill] sm:$0xff] %v3983_v42 }
 0x3a4   : > { %2645 = vmatmul.mubr.msk.f32.vlgmr.msra.gmra.mrb[8].mxu0 %vm346_vm1, %v3967_v46 }
 0x3a5   : > { %1629 = vmatprep.mubr.f32.mxu0 %v5056_v39 }
 0x3a8   : > { %2646 = vmatmul.mubr.msk.f32.gmra.mrb[10].mxu0 %vm346_vm1, %v3975_v34 }
 0x3a9   : > { %1635 = vmatprep.mubr.f32.mxu0 %v5056_v39 }
 0x3ac   : > { %2647 = vmatmul.mubr.msk.f32.gmra.mrb[12].mxu0 %vm346_vm1, %v3983_v42 }
 0x3ad   : > { %2525 = vmatprep.mubr.f32.mxu0 %v5056_v39 }
 0x473   : > { %v3988_v57 = vpop.f32.mrb[6].mxu0 }
 0x474   : > { %5060 = vst [vmem:[#allocation8_spill] sm:$0xff] %v3988_v57  ;;  %v3990_v13 = vpop.f32.mrb[7].mxu0 }
 0x475   : > { %5061 = vst [vmem:[#allocation28_spill] sm:$0xff] %v3990_v13 }
 0x477   : > { %v1625_v11 = vpop.f32.mrb[8].mxu0 }
 0x478   : > { %v1626_v21 = vadd.f32 %v1625_v11, %v5062_v16  ;;  %v1627_v8 = vpop.f32.mrb[9].mxu0 }
 0x479   : > { %v1628_v49 = vadd.f32 %v1627_v8, %v5062_v16  ;;  %v5066_v8 = vld [vmem:[#allocation21_spill] sm:$0xff] }
 0x47a   : > { %v1642_v33 = vmax.f32 %v1626_v21, 0.0 }
 0x47b   : > { %v1631_v5 = vpop.f32.mrb[10].mxu0  ;;  %v1643_v4 = vmax.f32 %v1628_v49, 0.0 }
 0x47c   : > { %v3993_v18 = vmin.f32 %v1642_v33, 6.0  ;;  %v1632_v47 = vadd.f32 %v1631_v5, %v5063_v37  ;;  %v1633_v62 = vpop.f32.mrb[11].mxu0 }
 0x47d   : > { %v1634_v45 = vadd.f32 %v1633_v62, %v5063_v37  ;;  %v4030_v54 = vmin.f32 %v1643_v4, 6.0 }
 0x47e   : > { %v1644_v17 = vmax.f32 %v1632_v47, 0.0  ;;  %1660 = vrot.lane.b32.xlu0 %v3993_v18, %s2851_s20 }
 0x47f   : > { %v1637_v28 = vpop.f32.mrb[12].mxu0  ;;  %v1645_v11 = vmax.f32 %v1634_v45, 0.0 }
 0x480   : > { %v3998_v22 = vmin.f32 %v1644_v17, 6.0  ;;  %v1639_v56 = vpop.f32.mrb[13].mxu0  ;;  %v1638_v33 = vadd.f32 %v1637_v28, %v5066_v8 }
 0x481   : > { %v4036_v21 = vmin.f32 %v1645_v11, 6.0  ;;  %v1640_v47 = vadd.f32 %v1639_v56, %v5066_v8 }
 0x482   : > { %1662 = vrot.lane.b32.xlu1 %v3998_v22, %s2851_s20  ;;  %1696 = vrot.lane.b32.xlu0 %v3993_v18, %s2850_s19  ;;  %v1646_v5 = vmax.f32 %v1638_v33, 0.0 }
 0x483   : > { %v1647_v17 = vmax.f32 %v1640_v47, 0.0 }
 0x484   : > { %v4068_v62 = vmin.f32 %v1646_v5, 6.0 }
 0x485   : > { %v4074_v28 = vmin.f32 %v1647_v17, 6.0 }
 0x486   : > { %1698 = vrot.lane.b32.xlu1 %v3998_v22, %s2850_s19  ;;  %1732 = vrot.lane.b32.xlu0 %v3993_v18, %s2852_s21  ;;  %5067 = vst [vmem:[#allocation41_spill] sm:$0xff] %v4068_v62 }
 0x487   : > { %5068 = vst [vmem:[#allocation42_spill] sm:$0xff] %v4074_v28 }
 0x48a   : > { %1734 = vrot.lane.b32.xlu1 %v3998_v22, %s2852_s21  ;;  %1768 = vrot.lane.b32.xlu0 %v3993_v18, %s2853_s22 }
 0x48e   : > { %1770 = vrot.lane.b32.xlu1 %v3998_v22, %s2853_s22  ;;  %1804 = vrot.lane.b32.xlu0 %v3993_v18, %s2854_s23 }
 0x492   : > { %1806 = vrot.lane.b32.xlu1 %v3998_v22, %s2854_s23  ;;  %1840 = vrot.lane.b32.xlu0 %v3993_v18, %s2855_s24 }
 0x496   : > { %1842 = vrot.lane.b32.xlu1 %v3998_v22, %s2855_s24  ;;  %1876 = vrot.lane.b32.xlu0 %v3993_v18, %s5064_s25 }
 0x49a   : > { %1878 = vrot.lane.b32.xlu1 %v3998_v22, %s5064_s25  ;;  %1912 = vrot.lane.b32.xlu0 %v3993_v18, %s5065_s26 }
 0x49e   : > { %1914 = vrot.lane.b32.xlu1 %v3998_v22, %s5065_s26  ;;  %1666 = vrot.lane.b32.xlu0 %v4030_v54, %s2851_s20 }
 0x4a2   : > { %1668 = vrot.lane.b32.xlu1 %v4036_v21, %s2851_s20  ;;  %1702 = vrot.lane.b32.xlu0 %v4030_v54, %s2850_s19 }
 0x4a6   : > { %1704 = vrot.lane.b32.xlu1 %v4036_v21, %s2850_s19  ;;  %1738 = vrot.lane.b32.xlu0 %v4030_v54, %s2852_s21 }
 0x4aa   : > { %1740 = vrot.lane.b32.xlu1 %v4036_v21, %s2852_s21  ;;  %1774 = vrot.lane.b32.xlu0 %v4030_v54, %s2853_s22 }
 0x4ae   : > { %1776 = vrot.lane.b32.xlu1 %v4036_v21, %s2853_s22  ;;  %1810 = vrot.lane.b32.xlu0 %v4030_v54, %s2854_s23 }
 0x4b2   : > { %1812 = vrot.lane.b32.xlu1 %v4036_v21, %s2854_s23  ;;  %1846 = vrot.lane.b32.xlu0 %v4030_v54, %s2855_s24 }
 0x4b6   : > { %1848 = vrot.lane.b32.xlu1 %v4036_v21, %s2855_s24  ;;  %1882 = vrot.lane.b32.xlu0 %v4030_v54, %s5064_s25 }
 0x4ba   : > { %1884 = vrot.lane.b32.xlu1 %v4036_v21, %s5064_s25  ;;  %1918 = vrot.lane.b32.xlu0 %v4030_v54, %s5065_s26 }
 0x4be   : > { %1920 = vrot.lane.b32.xlu1 %v4036_v21, %s5065_s26  ;;  %1664 = vrot.lane.b32.xlu0 %v4068_v62, %s2851_s20 }
 0x4c2   : > { %1670 = vrot.lane.b32.xlu1 %v4074_v28, %s2851_s20  ;;  %1700 = vrot.lane.b32.xlu0 %v4068_v62, %s2850_s19 }
 0x4c6   : > { %1706 = vrot.lane.b32.xlu1 %v4074_v28, %s2850_s19  ;;  %1736 = vrot.lane.b32.xlu0 %v4068_v62, %s2852_s21 }
 0x4ca   : > { %1742 = vrot.lane.b32.xlu1 %v4074_v28, %s2852_s21  ;;  %1772 = vrot.lane.b32.xlu0 %v4068_v62, %s2853_s22 }
 0x4ce   : > { %1778 = vrot.lane.b32.xlu1 %v4074_v28, %s2853_s22  ;;  %1808 = vrot.lane.b32.xlu0 %v4068_v62, %s2854_s23 }
 0x4d2   : > { %1814 = vrot.lane.b32.xlu1 %v4074_v28, %s2854_s23  ;;  %1844 = vrot.lane.b32.xlu0 %v4068_v62, %s2855_s24 }
 0x4d6   : > { %1850 = vrot.lane.b32.xlu1 %v4074_v28, %s2855_s24  ;;  %1880 = vrot.lane.b32.xlu0 %v4068_v62, %s5064_s25 }
 0x4da   : > { %1886 = vrot.lane.b32.xlu1 %v4074_v28, %s5064_s25  ;;  %1916 = vrot.lane.b32.xlu0 %v4068_v62, %s5065_s26 }
 0x4de   : > { %1922 = vrot.lane.b32.xlu1 %v4074_v28, %s5065_s26 }
 0x4f0   : > { %v1661_v56 = vpop.permute.xlu0 %1660 }
 0x4f4   : > { %v1663_v49 = vpop.permute.xlu1 %1662  ;;  %v1697_v4 = vpop.permute.xlu0 %1696 }
 0x4f8   : > { %v1699_v45 = vpop.permute.xlu1 %1698  ;;  %v1733_v11 = vpop.permute.xlu0 %1732 }
 0x4fc   : > { %v1735_v33 = vpop.permute.xlu1 %1734  ;;  %v1769_v5 = vpop.permute.xlu0 %1768 }
 0x500   : > { %v4106_v47 = vpop.permute.xlu1 %1770  ;;  %v4108_v17 = vpop.permute.xlu0 %1804 }
 0x504   : > { %v4110_v30 = vpop.permute.xlu1 %1806  ;;  %v4112_v13 = vpop.permute.xlu0 %1840 }
 0x508   : > { %v4114_v57 = vpop.permute.xlu1 %1842  ;;  %v4116_v8 = vpop.permute.xlu0 %1876 }
 0x50c   : > { %v4118_v37 = vpop.permute.xlu1 %1878  ;;  %v4120_v16 = vpop.permute.xlu0 %1912 }
 0x510   : > { %v4122_v42 = vpop.permute.xlu1 %1914  ;;  %v1667_v34 = vpop.permute.xlu0 %1666 }
 0x511   : > { %v1672_v46 = vsel %vm491_vm2, %v1661_v56, %v1667_v34  ;;  %v1675_v39 = vsel %vm491_vm2, %v1667_v34, %v1661_v56  ;;  %v5070_v34 = vld [vmem:[#allocation23_spill] sm:$0xff] }
 0x512   : > { %v1678_v3 = vmul.f32 %v1675_v39, %v5069_v44  ;;  %v1679_v43 = vmul.f32 %v1672_v46, %v5069_v44  ;;  %v1654_v56 = vmul.f32 %v3993_v18, %v5070_v34  ;;  %v5071_v44 = vld [vmem:[#allocation24_spill] sm:$0xff] }
 0x514   : > { %v1684_v29 = vmul.f32 %v1678_v3, %v3259_v10  ;;  %v1685_v40 = vmul.f32 %v1679_v43, %v3262_v32  ;;  %v1669_v28 = vpop.permute.xlu1 %1668  ;;  %v1703_v62 = vpop.permute.xlu0 %1702  ;;  %v1655_v43 = vmul.f32 %v4030_v54, %v5070_v34 }
 0x515   : > { %v1673_v12 = vsel %vm491_vm2, %v1663_v49, %v1669_v28  ;;  %v1676_v38 = vsel %vm491_vm2, %v1669_v28, %v1663_v49  ;;  %v1708_v59 = vsel %vm548_vm3, %v1697_v4, %v1703_v62  ;;  %v1711_v39 = vsel %vm548_vm3, %v1703_v62, %v1697_v4 }
 0x516   : > { %v1680_v46 = vmul.f32 %v1676_v38, %v3208_v19  ;;  %v1681_v3 = vmul.f32 %v1673_v12, %v3208_v19  ;;  %v1714_v14 = vmul.f32 %v1711_v39, %v5071_v44  ;;  %v1715_v28 = vmul.f32 %v1708_v59, %v5071_v44 }
 0x517   : > { %v1657_v49 = vmul.f32 %v4036_v21, %v3031_v23  ;;  %v1656_v62 = vmul.f32 %v3998_v22, %v3031_v23  ;;  %v1690_v19 = vadd.f32 %v1684_v29, %v1654_v56  ;;  %v1691_v48 = vadd.f32 %v1685_v40, %v1655_v43 }
 0x518   : > { %v1686_v38 = vmul.f32 %v1680_v46, %v3259_v10  ;;  %v1705_v4 = vpop.permute.xlu1 %1704  ;;  %v1739_v12 = vpop.permute.xlu0 %1738  ;;  %v1687_v59 = vmul.f32 %v1681_v3, %v3262_v32  ;;  %v1720_v39 = vmul.f32 %v1714_v14, %v3275_v0  ;;  %v1721_v46 = vmul.f32 %v1715_v28, %v3283_v24  ;;  %v5072_v3 = vld [vmem:[#allocation11_spill] sm:$0xff] }
 0x519   : > { %v1709_v54 = vsel %vm548_vm3, %v1699_v45, %v1705_v4  ;;  %v1712_v18 = vsel %vm548_vm3, %v1705_v4, %v1699_v45  ;;  %v1744_v40 = vsel %vm605_vm4, %v1733_v11, %v1739_v12  ;;  %v1747_v29 = vsel %vm605_vm4, %v1739_v12, %v1733_v11 }
 0x51a   : > { %v1716_v21 = vmul.f32 %v1712_v18, %v3101_v55  ;;  %v1717_v22 = vmul.f32 %v1709_v54, %v3101_v55  ;;  %v1692_v23 = vadd.f32 %v1686_v38, %v1656_v62  ;;  %v1750_v56 = vmul.f32 %v1747_v29, %v5072_v3 }
 0x51b   : > { %v1751_v14 = vmul.f32 %v1744_v40, %v5072_v3  ;;  %v1693_v12 = vadd.f32 %v1687_v59, %v1657_v49  ;;  %v1726_v54 = vadd.f32 %v1720_v39, %v1690_v19  ;;  %v5073_v3 = vld [vmem:[#allocation13_spill] sm:$0xff] }
 0x51c   : > { %v1722_v43 = vmul.f32 %v1716_v21, %v3275_v0  ;;  %v1723_v45 = vmul.f32 %v1717_v22, %v3283_v24  ;;  %v1741_v4 = vpop.permute.xlu1 %1740  ;;  %v1775_v18 = vpop.permute.xlu0 %1774  ;;  %v1756_v21 = vmul.f32 %v1750_v56, %v3288_v20 }
 0x51d   : > { %v1745_v62 = vsel %vm605_vm4, %v1735_v33, %v1741_v4  ;;  %v1748_v28 = vsel %vm605_vm4, %v1741_v4, %v1735_v33  ;;  %v1780_v38 = vsel %vm662_vm5, %v1769_v5, %v1775_v18  ;;  %v1783_v11 = vsel %vm662_vm5, %v1775_v18, %v1769_v5 }
 0x51e   : > { %v1757_v22 = vmul.f32 %v1751_v14, %v3293_v2  ;;  %v1752_v40 = vmul.f32 %v1748_v28, %v3113_v58  ;;  %v1753_v29 = vmul.f32 %v1745_v62, %v3113_v58  ;;  %v1786_v55 = vmul.f32 %v1783_v11, %v5073_v3 }
 0x51f   : > { %v1787_v33 = vmul.f32 %v1780_v38, %v5073_v3  ;;  %v1727_v4 = vadd.f32 %v1721_v46, %v1691_v48  ;;  %v1728_v44 = vadd.f32 %v1722_v43, %v1692_v23  ;;  %v1729_v0 = vadd.f32 %v1723_v45, %v1693_v12 }
 0x520   : > { %v1777_v34 = vpop.permute.xlu1 %1776  ;;  %v1811_v24 = vpop.permute.xlu0 %1810  ;;  %v1762_v5 = vadd.f32 %v1756_v21, %v1726_v54  ;;  %v1758_v19 = vmul.f32 %v1752_v40, %v3288_v20  ;;  %v1792_v49 = vmul.f32 %v1786_v55, %v3308_v53  ;;  %v1759_v43 = vmul.f32 %v1753_v29, %v3293_v2 }
 0x521   : > { %v1781_v59 = vsel %vm662_vm5, %v4106_v47, %v1777_v34  ;;  %v1784_v39 = vsel %vm662_vm5, %v1777_v34, %v4106_v47  ;;  %v1816_v23 = vsel %vm719_vm6, %v4108_v17, %v1811_v24  ;;  %v1819_v48 = vsel %vm719_vm6, %v1811_v24, %v4108_v17 }
 0x522   : > { %v1763_v46 = vadd.f32 %v1757_v22, %v1727_v4  ;;  %v1764_v55 = vadd.f32 %v1758_v19, %v1728_v44  ;;  %v1793_v45 = vmul.f32 %v1787_v33, %v3323_v41  ;;  %v1788_v56 = vmul.f32 %v1784_v39, %v3129_v60 }
 0x523   : > { %v1789_v14 = vmul.f32 %v1781_v59, %v3129_v60  ;;  %v1822_v47 = vmul.f32 %v1816_v23, %v3146_v63  ;;  %v1823_v34 = vmul.f32 %v1819_v48, %v3146_v63  ;;  %v1798_v38 = vadd.f32 %v1792_v49, %v1762_v5 }
 0x524   : > { %v1813_v18 = vpop.permute.xlu1 %1812  ;;  %v1847_v62 = vpop.permute.xlu0 %1846  ;;  %v1794_v11 = vmul.f32 %v1788_v56, %v3308_v53  ;;  %v1765_v29 = vadd.f32 %v1759_v43, %v1729_v0  ;;  %v1799_v33 = vadd.f32 %v1793_v45, %v1763_v46 }
 0x525   : > { %v1817_v24 = vsel %vm719_vm6, %v4110_v30, %v1813_v18  ;;  %v1820_v44 = vsel %vm719_vm6, %v1813_v18, %v4110_v30  ;;  %v1852_v17 = vsel %vm776_vm7, %v4112_v13, %v1847_v62  ;;  %v1855_v28 = vsel %vm776_vm7, %v1847_v62, %v4112_v13 }
 0x526   : > { %v1828_v12 = vmul.f32 %v1822_v47, %v3328_v52  ;;  %v1829_v54 = vmul.f32 %v1823_v34, %v3334_v51  ;;  %v1824_v21 = vmul.f32 %v1817_v24, %v5038_v31  ;;  %v1825_v22 = vmul.f32 %v1820_v44, %v5038_v31 }
 0x527   : > { %v1858_v30 = vmul.f32 %v1852_v17, %v3165_v6  ;;  %v1859_v40 = vmul.f32 %v1855_v28, %v3165_v6  ;;  %v1795_v4 = vmul.f32 %v1789_v14, %v3323_v41  ;;  %v1800_v19 = vadd.f32 %v1794_v11, %v1764_v55 }
 0x528   : > { %v1849_v13 = vpop.permute.xlu1 %1848  ;;  %v1883_v5 = vpop.permute.xlu0 %1882  ;;  %v1834_v49 = vadd.f32 %v1828_v12, %v1798_v38  ;;  %v1835_v43 = vadd.f32 %v1829_v54, %v1799_v33  ;;  %v1830_v55 = vmul.f32 %v1824_v21, %v3328_v52  ;;  %v1831_v45 = vmul.f32 %v1825_v22, %v3334_v51 }
 0x529   : > { %v1864_v59 = vmul.f32 %v1858_v30, %v3366_v27  ;;  %v1865_v39 = vmul.f32 %v1859_v40, %v3369_v15  ;;  %v1853_v23 = vsel %vm776_vm7, %v4114_v57, %v1849_v13  ;;  %v1856_v48 = vsel %vm776_vm7, %v1849_v13, %v4114_v57 }
 0x52a   : > { %v1888_v0 = vsel %vm833_vm8, %v4116_v8, %v1883_v5  ;;  %v1891_v46 = vsel %vm833_vm8, %v1883_v5, %v4116_v8  ;;  %v1860_v14 = vmul.f32 %v1853_v23, %v3173_v9  ;;  %v1861_v47 = vmul.f32 %v1856_v48, %v3173_v9 }
 0x52b   : > { %v1870_v56 = vadd.f32 %v1864_v59, %v1834_v49  ;;  %v1894_v57 = vmul.f32 %v1888_v0, %v5037_v26  ;;  %v1895_v34 = vmul.f32 %v1891_v46, %v5037_v26  ;;  %v1871_v28 = vadd.f32 %v1865_v39, %v1835_v43  ;;  %v4268_v39 = vld [vmem:[%s4827_s1 + $0x10] ss:$0 sm:$0xff] }
 0x52c   : > { %v1885_v18 = vpop.permute.xlu1 %1884  ;;  %v1919_v62 = vpop.permute.xlu0 %1918  ;;  %v1866_v38 = vmul.f32 %v1860_v14, %v3366_v27  ;;  %v1801_v30 = vadd.f32 %v1795_v4, %v1765_v29  ;;  %v1836_v40 = vadd.f32 %v1830_v55, %v1800_v19  ;;  %v1867_v33 = vmul.f32 %v1861_v47, %v3369_v15  ;;  %v4274_v29 = vld [vmem:[%s4827_s1 + $0x18] ss:$0 sm:$0xff] }
 0x52d   : > { %v1889_v8 = vsel %vm833_vm8, %v4118_v37, %v1885_v18  ;;  %v1892_v24 = vsel %vm833_vm8, %v1885_v18, %v4118_v37  ;;  %v1924_v44 = vsel %vm890_vm9, %v4120_v16, %v1919_v62  ;;  %v1927_v17 = vsel %vm890_vm9, %v1919_v62, %v4120_v16 }
 0x52e   : > { %v1900_v11 = vmul.f32 %v1894_v57, %v3384_v61  ;;  %v1901_v12 = vmul.f32 %v1895_v34, %v3387_v7  ;;  %v1896_v54 = vmul.f32 %v1889_v8, %v5003_v35  ;;  %v1897_v21 = vmul.f32 %v1892_v24, %v5003_v35 }
 0x52f   : > { %v1930_v37 = vmul.f32 %v1924_v44, %v5039_v50  ;;  %v1931_v22 = vmul.f32 %v1927_v17, %v5039_v50  ;;  %v1837_v19 = vadd.f32 %v1831_v45, %v1801_v30  ;;  %v1872_v43 = vadd.f32 %v1866_v38, %v1836_v40 }
 0x530   : > { %v1906_v16 = vadd.f32 %v1900_v11, %v1870_v56  ;;  %v1921_v13 = vpop.permute.xlu1 %1920  ;;  %v1665_v5 = vpop.permute.xlu0 %1664  ;;  %v1907_v49 = vadd.f32 %v1901_v12, %v1871_v28  ;;  %v1902_v59 = vmul.f32 %v1896_v54, %v3384_v61  ;;  %v1903_v48 = vmul.f32 %v1897_v21, %v3387_v7  ;;  %v5074_v54 = vld [vmem:[#allocation37_spill] sm:$0xff] }
 0x531   : > { %v1936_v23 = vmul.f32 %v4268_v39, %v1930_v37  ;;  %v1937_v4 = vmul.f32 %v4274_v29, %v1931_v22  ;;  %v1925_v0 = vsel %vm890_vm9, %v4122_v42, %v1921_v13  ;;  %v1928_v46 = vsel %vm890_vm9, %v1921_v13, %v4122_v42 }
 0x532   : > { %v1873_v14 = vadd.f32 %v1867_v33, %v1837_v19  ;;  %v1932_v47 = vmul.f32 %v1925_v0, %v5004_v36  ;;  %v1933_v57 = vmul.f32 %v1928_v46, %v5004_v36  ;;  %v1908_v18 = vadd.f32 %v1902_v59, %v1872_v43 }
 0x533   : > { %v1942_v55 = vadd.f32 %v1936_v23, %v1906_v16  ;;  %v1943_v56 = vadd.f32 %v1937_v4, %v1907_v49  ;;  %v5075_v4 = vld [vmem:[#allocation26_spill] sm:$0xff] }
 0x534   : > { %v1671_v34 = vpop.permute.xlu1 %1670  ;;  %v1701_v45 = vpop.permute.xlu0 %1700  ;;  %v1909_v62 = vadd.f32 %v1903_v48, %v1873_v14  ;;  %v1938_v24 = vmul.f32 %v4268_v39, %v1932_v47  ;;  %v1939_v44 = vmul.f32 %v4274_v29, %v1933_v57 }
 0x535   : > { %v1948_v8 = vadd.f32 %v1942_v55, %v5040_v25  ;;  %v1949_v42 = vadd.f32 %v1943_v56, %v5040_v25  ;;  %v1674_v37 = vsel %vm491_vm2, %v1665_v5, %v1671_v34  ;;  %v1677_v22 = vsel %vm491_vm2, %v1671_v34, %v1665_v5  ;;  %v5076_v5 = vld [vmem:[#allocation10_spill] sm:$0xff] }
 0x536   : > { %v1944_v17 = vadd.f32 %v1938_v24, %v1908_v18  ;;  %v1945_v28 = vadd.f32 %v1939_v44, %v1909_v62  ;;  %v1682_v19 = vmul.f32 %v1677_v22, %v5075_v4  ;;  %v1683_v48 = vmul.f32 %v1674_v37, %v5075_v4  ;;  %v5080_v37 = vld [vmem:[#allocation42_spill] sm:$0xff]  ;;  %v5106_v4 = vld [vmem:[#allocation24_spill] sm:$0xff] }
 0x537   : > { %v1954_v12 = vmax.f32 %v1948_v8, 0.0  ;;  %v1955_v40 = vmax.f32 %v1949_v42, 0.0 }
 0x538   : > { %v1707_v38 = vpop.permute.xlu1 %1706  ;;  %v1737_v11 = vpop.permute.xlu0 %1736  ;;  %v1950_v21 = vadd.f32 %v1944_v17, %v5074_v54  ;;  %v1951_v30 = vadd.f32 %v1945_v28, %v5074_v54  ;;  %v1688_v8 = vmul.f32 %v1682_v19, %v3259_v10  ;;  %v1689_v24 = vmul.f32 %v1683_v48, %v3262_v32  ;;  %v5077_v17 = vld [vmem:[#allocation12_spill] sm:$0xff] }
 0x539   : > { %v1713_v16 = vsel %vm548_vm3, %v1707_v38, %v1701_v45  ;;  %v1710_v59 = vsel %vm548_vm3, %v1701_v45, %v1707_v38  ;;  %v1960_v0 = vmin.f32 %v1954_v12, 6.0  ;;  %v1961_v55 = vmin.f32 %v1955_v40, 6.0  ;;  %v5079_v12 = vld [vmem:[#allocation41_spill] sm:$0xff] }
 0x53a   : > { %v1956_v33 = vmax.f32 %v1950_v21, 0.0  ;;  %v1957_v23 = vmax.f32 %v1951_v30, 0.0  ;;  %v1718_v43 = vmul.f32 %v1713_v16, %v5076_v5  ;;  %v1719_v14 = vmul.f32 %v1710_v59, %v5076_v5  ;;  %v5081_v30 = vld [vmem:[#allocation39_spill] sm:$0xff] }
 0x53c   : > { %v1743_v13 = vpop.permute.xlu1 %1742  ;;  %v1773_v49 = vpop.permute.xlu0 %1772  ;;  %v1962_v46 = vmin.f32 %v1956_v33, 6.0  ;;  %v1963_v56 = vmin.f32 %v1957_v23, 6.0  ;;  %v1724_v40 = vmul.f32 %v1718_v43, %v5081_v30  ;;  %v5082_v33 = vld [vmem:[#allocation40_spill] sm:$0xff]  ;;  %v5083_v23 = vld [vmem:[#allocation14_spill] sm:$0xff] }
 0x53d   : > { %v1746_v47 = vsel %vm605_vm4, %v1737_v11, %v1743_v13  ;;  %v1749_v57 = vsel %vm605_vm4, %v1743_v13, %v1737_v11  ;;  %v5078_v11 = vld [vmem:[#allocation27_spill] sm:$0xff]  ;;  %v1725_v16 = vmul.f32 %v1719_v14, %v5082_v33 }
 0x53e   : > { %v2677_v18 = vpack.c.bf16 %v1962_v46, %v1960_v0  ;;  %v2675_v62 = vpack.c.bf16 %v1963_v56, %v1961_v55  ;;  %v1754_v28 = vmul.f32 %v1749_v57, %v5077_v17  ;;  %v1755_v38 = vmul.f32 %v1746_v47, %v5077_v17  ;;  %v5084_v57 = vld [vmem:[#allocation15_spill] sm:$0xff] }
 0x53f   : > { %v1658_v21 = vmul.f32 %v5079_v12, %v5078_v11  ;;  %v1659_v22 = vmul.f32 %v5080_v37, %v5078_v11 }
 0x540   : > { %v1779_v34 = vpop.permute.xlu1 %1778  ;;  %v1809_v45 = vpop.permute.xlu0 %1808  ;;  %2676 = vmatprep.subr.bf16.mxu1 %v2675_v62  ;;  %v1760_v56 = vmul.f32 %v1754_v28, %v3288_v20  ;;  %v1761_v43 = vmul.f32 %v1755_v38, %v3293_v2 }
 0x541   : > { %v1782_v44 = vsel %vm662_vm5, %v1773_v49, %v1779_v34  ;;  %v1785_v42 = vsel %vm662_vm5, %v1779_v34, %v1773_v49  ;;  %2678 = vmatpush1.bf16.msra.mxu1 %v2677_v18  ;;  %v1694_v46 = vadd.f32 %v1688_v8, %v1658_v21  ;;  %v1695_v55 = vadd.f32 %v1689_v24, %v1659_v22  ;;  %v5085_v24 = vld [vmem:[#allocation16_spill] sm:$0xff] }
 0x542   : > { %v1790_v49 = vmul.f32 %v1785_v42, %v5083_v23  ;;  %v1791_v19 = vmul.f32 %v1782_v44, %v5083_v23 }
 0x543   : > { %v1730_v14 = vadd.f32 %v1724_v40, %v1694_v46  ;;  %v1731_v47 = vadd.f32 %v1725_v16, %v1695_v55  ;;  %v5086_v46 = vld [vmem:[#allocation17_spill] sm:$0xff] }
 0x544   : > { %v1815_v13 = vpop.permute.xlu1 %1814  ;;  %v1845_v59 = vpop.permute.xlu0 %1844  ;;  %v1796_v44 = vmul.f32 %v1790_v49, %v3308_v53  ;;  %v1797_v42 = vmul.f32 %v1791_v19, %v3323_v41 }
 0x545   : > { %v1818_v48 = vsel %vm719_vm6, %v1809_v45, %v1815_v13  ;;  %v1821_v0 = vsel %vm719_vm6, %v1815_v13, %v1809_v45  ;;  %v1766_v21 = vadd.f32 %v1760_v56, %v1730_v14  ;;  %v1767_v37 = vadd.f32 %v1761_v43, %v1731_v47 }
 0x546   : > { %v1826_v34 = vmul.f32 %v1818_v48, %v5084_v57  ;;  %v1827_v18 = vmul.f32 %v1821_v0, %v5084_v57 }
 0x547   : > { %v1802_v13 = vadd.f32 %v1796_v44, %v1766_v21  ;;  %v1803_v49 = vadd.f32 %v1797_v42, %v1767_v37 }
 0x548   : > { %v1851_v62 = vpop.permute.xlu1 %1850  ;;  %v1881_v12 = vpop.permute.xlu0 %1880  ;;  %v1832_v22 = vmul.f32 %v1826_v34, %v3328_v52  ;;  %v1833_v40 = vmul.f32 %v1827_v18, %v3334_v51 }
 0x549   : > { %v1854_v45 = vsel %vm776_vm7, %v1845_v59, %v1851_v62  ;;  %v1857_v8 = vsel %vm776_vm7, %v1851_v62, %v1845_v59 }
 0x54a   : > { %v1862_v28 = vmul.f32 %v1854_v45, %v5085_v24  ;;  %v1863_v38 = vmul.f32 %v1857_v8, %v5085_v24  ;;  %v1838_v43 = vadd.f32 %v1832_v22, %v1802_v13  ;;  %v1839_v14 = vadd.f32 %v1833_v40, %v1803_v49  ;;  %v5088_v49 = vld [vmem:[#allocation38_spill] sm:$0xff] }
 0x54c   : > { %v1887_v16 = vpop.permute.xlu1 %1886  ;;  %v1868_v48 = vmul.f32 %v1862_v28, %v3366_v27  ;;  %v1869_v0 = vmul.f32 %v1863_v38, %v3369_v15  ;;  %v1917_v18 = vpop.permute.xlu0 %1916  ;;  %v5087_v28 = vld [vmem:[#allocation18_spill] sm:$0xff] }
 0x54d   : > { %v1890_v19 = vsel %vm833_vm8, %v1881_v12, %v1887_v16  ;;  %v1893_v59 = vsel %vm833_vm8, %v1887_v16, %v1881_v12 }
 0x54e   : > { %v1898_v55 = vmul.f32 %v1890_v19, %v5086_v46  ;;  %v1899_v56 = vmul.f32 %v1893_v59, %v5086_v46  ;;  %v1874_v45 = vadd.f32 %v1868_v48, %v1838_v43  ;;  %v1875_v8 = vadd.f32 %v1869_v0, %v1839_v14 }
 0x550   : > { %v1904_v47 = vmul.f32 %v1898_v55, %v3384_v61  ;;  %v1905_v34 = vmul.f32 %v1899_v56, %v3387_v7  ;;  %v1923_v62 = vpop.permute.xlu1 %1922  ;;  %v4363_v55 = vld [vmem:[%s2973_s10 + $0x18] sm:$0xff] }
 0x551   : > { %v1926_v44 = vsel %vm890_vm9, %v1917_v18, %v1923_v62  ;;  %v1929_v42 = vsel %vm890_vm9, %v1923_v62, %v1917_v18  ;;  %5089 = vst [vmem:[#allocation13_spill] sm:$0xff] %v4363_v55  ;;  %v4367_v14 = vcombine.high %v4363_v55, %v4363_v55  ;;  %v5093_v18 = vld [vmem:[#allocation29_spill] sm:$0xff] }
 0x552   : > { %v1934_v38 = vmul.f32 %v1926_v44, %v5087_v28  ;;  %v1935_v12 = vmul.f32 %v1929_v42, %v5087_v28  ;;  %v1910_v21 = vadd.f32 %v1904_v47, %v1874_v45  ;;  %v1911_v37 = vadd.f32 %v1905_v34, %v1875_v8  ;;  %v4372_v47 = vld [vmem:[%s4832_s6] sm:$0xf]  ;;  %v5095_v44 = vld [vmem:[#allocation7_spill] sm:$0xff]  ;;  %v5103_v28 = vld [vmem:[#allocation22_spill] sm:$0xff] }
 0x553   : > { %5090 = vst [vmem:[#allocation41_spill] sm:$0xff] %v4367_v14  ;;  %5091 = vst [vmem:[#allocation42_spill] sm:$0xff] %v4372_v47  ;;  %v5092_v34 = vmov 0.0   ;;  %v5094_v62 = vld [vmem:[#allocation33_spill] sm:$0xff] }
 0x554   : > { %v1940_v22 = vmul.f32 %v4268_v39, %v1934_v38  ;;  %v1941_v40 = vmul.f32 %v4274_v29, %v1935_v12  ;;  %v5098_v38 = vld [vmem:[#allocation19_spill] sm:$0xff] }
 0x556   : > { %v1946_v16 = vadd.f32 %v1940_v22, %v1910_v21  ;;  %v1947_v13 = vadd.f32 %v1941_v40, %v1911_v37 }
 0x558   : > { %v1953_v19 = vadd.f32 %v1947_v13, %v5088_v49  ;;  %v1952_v59 = vadd.f32 %v1946_v16, %v5088_v49  ;;  %v5099_v16 = vld [vmem:[#allocation20_spill] sm:$0xff] }
 0x55a   : > { %v1959_v48 = vmax.f32 %v1953_v19, 0.0  ;;  %v1958_v0 = vmax.f32 %v1952_v59, 0.0 }
 0x55c   : > { %v1965_v56 = vmin.f32 %v1959_v48, 6.0  ;;  %v1964_v43 = vmin.f32 %v1958_v0, 6.0 }
 0x55e   : > { %1970 = vmatprep.subr.mxu1 %v1965_v56 }
 0x55f   : > { %1971 = vmatpush1.msra.mxu1 %v1964_v43 }
 0x560   : > { %2648 = vmatmul.mubr.msk.f32.vlgmr.msra.gmra.mrb[8].mxu1 %vm973_vm10, %v4372_v47  ;;  %2651 = vmatprep.subr.msk.mxu1 %vm356_vm0, %v4367_v14 }
 0x561   : > { %2652 = vmatpush1.msk.msra.mxu1 %vm356_vm0, %v4363_v55  ;;  %2118 = vmatprep.mubr.f32.mxu1 %v5092_v34 }
 0x564   : > { %2653 = vmatmul.mubr.msk.f32.vlgmr.msra.gmra.mrb[10].mxu1 %vm346_vm1, %v5093_v18 }
 0x565   : > { %2124 = vmatprep.mubr.f32.mxu1 %v5092_v34 }
 0x568   : > { %2654 = vmatmul.mubr.msk.f32.gmra.mrb[12].mxu1 %vm346_vm1, %v5094_v62 }
 0x569   : > { %2130 = vmatprep.mubr.f32.mxu1 %v5092_v34 }
 0x56c   : > { %2655 = vmatmul.mubr.msk.f32.gmra.mrb[14].mxu1 %vm346_vm1, %v5095_v44 }
 0x633   : > { %v4389_v42 = vpop.f32.mrb[8].mxu1 }
 0x634   : > { %5096 = vst [vmem:[#allocation29_spill] sm:$0xff] %v4389_v42  ;;  %v4391_v45 = vpop.f32.mrb[9].mxu1 }
 0x635   : > { %5097 = vst [vmem:[#allocation33_spill] sm:$0xff] %v4391_v45 }
 0x637   : > { %v2120_v8 = vpop.f32.mrb[10].mxu1 }
 0x638   : > { %v2121_v12 = vadd.f32 %v2120_v8, %v5098_v38  ;;  %v2122_v21 = vpop.f32.mrb[11].mxu1 }
 0x639   : > { %v2123_v43 = vadd.f32 %v2122_v21, %v5098_v38  ;;  %v5100_v38 = vld [vmem:[#allocation21_spill] sm:$0xff] }
 0x63a   : > { %v2137_v37 = vmax.f32 %v2121_v12, 0.0 }
 0x63b   : > { %v2126_v22 = vpop.f32.mrb[12].mxu1  ;;  %v2138_v34 = vmax.f32 %v2123_v43, 0.0 }
 0x63c   : > { %v4394_v40 = vmin.f32 %v2137_v37, 6.0  ;;  %v2127_v13 = vadd.f32 %v2126_v22, %v5099_v16  ;;  %v2128_v19 = vpop.f32.mrb[13].mxu1 }
 0x63d   : > { %v2129_v18 = vadd.f32 %v2128_v19, %v5099_v16  ;;  %v4431_v62 = vmin.f32 %v2138_v34, 6.0  ;;  %v320_v19 = vld [vmem:[%s4833_s7] sm:$0xf] }
 0x63e   : > { %v2139_v59 = vmax.f32 %v2127_v13, 0.0  ;;  %2155 = vrot.lane.b32.xlu0 %v4394_v40, %s2851_s20 }
 0x63f   : > { %v2132_v48 = vpop.f32.mrb[14].mxu1  ;;  %v2140_v44 = vmax.f32 %v2129_v18, 0.0 }
 0x640   : > { %v4399_v0 = vmin.f32 %v2139_v59, 6.0  ;;  %v2134_v56 = vpop.f32.mrb[15].mxu1  ;;  %v2133_v12 = vadd.f32 %v2132_v48, %v5100_v38 }
 0x641   : > { %v4437_v8 = vmin.f32 %v2140_v44, 6.0  ;;  %v2135_v37 = vadd.f32 %v2134_v56, %v5100_v38 }
 0x642   : > { %2157 = vrot.lane.b32.xlu1 %v4399_v0, %s2851_s20  ;;  %2191 = vrot.lane.b32.xlu0 %v4394_v40, %s2850_s19  ;;  %v2141_v21 = vmax.f32 %v2133_v12, 0.0 }
 0x643   : > { %v2142_v16 = vmax.f32 %v2135_v37, 0.0 }
 0x644   : > { %v4469_v22 = vmin.f32 %v2141_v21, 6.0 }
 0x645   : > { %v4475_v13 = vmin.f32 %v2142_v16, 6.0 }
 0x646   : > { %2193 = vrot.lane.b32.xlu1 %v4399_v0, %s2850_s19  ;;  %2227 = vrot.lane.b32.xlu0 %v4394_v40, %s2852_s21  ;;  %5101 = vst [vmem:[#allocation7_spill] sm:$0xff] %v4469_v22 }
 0x647   : > { %5102 = vst [vmem:[#allocation19_spill] sm:$0xff] %v4475_v13 }
 0x64a   : > { %2229 = vrot.lane.b32.xlu1 %v4399_v0, %s2852_s21  ;;  %2263 = vrot.lane.b32.xlu0 %v4394_v40, %s2853_s22 }
 0x64e   : > { %2265 = vrot.lane.b32.xlu1 %v4399_v0, %s2853_s22  ;;  %2299 = vrot.lane.b32.xlu0 %v4394_v40, %s2854_s23 }
 0x652   : > { %2301 = vrot.lane.b32.xlu1 %v4399_v0, %s2854_s23  ;;  %2335 = vrot.lane.b32.xlu0 %v4394_v40, %s2855_s24 }
 0x656   : > { %2337 = vrot.lane.b32.xlu1 %v4399_v0, %s2855_s24  ;;  %2371 = vrot.lane.b32.xlu0 %v4394_v40, %s5064_s25 }
 0x65a   : > { %2373 = vrot.lane.b32.xlu1 %v4399_v0, %s5064_s25  ;;  %2407 = vrot.lane.b32.xlu0 %v4394_v40, %s5065_s26 }
 0x65e   : > { %2409 = vrot.lane.b32.xlu1 %v4399_v0, %s5065_s26  ;;  %2161 = vrot.lane.b32.xlu0 %v4431_v62, %s2851_s20 }
 0x662   : > { %2163 = vrot.lane.b32.xlu1 %v4437_v8, %s2851_s20  ;;  %2197 = vrot.lane.b32.xlu0 %v4431_v62, %s2850_s19 }
 0x666   : > { %2199 = vrot.lane.b32.xlu1 %v4437_v8, %s2850_s19  ;;  %2233 = vrot.lane.b32.xlu0 %v4431_v62, %s2852_s21 }
 0x66a   : > { %2235 = vrot.lane.b32.xlu1 %v4437_v8, %s2852_s21  ;;  %2269 = vrot.lane.b32.xlu0 %v4431_v62, %s2853_s22 }
 0x66e   : > { %2271 = vrot.lane.b32.xlu1 %v4437_v8, %s2853_s22  ;;  %2305 = vrot.lane.b32.xlu0 %v4431_v62, %s2854_s23 }
 0x672   : > { %2307 = vrot.lane.b32.xlu1 %v4437_v8, %s2854_s23  ;;  %2341 = vrot.lane.b32.xlu0 %v4431_v62, %s2855_s24 }
 0x676   : > { %2343 = vrot.lane.b32.xlu1 %v4437_v8, %s2855_s24  ;;  %2377 = vrot.lane.b32.xlu0 %v4431_v62, %s5064_s25 }
 0x67a   : > { %2379 = vrot.lane.b32.xlu1 %v4437_v8, %s5064_s25  ;;  %2413 = vrot.lane.b32.xlu0 %v4431_v62, %s5065_s26 }
 0x67e   : > { %2415 = vrot.lane.b32.xlu1 %v4437_v8, %s5065_s26  ;;  %2159 = vrot.lane.b32.xlu0 %v4469_v22, %s2851_s20 }
 0x682   : > { %2165 = vrot.lane.b32.xlu1 %v4475_v13, %s2851_s20  ;;  %2195 = vrot.lane.b32.xlu0 %v4469_v22, %s2850_s19 }
 0x686   : > { %2201 = vrot.lane.b32.xlu1 %v4475_v13, %s2850_s19  ;;  %2231 = vrot.lane.b32.xlu0 %v4469_v22, %s2852_s21  ;;  %s2782_s19 = scalar_lea.vmem %s2781_s13, 1024 }
 0x68a   : > { %2237 = vrot.lane.b32.xlu1 %v4475_v13, %s2852_s21  ;;  %2267 = vrot.lane.b32.xlu0 %v4469_v22, %s2853_s22  ;;  %s299_s21 = sand.u32 1, %s2830_s28  }
 0x68b   : > { %s4785_s18 = scalar_lea.sflag [#allocation3], %s299_s21 }
 0x68e   : > { %2273 = vrot.lane.b32.xlu1 %v4475_v13, %s2853_s22  ;;  %2303 = vrot.lane.b32.xlu0 %v4469_v22, %s2854_s23  ;;  %s2622_s22 = sshll.u32 %s299_s21, 5 }
 0x692   : > { %2309 = vrot.lane.b32.xlu1 %v4475_v13, %s2854_s23  ;;  %2339 = vrot.lane.b32.xlu0 %v4469_v22, %s2855_s24  ;;  %s301_s23 = scalar_lea.vmem [#allocation2], %s2622_s22 }
 0x696   : > { %2345 = vrot.lane.b32.xlu1 %v4475_v13, %s2855_s24  ;;  %2375 = vrot.lane.b32.xlu0 %v4469_v22, %s5064_s25  ;;  %s2556_s24 = sshll.u32 %s301_s23, 4  ;;  %s4776_s24 = int_to_ptr.vmem [resolvable:$true] %s2556_s24 }
 0x697   : > { %p2783_p0 = scmp.lt.s32.totalorder %s4776_s24, %s2781_s13 }
 0x69a   : > { %2381 = vrot.lane.b32.xlu1 %v4475_v13, %s5064_s25  ;;  %2411 = vrot.lane.b32.xlu0 %v4469_v22, %s5065_s26  ;;  %s2666_s25 = sshll.u32 %s2927_s9, 9  ;;  %s2776_s9 = scalar_lea.vmem %s4776_s24, 512 }
 0x69b   : > { %s4781_s17 = scalar_lea.hbm %s4834_s8, %s2666_s25  ;;  %p2777_p11 = scmp.ne.s32.totalorder %s4776_s24, %s2776_s9 }
 0x69c   : > { %p2784_p1 = scmp.lt.s32.totalorder %s2782_s19, %s2776_s9 }
 0x69d   : > { %p2778_p12 = pnand %p2777_p11, %p2944_p5 }
 0x69e   : > { %2417 = vrot.lane.b32.xlu1 %v4475_v13, %s5065_s26  ;;  %970 = vperm.xlu0 %2761, %v320_v19   ;;  %p2785_p2 = por %p2784_p1, %p2783_p0 }
 0x69f   : > { %p2779_p13 = pneg %p2778_p12 }
 0x6a1   : > { %p2786_p3 = pnand %p2785_p2, %p2779_p13 }
 0x6b0   : > { %v2156_v59 = vpop.permute.xlu0 %2155 }
 0x6b4   : > { %v2158_v48 = vpop.permute.xlu1 %2157  ;;  %v2192_v56 = vpop.permute.xlu0 %2191 }
 0x6b8   : > { %v2194_v43 = vpop.permute.xlu1 %2193  ;;  %v2228_v34 = vpop.permute.xlu0 %2227 }
 0x6bc   : > { %v2230_v18 = vpop.permute.xlu1 %2229  ;;  %v2264_v44 = vpop.permute.xlu0 %2263 }
 0x6c0   : > { %v4510_v38 = vpop.permute.xlu1 %2265  ;;  %v4512_v12 = vpop.permute.xlu0 %2299 }
 0x6c4   : > { %v4514_v21 = vpop.permute.xlu1 %2301  ;;  %v4516_v37 = vpop.permute.xlu0 %2335 }
 0x6c8   : > { %v4518_v16 = vpop.permute.xlu1 %2337  ;;  %v4520_v14 = vpop.permute.xlu0 %2371 }
 0x6cc   : > { %v4522_v19 = vpop.permute.xlu1 %2373  ;;  %v4524_v55 = vpop.permute.xlu0 %2407 }
 0x6d0   : > { %v4526_v47 = vpop.permute.xlu1 %2409  ;;  %v2162_v45 = vpop.permute.xlu0 %2161 }
 0x6d1   : > { %v2167_v42 = vsel %vm491_vm2, %v2156_v59, %v2162_v45  ;;  %v2170_v49 = vsel %vm491_vm2, %v2162_v45, %v2156_v59  ;;  %v5104_v45 = vld [vmem:[#allocation36_spill] sm:$0xff] }
 0x6d2   : > { %v2173_v46 = vmul.f32 %v2170_v49, %v5103_v28  ;;  %v2174_v24 = vmul.f32 %v2167_v42, %v5103_v28  ;;  %v5105_v42 = vld [vmem:[#allocation23_spill] sm:$0xff] }
 0x6d3   : > { %v2149_v59 = vmul.f32 %v4394_v40, %v5105_v42 }
 0x6d4   : > { %v2179_v57 = vmul.f32 %v2173_v46, %v3259_v10  ;;  %v2180_v23 = vmul.f32 %v2174_v24, %v3262_v32  ;;  %v2164_v13 = vpop.permute.xlu1 %2163  ;;  %v2198_v22 = vpop.permute.xlu0 %2197  ;;  %v2150_v24 = vmul.f32 %v4431_v62, %v5105_v42 }
 0x6d5   : > { %v2168_v11 = vsel %vm491_vm2, %v2158_v48, %v2164_v13  ;;  %v2171_v17 = vsel %vm491_vm2, %v2164_v13, %v2158_v48  ;;  %v2203_v5 = vsel %vm548_vm3, %v2192_v56, %v2198_v22  ;;  %v2206_v49 = vsel %vm548_vm3, %v2198_v22, %v2192_v56  ;;  %v5107_v48 = vld [vmem:[#allocation9_spill] sm:$0xff] }
 0x6d6   : > { %v2175_v28 = vmul.f32 %v2171_v17, %v5104_v45  ;;  %v2176_v46 = vmul.f32 %v2168_v11, %v5104_v45  ;;  %v2209_v54 = vmul.f32 %v2206_v49, %v5106_v4  ;;  %v2210_v13 = vmul.f32 %v2203_v5, %v5106_v4 }
 0x6d7   : > { %v2152_v25 = vmul.f32 %v4437_v8, %v5107_v48  ;;  %v2151_v22 = vmul.f32 %v4399_v0, %v5107_v48  ;;  %v2185_v45 = vadd.f32 %v2179_v57, %v2149_v59  ;;  %v2186_v36 = vadd.f32 %v2180_v23, %v2150_v24  ;;  %v5108_v8 = vld [vmem:[#allocation25_spill] sm:$0xff] }
 0x6d8   : > { %v2181_v17 = vmul.f32 %v2175_v28, %v3259_v10  ;;  %v2200_v56 = vpop.permute.xlu1 %2199  ;;  %v2234_v11 = vpop.permute.xlu0 %2233  ;;  %v2182_v4 = vmul.f32 %v2176_v46, %v3262_v32  ;;  %v2215_v5 = vmul.f32 %v2209_v54, %v5081_v30  ;;  %v2216_v28 = vmul.f32 %v2210_v13, %v5082_v33  ;;  %v5109_v46 = vld [vmem:[#allocation11_spill] sm:$0xff] }
 0x6d9   : > { %v2204_v62 = vsel %vm548_vm3, %v2194_v43, %v2200_v56  ;;  %v2207_v40 = vsel %vm548_vm3, %v2200_v56, %v2194_v43  ;;  %v2239_v23 = vsel %vm605_vm4, %v2228_v34, %v2234_v11  ;;  %v2242_v57 = vsel %vm605_vm4, %v2234_v11, %v2228_v34 }
 0x6da   : > { %v2211_v49 = vmul.f32 %v2207_v40, %v5108_v8  ;;  %v2212_v0 = vmul.f32 %v2204_v62, %v5108_v8  ;;  %v2187_v42 = vadd.f32 %v2181_v17, %v2151_v22  ;;  %v2245_v59 = vmul.f32 %v2242_v57, %v5109_v46 }
 0x6db   : > { %v2246_v54 = vmul.f32 %v2239_v23, %v5109_v46  ;;  %v2188_v11 = vadd.f32 %v2182_v4, %v2152_v25  ;;  %v2221_v62 = vadd.f32 %v2215_v5, %v2185_v45  ;;  %v2222_v57 = vadd.f32 %v2216_v28, %v2186_v36 }
 0x6dc   : > { %v2217_v24 = vmul.f32 %v2211_v49, %v5081_v30  ;;  %v2218_v43 = vmul.f32 %v2212_v0, %v5082_v33  ;;  %v2236_v48 = vpop.permute.xlu1 %2235  ;;  %v2270_v56 = vpop.permute.xlu0 %2269  ;;  %v2251_v40 = vmul.f32 %v2245_v59, %v3288_v20 }
 0x6dd   : > { %v2240_v22 = vsel %vm605_vm4, %v2230_v18, %v2236_v48  ;;  %v2243_v13 = vsel %vm605_vm4, %v2236_v48, %v2230_v18  ;;  %v2275_v17 = vsel %vm662_vm5, %v2264_v44, %v2270_v56  ;;  %v2278_v34 = vsel %vm662_vm5, %v2270_v56, %v2264_v44 }
 0x6de   : > { %v2252_v8 = vmul.f32 %v2246_v54, %v3293_v2  ;;  %v2247_v49 = vmul.f32 %v2243_v13, %v3113_v58  ;;  %v2248_v0 = vmul.f32 %v2240_v22, %v3113_v58  ;;  %v2281_v23 = vmul.f32 %v2278_v34, %v5073_v3 }
 0x6df   : > { %v2282_v18 = vmul.f32 %v2275_v17, %v5073_v3  ;;  %v2223_v46 = vadd.f32 %v2217_v24, %v2187_v42  ;;  %v2224_v30 = vadd.f32 %v2218_v43, %v2188_v11  ;;  %v2257_v44 = vadd.f32 %v2251_v40, %v2221_v62 }
 0x6e0   : > { %v2272_v48 = vpop.permute.xlu1 %2271  ;;  %v2306_v33 = vpop.permute.xlu0 %2305  ;;  %v2253_v25 = vmul.f32 %v2247_v49, %v3288_v20  ;;  %v2287_v45 = vmul.f32 %v2281_v23, %v3308_v53  ;;  %v2258_v5 = vadd.f32 %v2252_v8, %v2222_v57  ;;  %v2254_v42 = vmul.f32 %v2248_v0, %v3293_v2 }
 0x6e1   : > { %v2276_v4 = vsel %vm662_vm5, %v4510_v38, %v2272_v48  ;;  %v2279_v58 = vsel %vm662_vm5, %v2272_v48, %v4510_v38  ;;  %v2311_v36 = vsel %vm719_vm6, %v4512_v12, %v2306_v33  ;;  %v2314_v3 = vsel %vm719_vm6, %v2306_v33, %v4512_v12 }
 0x6e2   : > { %v2259_v28 = vadd.f32 %v2253_v25, %v2223_v46  ;;  %v2288_v24 = vmul.f32 %v2282_v18, %v3323_v41  ;;  %v2283_v43 = vmul.f32 %v2279_v58, %v3129_v60  ;;  %v2284_v59 = vmul.f32 %v2276_v4, %v3129_v60 }
 0x6e3   : > { %v2317_v38 = vmul.f32 %v2311_v36, %v3146_v63  ;;  %v2318_v54 = vmul.f32 %v2314_v3, %v3146_v63  ;;  %v2293_v17 = vadd.f32 %v2287_v45, %v2257_v44  ;;  %v2260_v49 = vadd.f32 %v2254_v42, %v2224_v30 }
 0x6e4   : > { %v2308_v56 = vpop.permute.xlu1 %2307  ;;  %v2342_v22 = vpop.permute.xlu0 %2341  ;;  %v2289_v63 = vmul.f32 %v2283_v43, %v3308_v53  ;;  %v2294_v0 = vadd.f32 %v2288_v24, %v2258_v5  ;;  %v2290_v23 = vmul.f32 %v2284_v59, %v3323_v41 }
 0x6e5   : > { %v2312_v33 = vsel %vm719_vm6, %v4514_v21, %v2308_v56  ;;  %v2315_v12 = vsel %vm719_vm6, %v2308_v56, %v4514_v21  ;;  %v2347_v13 = vsel %vm776_vm7, %v4516_v37, %v2342_v22  ;;  %v2350_v60 = vsel %vm776_vm7, %v2342_v22, %v4516_v37 }
 0x6e6   : > { %v2323_v34 = vmul.f32 %v2317_v38, %v3328_v52  ;;  %v2324_v11 = vmul.f32 %v2318_v54, %v3334_v51  ;;  %v2319_v62 = vmul.f32 %v2312_v33, %v5038_v31  ;;  %v2320_v40 = vmul.f32 %v2315_v12, %v5038_v31 }
 0x6e7   : > { %v2353_v21 = vmul.f32 %v2347_v13, %v3165_v6  ;;  %v2354_v8 = vmul.f32 %v2350_v60, %v3165_v6  ;;  %v2295_v57 = vadd.f32 %v2289_v63, %v2259_v28  ;;  %v2296_v13 = vadd.f32 %v2290_v23, %v2260_v49 }
 0x6e8   : > { %v2344_v37 = vpop.permute.xlu1 %2343  ;;  %v2378_v18 = vpop.permute.xlu0 %2377  ;;  %v2329_v46 = vadd.f32 %v2323_v34, %v2293_v17  ;;  %v2330_v45 = vadd.f32 %v2324_v11, %v2294_v0  ;;  %v2325_v4 = vmul.f32 %v2319_v62, %v3328_v52  ;;  %v2326_v58 = vmul.f32 %v2320_v40, %v3334_v51 }
 0x6e9   : > { %v2359_v48 = vmul.f32 %v2353_v21, %v3366_v27  ;;  %v2360_v44 = vmul.f32 %v2354_v8, %v3369_v15  ;;  %v2348_v31 = vsel %vm776_vm7, %v4518_v16, %v2344_v37  ;;  %v2351_v6 = vsel %vm776_vm7, %v2344_v37, %v4518_v16 }
 0x6ea   : > { %v2383_v30 = vsel %vm833_vm8, %v4520_v14, %v2378_v18  ;;  %v2386_v25 = vsel %vm833_vm8, %v2378_v18, %v4520_v14  ;;  %v2355_v3 = vmul.f32 %v2348_v31, %v3173_v9  ;;  %v2356_v5 = vmul.f32 %v2351_v6, %v3173_v9 }
 0x6eb   : > { %v2365_v36 = vadd.f32 %v2359_v48, %v2329_v46  ;;  %v2389_v16 = vmul.f32 %v2383_v30, %v5037_v26  ;;  %v2390_v42 = vmul.f32 %v2386_v25, %v5037_v26  ;;  %v2366_v38 = vadd.f32 %v2360_v44, %v2330_v45  ;;  %v5111_v25 = vld [vmem:[#allocation35_spill] sm:$0xff] }
 0x6ec   : > { %v2380_v28 = vpop.permute.xlu1 %2379  ;;  %v2414_v24 = vpop.permute.xlu0 %2413  ;;  %v2361_v26 = vmul.f32 %v2355_v3, %v3366_v27  ;;  %v2331_v60 = vadd.f32 %v2325_v4, %v2295_v57  ;;  %v2362_v17 = vmul.f32 %v2356_v5, %v3369_v15  ;;  %v2332_v8 = vadd.f32 %v2326_v58, %v2296_v13  ;;  %v5110_v57 = vld [vmem:[#allocation34_spill] sm:$0xff] }
 0x6ed   : > { %v2384_v14 = vsel %vm833_vm8, %v4522_v19, %v2380_v28  ;;  %v2387_v43 = vsel %vm833_vm8, %v2380_v28, %v4522_v19  ;;  %v2419_v59 = vsel %vm890_vm9, %v4524_v55, %v2414_v24  ;;  %v2422_v9 = vsel %vm890_vm9, %v2414_v24, %v4524_v55  ;;  %v5112_v28 = vld [vmem:[#allocation37_spill] sm:$0xff] }
 0x6ee   : > { %v2395_v54 = vmul.f32 %v2389_v16, %v3384_v61  ;;  %v2396_v56 = vmul.f32 %v2390_v42, %v3387_v7  ;;  %v2391_v22 = vmul.f32 %v2384_v14, %v5003_v35  ;;  %v2392_v33 = vmul.f32 %v2387_v43, %v5003_v35 }
 0x6ef   : > { %v2425_v19 = vmul.f32 %v2419_v59, %v5039_v50  ;;  %v2426_v12 = vmul.f32 %v2422_v9, %v5039_v50  ;;  %v2367_v0 = vadd.f32 %v2361_v26, %v2331_v60  ;;  %v2368_v18 = vadd.f32 %v2362_v17, %v2332_v8 }
 0x6f0   : > { %v2401_v55 = vadd.f32 %v2395_v54, %v2365_v36  ;;  %v2416_v63 = vpop.permute.xlu1 %2415  ;;  %v2160_v34 = vpop.permute.xlu0 %2159  ;;  %v2402_v11 = vadd.f32 %v2396_v56, %v2366_v38  ;;  %v2397_v62 = vmul.f32 %v2391_v22, %v3384_v61  ;;  %v2398_v35 = vmul.f32 %v2392_v33, %v3387_v7 }
 0x6f1   : > { %v2431_v40 = vmul.f32 %v4268_v39, %v2425_v19  ;;  %v2432_v21 = vmul.f32 %v4274_v29, %v2426_v12  ;;  %v2420_v50 = vsel %vm890_vm9, %v4526_v47, %v2416_v63  ;;  %v2423_v49 = vsel %vm890_vm9, %v2416_v63, %v4526_v47  ;;  %v5113_v19 = vld [vmem:[#allocation26_spill] sm:$0xff] }
 0x6f2   : > { %v2427_v46 = vmul.f32 %v2420_v50, %v5110_v57  ;;  %v2428_v48 = vmul.f32 %v2423_v49, %v5110_v57  ;;  %v2403_v6 = vadd.f32 %v2397_v62, %v2367_v0  ;;  %v2404_v30 = vadd.f32 %v2398_v35, %v2368_v18  ;;  %v5115_v57 = vld [vmem:[#allocation12_spill] sm:$0xff] }
 0x6f3   : > { %v2437_v23 = vadd.f32 %v2431_v40, %v2401_v55  ;;  %v2438_v37 = vadd.f32 %v2432_v21, %v2402_v11  ;;  %v5114_v55 = vld [vmem:[#allocation10_spill] sm:$0xff] }
 0x6f4   : > { %v2166_v44 = vpop.permute.xlu1 %2165  ;;  %v2196_v31 = vpop.permute.xlu0 %2195  ;;  %v2433_v4 = vmul.f32 %v4268_v39, %v2427_v46  ;;  %v2434_v58 = vmul.f32 %v4274_v29, %v2428_v48 }
 0x6f5   : > { %v2443_v45 = vadd.f32 %v2437_v23, %v5111_v25  ;;  %v2444_v47 = vadd.f32 %v2438_v37, %v5111_v25  ;;  %v2169_v14 = vsel %vm491_vm2, %v2160_v34, %v2166_v44  ;;  %v2172_v43 = vsel %vm491_vm2, %v2166_v44, %v2160_v34  ;;  %v5116_v44 = vld [vmem:[#allocation27_spill] sm:$0xff] }
 0x6f6   : > { %v2439_v36 = vadd.f32 %v2433_v4, %v2403_v6  ;;  %v2440_v3 = vadd.f32 %v2434_v58, %v2404_v30  ;;  %v2177_v12 = vmul.f32 %v2172_v43, %v5113_v19  ;;  %v2178_v13 = vmul.f32 %v2169_v14, %v5113_v19  ;;  %v5118_v30 = vld [vmem:[#allocation19_spill] sm:$0xff] }
 0x6f7   : > { %v2449_v42 = vmax.f32 %v2443_v45, 0.0  ;;  %v2450_v9 = vmax.f32 %v2444_v47, 0.0  ;;  %v2154_v25 = vmul.f32 %v5118_v30, %v5116_v44 }
 0x6f8   : > { %v2202_v5 = vpop.permute.xlu1 %2201  ;;  %v2232_v16 = vpop.permute.xlu0 %2231  ;;  %v2445_v24 = vadd.f32 %v2439_v36, %v5112_v28  ;;  %v2446_v59 = vadd.f32 %v2440_v3, %v5112_v28  ;;  %v2183_v0 = vmul.f32 %v2177_v12, %v3259_v10  ;;  %v2184_v23 = vmul.f32 %v2178_v13, %v3262_v32  ;;  %v5119_v10 = vld [vmem:[#allocation39_spill] sm:$0xff]  ;;  %v5120_v32 = vld [vmem:[#allocation40_spill] sm:$0xff]  ;;  %v5121_v36 = vld [vmem:[#allocation14_spill] sm:$0xff] }
 0x6f9   : > { %v2208_v26 = vsel %vm548_vm3, %v2202_v5, %v2196_v31  ;;  %v2205_v22 = vsel %vm548_vm3, %v2196_v31, %v2202_v5  ;;  %v2455_v60 = vmin.f32 %v2449_v42, 6.0  ;;  %v2456_v34 = vmin.f32 %v2450_v9, 6.0  ;;  %v5117_v31 = vld [vmem:[#allocation7_spill] sm:$0xff] }
 0x6fa   : > { %v2451_v38 = vmax.f32 %v2445_v24, 0.0  ;;  %v2452_v33 = vmax.f32 %v2446_v59, 0.0  ;;  %v2213_v63 = vmul.f32 %v2208_v26, %v5114_v55  ;;  %v2214_v62 = vmul.f32 %v2205_v22, %v5114_v55 }
 0x6fb   : > { %v2153_v6 = vmul.f32 %v5117_v31, %v5116_v44  ;;  %v2190_v24 = vadd.f32 %v2184_v23, %v2154_v25 }
 0x6fc   : > { %v2238_v54 = vpop.permute.xlu1 %2237  ;;  %v2268_v56 = vpop.permute.xlu0 %2267  ;;  %v2457_v17 = vmin.f32 %v2451_v38, 6.0  ;;  %v2458_v11 = vmin.f32 %v2452_v33, 6.0  ;;  %v2219_v45 = vmul.f32 %v2213_v63, %v5119_v10  ;;  %v2220_v4 = vmul.f32 %v2214_v62, %v5120_v32  ;;  %v5122_v38 = vld [vmem:[#allocation15_spill] sm:$0xff] }
 0x6fd   : > { %v2241_v40 = vsel %vm605_vm4, %v2232_v16, %v2238_v54  ;;  %v2244_v21 = vsel %vm605_vm4, %v2238_v54, %v2232_v16  ;;  %v2189_v28 = vadd.f32 %v2183_v0, %v2153_v6 }
 0x6fe   : > { %v2681_v50 = vpack.c.bf16 %v2457_v17, %v2455_v60  ;;  %v2679_v49 = vpack.c.bf16 %v2458_v11, %v2456_v34  ;;  %v2249_v46 = vmul.f32 %v2244_v21, %v5115_v57  ;;  %v2250_v48 = vmul.f32 %v2241_v40, %v5115_v57 }
 0x6ff   : > { %v2225_v59 = vadd.f32 %v2219_v45, %v2189_v28  ;;  %v2226_v9 = vadd.f32 %v2220_v4, %v2190_v24  ;;  %v5126_v45 = vld [vmem:[#allocation38_spill] sm:$0xff]  ;;  %v5130_v24 = vld [vmem:[#allocation28_spill] sm:$0xff] }
 0x700   : > { %v2274_v8 = vpop.permute.xlu1 %2273  ;;  %v2304_v35 = vpop.permute.xlu0 %2303  ;;  %2680 = vmatprep.subr.bf16.mxu0 %v2679_v49  ;;  %v2255_v14 = vmul.f32 %v2249_v46, %v3288_v20  ;;  %v2256_v43 = vmul.f32 %v2250_v48, %v3293_v2  ;;  %v5123_v20 = vld [vmem:[#allocation16_spill] sm:$0xff]  ;;  %v5125_v48 = vld [vmem:[#allocation18_spill] sm:$0xff] }
 0x701   : > { %v2277_v37 = vsel %vm662_vm5, %v2268_v56, %v2274_v8  ;;  %v2280_v18 = vsel %vm662_vm5, %v2274_v8, %v2268_v56  ;;  %2682 = vmatpush1.bf16.msra.mxu0 %v2681_v50 }
 0x702   : > { %v2285_v3 = vmul.f32 %v2280_v18, %v5121_v36  ;;  %v2286_v5 = vmul.f32 %v2277_v37, %v5121_v36  ;;  %v2261_v17 = vadd.f32 %v2255_v14, %v2225_v59  ;;  %v2262_v55 = vadd.f32 %v2256_v43, %v2226_v9  ;;  %v5131_v43 = vld [vmem:[#allocation29_spill] sm:$0xff] }
 0x703   : > { %v5132_v9 = vld [vmem:[#allocation33_spill] sm:$0xff] }
 0x704   : > { %v2310_v58 = vpop.permute.xlu1 %2309  ;;  %v2340_v47 = vpop.permute.xlu0 %2339  ;;  %v2291_v22 = vmul.f32 %v2285_v3, %v3308_v53  ;;  %v2292_v33 = vmul.f32 %v2286_v5, %v3323_v41  ;;  %v5127_v5 = vld [vmem:[#allocation30_spill] sm:$0xff] }
 0x705   : > { %v2313_v16 = vsel %vm719_vm6, %v2304_v35, %v2310_v58  ;;  %v2316_v42 = vsel %vm719_vm6, %v2310_v58, %v2304_v35  ;;  %v5124_v35 = vld [vmem:[#allocation17_spill] sm:$0xff] }
 0x706   : > { %v2321_v26 = vmul.f32 %v2313_v16, %v5122_v38  ;;  %v2322_v54 = vmul.f32 %v2316_v42, %v5122_v38  ;;  %v2297_v11 = vadd.f32 %v2291_v22, %v2261_v17  ;;  %v2298_v41 = vadd.f32 %v2292_v33, %v2262_v55  ;;  %v5129_v42 = vld [vmem:[#allocation8_spill] sm:$0xff]  ;;  %v2774_v33 = vld [vmem:[%s2973_s10 + $0x8] sm:$0xff]  ;;  %v5136_v17 = vld [vmem:[#allocation31_spill] sm:$0xff] }
 0x708   : > { %v2346_v56 = vpop.permute.xlu1 %2345  ;;  %v2376_v60 = vpop.permute.xlu0 %2375  ;;  %v2327_v63 = vmul.f32 %v2321_v26, %v3328_v52  ;;  %v2328_v34 = vmul.f32 %v2322_v54, %v3334_v51  ;;  %v2773_v26 = vld [vmem:[%s2973_s10] sm:$0xff] }
 0x709   : > { %v2349_v19 = vsel %vm776_vm7, %v2340_v47, %v2346_v56  ;;  %v2352_v12 = vsel %vm776_vm7, %v2346_v56, %v2340_v47  ;;  %v5133_v56 = vld [vmem:[#allocation5_spill] sm:$0xff] }
 0x70a   : > { %v2357_v13 = vmul.f32 %v2349_v19, %v5123_v20  ;;  %v2358_v2 = vmul.f32 %v2352_v12, %v5123_v20  ;;  %v2333_v52 = vadd.f32 %v2327_v63, %v2297_v11  ;;  %v2334_v0 = vadd.f32 %v2328_v34, %v2298_v41  ;;  %v5134_v12 = vld [vmem:[#allocation32_spill] sm:$0xff] }
 0x70c   : > { %v2382_v53 = vpop.permute.xlu1 %2381  ;;  %v2363_v21 = vmul.f32 %v2357_v13, %v3366_v27  ;;  %v2364_v8 = vmul.f32 %v2358_v2, %v3369_v15  ;;  %v2412_v37 = vpop.permute.xlu0 %2411  ;;  %v5135_v13 = vld [vmem:[#allocation42_spill] sm:$0xff]  ;;  %v2775_v2 = vld [vmem:[%s2973_s10 + $0x10] sm:$0xff] }
 0x70d   : > { %v2385_v62 = vsel %vm833_vm8, %v2376_v60, %v2382_v53  ;;  %v2388_v40 = vsel %vm833_vm8, %v2382_v53, %v2376_v60 }
 0x70e   : > { %v2393_v50 = vmul.f32 %v2385_v62, %v5124_v35  ;;  %v2394_v49 = vmul.f32 %v2388_v40, %v5124_v35  ;;  %v2369_v15 = vadd.f32 %v2363_v21, %v2333_v52  ;;  %v2370_v46 = vadd.f32 %v2364_v8, %v2334_v0  ;;  %v5137_v21 = vld [vmem:[#allocation13_spill] sm:$0xff] }
 0x70f   : > { %v5138_v35 = vld [vmem:[#allocation41_spill] sm:$0xff] }
 0x710   : > { %v2399_v51 = vmul.f32 %v2393_v50, %v3384_v61  ;;  %v2400_v23 = vmul.f32 %v2394_v49, %v3387_v7  ;;  %v2418_v18 = vpop.permute.xlu1 %2417 }
 0x711   : > { %v2421_v57 = vsel %vm890_vm9, %v2412_v37, %v2418_v18  ;;  %v2424_v27 = vsel %vm890_vm9, %v2418_v18, %v2412_v37 }
 0x712   : > { %v2429_v44 = vmul.f32 %v2421_v57, %v5125_v48  ;;  %v2430_v31 = vmul.f32 %v2424_v27, %v5125_v48  ;;  %v2405_v6 = vadd.f32 %v2399_v51, %v2369_v15  ;;  %v2406_v30 = vadd.f32 %v2400_v23, %v2370_v46 }
 0x714   : > { %v2435_v61 = vmul.f32 %v4268_v39, %v2429_v44  ;;  %v2436_v7 = vmul.f32 %v4274_v29, %v2430_v31  ;;  %v5128_v39 = vld [vmem:[#allocation6_spill] sm:$0xff] }
 0x716   : > { %v2441_v25 = vadd.f32 %v2435_v61, %v2405_v6  ;;  %v2442_v10 = vadd.f32 %v2436_v7, %v2406_v30 }
 0x718   : > { %v2448_v32 = vadd.f32 %v2442_v10, %v5126_v45  ;;  %v2447_v1 = vadd.f32 %v2441_v25, %v5126_v45 }
 0x71a   : > { %v2454_v4 = vmax.f32 %v2448_v32, 0.0  ;;  %v2453_v58 = vmax.f32 %v2447_v1, 0.0 }
 0x71c   : > { %v2460_v47 = vmin.f32 %v2454_v4, 6.0  ;;  %v2459_v36 = vmin.f32 %v2453_v58, 6.0 }
 0x71d   : > { %v971_v3 = vpop.permute.xlu0 %970 }
 0x71e   : > { %v1044_v16 = vadd.f32 %v5127_v5, %v971_v3  ;;  %v1046_v29 = vadd.f32 %v5128_v39, %v971_v3  ;;  %v1538_v28 = vadd.f32 %v5129_v42, %v971_v3  ;;  %v1540_v14 = vadd.f32 %v5130_v24, %v971_v3  ;;  %2465 = vmatprep.subr.mxu0 %v2460_v47 }
 0x71f   : > { %v2033_v59 = vadd.f32 %v5131_v43, %v971_v3  ;;  %v2035_v38 = vadd.f32 %v5132_v9, %v971_v3  ;;  %2466 = vmatpush1.msra.mxu0 %v2459_v36 }
 0x720   : > { %v1049_v54 = vadd.f32 %v2773_v26, %v1044_v16  ;;  %v1050_v22 = vadd.f32 %v1046_v29, %v5133_v56  ;;  %v1543_v19 = vadd.f32 %v2774_v33, %v1538_v28  ;;  %v1544_v20 = vadd.f32 %v1540_v14, %v5134_v12  ;;  %2656 = vmatmul.mubr.msk.f32.vlgmr.msra.gmra.mrb[14].mxu0 %vm973_vm10, %v5135_v13 }
 0x721   : > { %v2038_v60 = vadd.f32 %v2775_v2, %v2033_v59  ;;  %v2039_v55 = vadd.f32 %v2035_v38, %v5136_v17 }
 0x722   : > { %v1053_v63 = vcombine.low %v1049_v54, %v1050_v22  ;;  %v1547_v34 = vcombine.low %v1543_v19, %v1544_v20 }
 0x723   : > { %v2042_v53 = vcombine.low %v2038_v60, %v2039_v55 }
 0x724   : > { %1055 = vst [vmem:[%s301_s23] sm:$0xff] %v1053_v63  ;;  %2641 = vst [vmem:[%s301_s23 + $0x8] sm:$0xff] %v1547_v34 }
 0x725   : > { %2649 = vst [vmem:[%s301_s23 + $0x10] sm:$0xff] %v2042_v53 }
 0x7f3   : > { %v2527_v11 = vpop.f32.mrb[14].mxu0 }
 0x7f4   : > { %v2528_v41 = vadd.f32 %v2527_v11, %v971_v3  ;;  %v2529_v62 = vpop.f32.mrb[15].mxu0 }
 0x7f5   : > { %v2530_v40 = vadd.f32 %v2529_v62, %v971_v3 }
 0x7f6   : > { %v2533_v8 = vadd.f32 %v5137_v21, %v2528_v41 }
 0x7f7   : > { %v2534_v50 = vadd.f32 %v2530_v40, %v5138_v35 }
 0x7f9   : > { %v2537_v49 = vcombine.low %v2533_v8, %v2534_v50 }
 0x7fb   : > { %2657 = vst [vmem:[%s301_s23 + $0x18] sm:$0xff] %v2537_v49 }
 0x7fc   : > { %2789 = shalt.err (!%p2786_p3)
}
 0x7fd   : > { %s2790_s20 = scalar_lea.hbm %s4781_s17, 512  ;;  %s2794_s23 = scalar_lea.hbm %s4834_s8, 1024 }
 0x7fe   : > { %p2791_p4 = scmp.ne.s32.totalorder %s4781_s17, %s2790_s20  ;;  %p2795_p9 = scmp.lt.u32.totalorder %s4781_s17, %s4834_s8 }
 0x7ff   : > { %p2796_p10 = scmp.lt.u32.totalorder %s2794_s23, %s2790_s20  ;;  %p2798_p12 = scmp.lt.u32.totalorder %s2790_s20, %s4781_s17 }
 0x800   : > { %p2792_p7 = pnand %p2791_p4, %p2944_p5 }
 0x801   : > { %p2797_p11 = por %p2796_p10, %p2795_p9 }
 0x802   : > { %p2793_p8 = pneg %p2792_p7 }
 0x803   : > { %p2799_p13 = por %p2798_p12, %p2797_p11 }
 0x805   : > { %p2800_p0 = pnand %p2799_p13, %p2793_p8 }
 0x807   : > { %2803 = shalt.err (!%p2800_p0)
}
 0x808   : > { %s2859_s26 = smov 128   ;;  %s2860_s9 = smov 8  }
 0x809   : > { %2683 = dma.vmem_to_hbm [thread:$0]  (%p2944_p5), %s4776_s24, 512, %s4781_s17, %s4785_s18, %s2859_s26, %s2859_s26, %s2860_s9  }
 0x80a PF: > { %p2689_p1 = scmp.ge.s32.totalorder %s2838_s30, 2  ;;  %s2571_s12 = sand.u32 1, %s2826_s27  }
 0x80b   : > { %s2572_s13 = scalar_lea.sflag [#allocation3], %s2571_s12 }
 0x80c   : > { %p2686_p2 = pnand %p2689_p1, %p2948_p6 }
 0x80e   : > { %2821 = dma.done.wait (!%p2686_p2), %s2572_s13, 512  }
 0x80f   : > { %2823 = vsyncadd (!%p2686_p2), %s2572_s13, 4294966784  ;;  %p18_p3 = scmp.ge.s32.totalorder %s2931_s11, 4   ;;  %s5139_s27 = smov %s2830_s28 }
 0x810   : > { %s5140_s28 = smov %s2834_s29  ;;  %s5141_s29 = smov %s2942_s14 }
 0x811   : > { %s5142_s30 = smov %s2931_s11  ;;  %20 = sbr.rel (!%p18_p3) target bundleno = 3 (0x3), region = 93 }
 0x818   :  { %2577 = vsyncpa [#allocation3], 1 }
 0x819   :  { %2579 = vsyncpa [#allocation3 + $0x1], 1 }

</bundles_post_ra>
